<compile_context>
chip_gen: v7x
topology: tpu7x:2x2x1
jax: 0.10.0
libtpu: 0.0.40
codegen_flags: <defaults>
</compile_context>

<pallas_src>
import functools

import jax
import jax.numpy as jnp
from jax import lax
from jax.experimental import pallas as pl
from jax.experimental.pallas import tpu as pltpu


# ----------------------------- in-kernel helpers -----------------------------

def _erf(x):
    # Abramowitz & Stegun 7.1.26 rational approximation (|err| < 1.5e-7);
    # built only from exp / mul / add / div / select so it lowers cleanly in Mosaic.
    a1, a2, a3, a4, a5 = 0.254829592, -0.284496736, 1.421413741, -1.453152027, 1.061405429
    p = 0.3275911
    ax = jnp.abs(x)
    t = 1.0 / (1.0 + p * ax)
    poly = ((((a5 * t + a4) * t + a3) * t + a2) * t + a1) * t
    y = 1.0 - poly * jnp.exp(-ax * ax)
    return jnp.where(x >= 0, y, -y)


def _gelu_exact(x):
    # PyTorch nn.GELU (erf form): 0.5 * x * (1 + erf(x / sqrt(2)))
    return 0.5 * x * (1.0 + _erf(x * 0.7071067811865476))


# ------------------------------- fused kernel -------------------------------

def _ff_kernel(x_ref, w1_ref, wd_ref, w2_ref, out_ref, pad_ref, *, H, W):
    # x_ref:   [1, C, N]   NCHW with spatial flattened (N = H*W, lane-dense)
    # w1_ref:  [Ch, C]     1x1 conv #1 weight (PyTorch [Ch, C, 1, 1] squeezed)
    # wd_ref:  [3, 3, Ch]  depthwise 3x3 taps (PyTorch [Ch, 1, 3, 3] -> (ki, kj, Ch))
    # w2_ref:  [C, Ch]     1x1 conv #2 weight (PyTorch [C, Ch, 1, 1] squeezed)
    # out_ref: [1, C, N]   NCHW output, lane-dense store
    # pad_ref: VMEM scratch [H+2, W+2, Ch] zero-padded hidden activations
    Ch = w1_ref.shape[0]

    # ---- 1x1 conv #1 (dim -> dim*mult), channels-first & lane-dense ----
    # [Ch, C] @ [C, N] -> [Ch, N] with f32 MXU accumulation.
    h1_t = jnp.dot(w1_ref[...], x_ref[0], preferred_element_type=jnp.float32)
    h1_t = _gelu_exact(h1_t)                       # GELU on the 256-lane view

    # ---- layout change for the depthwise: [Ch, N] -> [H, W, Ch] (one XLU transpose) ----
    h1 = h1_t.T.reshape(H, W, Ch)                  # reshape is a free view (W % 8 == 0)

    # ---- padded hidden activations in VMEM scratch (conv padding=1) ----
    # Halo-only zeroing each step; the interior is fully overwritten below.
    zrow = jnp.zeros((1, W + 2, Ch), jnp.float32)
    pad_ref[0:1, :, :] = zrow
    pad_ref[H + 1:H + 2, :, :] = zrow
    zcol = jnp.zeros((H, 1, Ch), jnp.float32)
    pad_ref[1:H + 1, 0:1, :] = zcol
    pad_ref[1:H + 1, W + 1:W + 2, :] = zcol
    pad_ref[1:H + 1, 1:W + 1, :] = h1

    # ---- 3x3 depthwise conv ----
    wd = wd_ref[...]                               # [3, 3, Ch] taps, loaded once
    acc = jnp.zeros((H, W, Ch), jnp.float32)
    for dj in range(3):
        # One sublane-offset slice per dj (3 relayouts total instead of 9) ...
        slab = pad_ref[:, dj:dj + W, :]            # [H+2, W, Ch]
        for di in range(3):
            # ... H shifts are free leading-dim slices of the loaded slab.
            acc = acc + slab[di:di + H] * wd[di, dj]

    # ---- GELU + 1x1 conv #2 (dim*mult -> dim), back to channels-first ----
    h2_t = acc.reshape(H * W, Ch).T                # [Ch, N] (one XLU transpose)
    h2_t = _gelu_exact(h2_t)                       # GELU on the 256-lane view
    out = jnp.dot(w2_ref[...], h2_t, preferred_element_type=jnp.float32)   # [C, N]
    out_ref[0] = out.astype(out_ref.dtype)         # unmasked, lane-dense NCHW store


# ---------------------------------- wrapper ----------------------------------

def feedforward_pallas(x_nchw, params):
    B, C, H, W = x_nchw.shape
    Ch = params["w1"].shape[0]
    N = H * W
    f32 = jnp.float32

    # Metadata-only reshape: stays NCHW, spatial flattened so the last (lane) dim of the
    # x / out blocks is H*W (a multiple of 128 here) -> lane-dense loads and stores.
    x_flat = x_nchw.reshape(B, C, N).astype(f32)

    kern = functools.partial(_ff_kernel, H=H, W=W)
    out_flat = pl.pallas_call(
        kern,
        out_shape=jax.ShapeDtypeStruct((B, C, N), f32),
        grid=(B,),
        in_specs=[
            pl.BlockSpec((1, C, N), lambda b: (b, 0, 0)),     # x (NCHW, flattened)
            pl.BlockSpec((Ch, C), lambda b: (0, 0)),          # 1x1 conv #1 weight
            pl.BlockSpec((3, 3, Ch), lambda b: (0, 0, 0)),    # depthwise 3x3 taps
            pl.BlockSpec((C, Ch), lambda b: (0, 0)),          # 1x1 conv #2 weight
        ],
        out_specs=pl.BlockSpec((1, C, N), lambda b: (b, 0, 0)),
        scratch_shapes=[pltpu.VMEM((H + 2, W + 2, Ch), f32)],
        compiler_params=pltpu.CompilerParams(dimension_semantics=("parallel",)),
    )(x_flat,
      params["w1"].astype(f32),
      params["wd"].astype(f32),
      params["w2"].astype(f32))

    return out_flat.reshape(B, C, H, W)            # metadata-only, already NCHW


# ------------------------------ pure-JAX reference ------------------------------

def feedforward_ref(x_nchw, params):
    hp = lax.Precision.HIGHEST
    Ch = params["wd"].shape[-1]
    x = x_nchw.transpose(0, 2, 3, 1).astype(jnp.float32)              # NHWC
    h = jnp.einsum("bhwc,oc->bhwo", x, params["w1"], precision=hp)    # 1x1 conv #1
    h = jax.nn.gelu(h, approximate=False)
    wdep = params["wd"][:, :, None, :]                                # HWIO, I=1, O=Ch
    h = lax.conv_general_dilated(
        h, wdep, window_strides=(1, 1), padding=((1, 1), (1, 1)),
        dimension_numbers=("NHWC", "HWIO", "NHWC"),
        feature_group_count=Ch, precision=hp)                         # depthwise 3x3
    h = jax.nn.gelu(h, approximate=False)
    out = jnp.einsum("bhwd,od->bhwo", h, params["w2"], precision=hp)  # 1x1 conv #2
    return out.transpose(0, 3, 1, 2)                                  # back to NCHW


# ------------------------------------- main -------------------------------------

if __name__ == "__main__":
    B, dim, H, W = 2, 32, 16, 16
    mult = 2
    hidden = dim * mult

    key = jax.random.PRNGKey(0)
    ks = jax.random.split(key, 4)
    # Weights stored in PyTorch-native (squeezed) layouts:
    #   w1: [Ch, C]  (Conv2d(dim, dim*mult, 1).weight[:, :, 0, 0])
    #   wd: [3, 3, Ch] (Conv2d(..., groups=Ch).weight.permute(2, 3, 0) squeezed)
    #   w2: [C, Ch]  (Conv2d(dim*mult, dim, 1).weight[:, :, 0, 0])
    params = {
        "w1": 0.2 * jax.random.normal(ks[0], (hidden, dim), jnp.float32),
        "wd": 0.3 * jax.random.normal(ks[1], (3, 3, hidden), jnp.float32),
        "w2": 0.2 * jax.random.normal(ks[2], (dim, hidden), jnp.float32),
    }
    x_in = jax.random.normal(ks[3], (B, dim, H, W), jnp.float32)

    out = feedforward_pallas(x_in, params)
    out = jax.block_until_ready(out)
    assert out.shape == (B, dim, H, W)

    with jax.default_matmul_precision("float32"):
        ref = feedforward_ref(x_in, params)
    max_err = float(jnp.max(jnp.abs(out - ref)))
    if max_err > 2e-3:
        raise AssertionError(f"Pallas result mismatch vs reference: max abs err = {max_err}")

    print("KERNEL_OK")
</pallas_src>

<mosaic_0001>
module attributes {stable_mosaic.version = 11 : i64} {
  func.func @_ff_kernel(%arg0: i32, %arg1: memref<1x32x256xf32, #tpu.memory_space<vmem>>, %arg2: memref<64x32xf32, #tpu.memory_space<vmem>>, %arg3: memref<3x3x64xf32, #tpu.memory_space<vmem>>, %arg4: memref<32x64xf32, #tpu.memory_space<vmem>>, %arg5: memref<1x32x256xf32, #tpu.memory_space<vmem>>, %arg6: memref<18x18x64xf32, #tpu.memory_space<vmem>>) attributes {dimension_semantics = [#tpu.dimension_semantics<parallel>], iteration_bounds = array<i64: 2>, scalar_prefetch = 0 : i64, scratch_operands = 1 : i64, tpu.core_type = #tpu.core_type<tc>, window_params = [{transform_indices = @transform_0, window_bounds = array<i64: 1, 32, 256>}, {pipeline_mode = #tpu.pipeline_mode<synchronous>, transform_indices = @transform_1, window_bounds = array<i64: 64, 32>}, {pipeline_mode = #tpu.pipeline_mode<synchronous>, transform_indices = @transform_2, window_bounds = array<i64: 3, 3, 64>}, {pipeline_mode = #tpu.pipeline_mode<synchronous>, transform_indices = @transform_3, window_bounds = array<i64: 32, 64>}, {transform_indices = @transform_4, window_bounds = array<i64: 1, 32, 256>}]} {
    %c0 = arith.constant 0 : index
    %c0_0 = arith.constant 0 : index
    %0 = vector.load %arg2[%c0, %c0_0] : memref<64x32xf32, #tpu.memory_space<vmem>>, vector<64x32xf32>
    %c0_1 = arith.constant 0 : index
    %c0_2 = arith.constant 0 : index
    %c0_3 = arith.constant 0 : index
    %1 = vector.load %arg1[%c0_1, %c0_2, %c0_3] : memref<1x32x256xf32, #tpu.memory_space<vmem>>, vector<1x32x256xf32>
    %2 = vector.shape_cast %1 : vector<1x32x256xf32> to vector<32x256xf32>
    %cst = arith.constant dense<0.000000e+00> : vector<64x256xf32>
    %3 = tpu.matmul %0, %2, %cst {dimension_numbers = #tpu.dot_dimension_numbers<[1], [0], [0], [1], [0, 0, 1, 1], [], []>} : vector<64x32xf32>, vector<32x256xf32>, vector<64x256xf32> -> vector<64x256xf32>
    %cst_4 = arith.constant 5.000000e-01 : f32
    %4 = vector.broadcast %cst_4 : f32 to vector<64x256xf32>
    %5 = arith.mulf %4, %3 : vector<64x256xf32>
    %cst_5 = arith.constant 0.707106769 : f32
    %6 = vector.broadcast %cst_5 : f32 to vector<64x256xf32>
    %7 = arith.mulf %3, %6 : vector<64x256xf32>
    %8 = math.absf %7 : vector<64x256xf32>
    %cst_6 = arith.constant 0.327591091 : f32
    %9 = vector.broadcast %cst_6 : f32 to vector<64x256xf32>
    %10 = arith.mulf %9, %8 : vector<64x256xf32>
    %cst_7 = arith.constant 1.000000e+00 : f32
    %11 = vector.broadcast %cst_7 : f32 to vector<64x256xf32>
    %12 = arith.addf %11, %10 : vector<64x256xf32>
    %cst_8 = arith.constant 1.000000e+00 : f32
    %13 = vector.broadcast %cst_8 : f32 to vector<64x256xf32>
    %14 = arith.divf %13, %12 : vector<64x256xf32>
    %cst_9 = arith.constant 1.06140542 : f32
    %15 = vector.broadcast %cst_9 : f32 to vector<64x256xf32>
    %16 = arith.mulf %15, %14 : vector<64x256xf32>
    %cst_10 = arith.constant -1.45315206 : f32
    %17 = vector.broadcast %cst_10 : f32 to vector<64x256xf32>
    %18 = arith.addf %16, %17 : vector<64x256xf32>
    %19 = arith.mulf %18, %14 : vector<64x256xf32>
    %cst_11 = arith.constant 1.42141378 : f32
    %20 = vector.broadcast %cst_11 : f32 to vector<64x256xf32>
    %21 = arith.addf %19, %20 : vector<64x256xf32>
    %22 = arith.mulf %21, %14 : vector<64x256xf32>
    %cst_12 = arith.constant -0.284496725 : f32
    %23 = vector.broadcast %cst_12 : f32 to vector<64x256xf32>
    %24 = arith.addf %22, %23 : vector<64x256xf32>
    %25 = arith.mulf %24, %14 : vector<64x256xf32>
    %cst_13 = arith.constant 0.254829586 : f32
    %26 = vector.broadcast %cst_13 : f32 to vector<64x256xf32>
    %27 = arith.addf %25, %26 : vector<64x256xf32>
    %28 = arith.mulf %27, %14 : vector<64x256xf32>
    %cst_14 = arith.constant 0.000000e+00 : f32
    %29 = vector.broadcast %cst_14 : f32 to vector<64x256xf32>
    %30 = arith.subf %29, %8 : vector<64x256xf32>
    %31 = arith.mulf %30, %8 : vector<64x256xf32>
    %32 = math.exp %31 : vector<64x256xf32>
    %33 = arith.mulf %28, %32 : vector<64x256xf32>
    %cst_15 = arith.constant 1.000000e+00 : f32
    %34 = vector.broadcast %cst_15 : f32 to vector<64x256xf32>
    %35 = arith.subf %34, %33 : vector<64x256xf32>
    %cst_16 = arith.constant 0.000000e+00 : f32
    %36 = vector.broadcast %cst_16 : f32 to vector<64x256xf32>
    %37 = arith.cmpf oge, %7, %36 : vector<64x256xf32>
    %cst_17 = arith.constant 0.000000e+00 : f32
    %38 = vector.broadcast %cst_17 : f32 to vector<64x256xf32>
    %39 = arith.subf %38, %35 : vector<64x256xf32>
    %40 = arith.select %37, %35, %39 : vector<64x256xi1>, vector<64x256xf32>
    %cst_18 = arith.constant 1.000000e+00 : f32
    %41 = vector.broadcast %cst_18 : f32 to vector<64x256xf32>
    %42 = arith.addf %41, %40 : vector<64x256xf32>
    %43 = arith.mulf %5, %42 : vector<64x256xf32>
    %44 = tpu.transpose %43, [1, 0] : vector<64x256xf32> -> vector<256x64xf32>
    %45 = vector.shape_cast %44 : vector<256x64xf32> to vector<16x16x64xf32>
    %cst_19 = arith.constant 0.000000e+00 : f32
    %46 = vector.broadcast %cst_19 : f32 to vector<1x18x64xf32>
    %c0_20 = arith.constant 0 : index
    %c0_21 = arith.constant 0 : index
    %c0_22 = arith.constant 0 : index
    %47 = vector.load %arg6[%c0_20, %c0_21, %c0_22] : memref<18x18x64xf32, #tpu.memory_space<vmem>>, vector<1x18x64xf32>
    tpu.vector_store %arg6[%c0_20, %c0_21, %c0_22], %46 {strides = array<i32>} : memref<18x18x64xf32, #tpu.memory_space<vmem>>, vector<1x18x64xf32>,
    %c17 = arith.constant 17 : index
    %c0_23 = arith.constant 0 : index
    %c0_24 = arith.constant 0 : index
    %48 = vector.load %arg6[%c17, %c0_23, %c0_24] : memref<18x18x64xf32, #tpu.memory_space<vmem>>, vector<1x18x64xf32>
    tpu.vector_store %arg6[%c17, %c0_23, %c0_24], %46 {strides = array<i32>} : memref<18x18x64xf32, #tpu.memory_space<vmem>>, vector<1x18x64xf32>,
    %cst_25 = arith.constant 0.000000e+00 : f32
    %49 = vector.broadcast %cst_25 : f32 to vector<16x1x64xf32>
    %c1 = arith.constant 1 : index
    %c0_26 = arith.constant 0 : index
    %c0_27 = arith.constant 0 : index
    %50 = vector.load %arg6[%c1, %c0_26, %c0_27] : memref<18x18x64xf32, #tpu.memory_space<vmem>>, vector<16x1x64xf32>
    tpu.vector_store %arg6[%c1, %c0_26, %c0_27], %49 {strides = array<i32>} : memref<18x18x64xf32, #tpu.memory_space<vmem>>, vector<16x1x64xf32>,
    %c1_28 = arith.constant 1 : index
    %c17_29 = arith.constant 17 : index
    %c0_30 = arith.constant 0 : index
    %51 = vector.load %arg6[%c1_28, %c17_29, %c0_30] : memref<18x18x64xf32, #tpu.memory_space<vmem>>, vector<16x1x64xf32>
    tpu.vector_store %arg6[%c1_28, %c17_29, %c0_30], %49 {strides = array<i32>} : memref<18x18x64xf32, #tpu.memory_space<vmem>>, vector<16x1x64xf32>,
    %c1_31 = arith.constant 1 : index
    %c1_32 = arith.constant 1 : index
    %c0_33 = arith.constant 0 : index
    %52 = vector.load %arg6[%c1_31, %c1_32, %c0_33] : memref<18x18x64xf32, #tpu.memory_space<vmem>>, vector<16x16x64xf32>
    tpu.vector_store %arg6[%c1_31, %c1_32, %c0_33], %45 {strides = array<i32>} : memref<18x18x64xf32, #tpu.memory_space<vmem>>, vector<16x16x64xf32>,
    %c0_34 = arith.constant 0 : index
    %c0_35 = arith.constant 0 : index
    %c0_36 = arith.constant 0 : index
    %53 = vector.load %arg3[%c0_34, %c0_35, %c0_36] : memref<3x3x64xf32, #tpu.memory_space<vmem>>, vector<3x3x64xf32>
    %cst_37 = arith.constant 0.000000e+00 : f32
    %54 = vector.broadcast %cst_37 : f32 to vector<16x16x64xf32>
    %c0_38 = arith.constant 0 : index
    %c0_39 = arith.constant 0 : index
    %c0_40 = arith.constant 0 : index
    %55 = vector.load %arg6[%c0_38, %c0_39, %c0_40] : memref<18x18x64xf32, #tpu.memory_space<vmem>>, vector<18x16x64xf32>
    %56 = vector.extract_strided_slice %55 {offsets = [0, 0, 0], sizes = [16, 16, 64], strides = [1, 1, 1]} : vector<18x16x64xf32> to vector<16x16x64xf32>
    %57 = vector.extract_strided_slice %53 {offsets = [0, 0, 0], sizes = [1, 1, 64], strides = [1, 1, 1]} : vector<3x3x64xf32> to vector<1x1x64xf32>
    %58 = vector.shape_cast %57 : vector<1x1x64xf32> to vector<64xf32>
    %59 = vector.shape_cast %58 : vector<64xf32> to vector<1x1x64xf32>
    %60 = vector.broadcast %59 : vector<1x1x64xf32> to vector<16x16x64xf32>
    %61 = arith.mulf %56, %60 : vector<16x16x64xf32>
    %62 = arith.addf %54, %61 : vector<16x16x64xf32>
    %63 = vector.extract_strided_slice %55 {offsets = [1, 0, 0], sizes = [16, 16, 64], strides = [1, 1, 1]} : vector<18x16x64xf32> to vector<16x16x64xf32>
    %64 = vector.extract_strided_slice %53 {offsets = [1, 0, 0], sizes = [1, 1, 64], strides = [1, 1, 1]} : vector<3x3x64xf32> to vector<1x1x64xf32>
    %65 = vector.shape_cast %64 : vector<1x1x64xf32> to vector<64xf32>
    %66 = vector.shape_cast %65 : vector<64xf32> to vector<1x1x64xf32>
    %67 = vector.broadcast %66 : vector<1x1x64xf32> to vector<16x16x64xf32>
    %68 = arith.mulf %63, %67 : vector<16x16x64xf32>
    %69 = arith.addf %62, %68 : vector<16x16x64xf32>
    %70 = vector.extract_strided_slice %55 {offsets = [2, 0, 0], sizes = [16, 16, 64], strides = [1, 1, 1]} : vector<18x16x64xf32> to vector<16x16x64xf32>
    %71 = vector.extract_strided_slice %53 {offsets = [2, 0, 0], sizes = [1, 1, 64], strides = [1, 1, 1]} : vector<3x3x64xf32> to vector<1x1x64xf32>
    %72 = vector.shape_cast %71 : vector<1x1x64xf32> to vector<64xf32>
    %73 = vector.shape_cast %72 : vector<64xf32> to vector<1x1x64xf32>
    %74 = vector.broadcast %73 : vector<1x1x64xf32> to vector<16x16x64xf32>
    %75 = arith.mulf %70, %74 : vector<16x16x64xf32>
    %76 = arith.addf %69, %75 : vector<16x16x64xf32>
    %c0_41 = arith.constant 0 : index
    %c1_42 = arith.constant 1 : index
    %c0_43 = arith.constant 0 : index
    %77 = vector.load %arg6[%c0_41, %c1_42, %c0_43] : memref<18x18x64xf32, #tpu.memory_space<vmem>>, vector<18x16x64xf32>
    %78 = vector.extract_strided_slice %77 {offsets = [0, 0, 0], sizes = [16, 16, 64], strides = [1, 1, 1]} : vector<18x16x64xf32> to vector<16x16x64xf32>
    %79 = vector.extract_strided_slice %53 {offsets = [0, 1, 0], sizes = [1, 1, 64], strides = [1, 1, 1]} : vector<3x3x64xf32> to vector<1x1x64xf32>
    %80 = vector.shape_cast %79 : vector<1x1x64xf32> to vector<64xf32>
    %81 = vector.shape_cast %80 : vector<64xf32> to vector<1x1x64xf32>
    %82 = vector.broadcast %81 : vector<1x1x64xf32> to vector<16x16x64xf32>
    %83 = arith.mulf %78, %82 : vector<16x16x64xf32>
    %84 = arith.addf %76, %83 : vector<16x16x64xf32>
    %85 = vector.extract_strided_slice %77 {offsets = [1, 0, 0], sizes = [16, 16, 64], strides = [1, 1, 1]} : vector<18x16x64xf32> to vector<16x16x64xf32>
    %86 = vector.extract_strided_slice %53 {offsets = [1, 1, 0], sizes = [1, 1, 64], strides = [1, 1, 1]} : vector<3x3x64xf32> to vector<1x1x64xf32>
    %87 = vector.shape_cast %86 : vector<1x1x64xf32> to vector<64xf32>
    %88 = vector.shape_cast %87 : vector<64xf32> to vector<1x1x64xf32>
    %89 = vector.broadcast %88 : vector<1x1x64xf32> to vector<16x16x64xf32>
    %90 = arith.mulf %85, %89 : vector<16x16x64xf32>
    %91 = arith.addf %84, %90 : vector<16x16x64xf32>
    %92 = vector.extract_strided_slice %77 {offsets = [2, 0, 0], sizes = [16, 16, 64], strides = [1, 1, 1]} : vector<18x16x64xf32> to vector<16x16x64xf32>
    %93 = vector.extract_strided_slice %53 {offsets = [2, 1, 0], sizes = [1, 1, 64], strides = [1, 1, 1]} : vector<3x3x64xf32> to vector<1x1x64xf32>
    %94 = vector.shape_cast %93 : vector<1x1x64xf32> to vector<64xf32>
    %95 = vector.shape_cast %94 : vector<64xf32> to vector<1x1x64xf32>
    %96 = vector.broadcast %95 : vector<1x1x64xf32> to vector<16x16x64xf32>
    %97 = arith.mulf %92, %96 : vector<16x16x64xf32>
    %98 = arith.addf %91, %97 : vector<16x16x64xf32>
    %c0_44 = arith.constant 0 : index
    %c2 = arith.constant 2 : index
    %c0_45 = arith.constant 0 : index
    %99 = vector.load %arg6[%c0_44, %c2, %c0_45] : memref<18x18x64xf32, #tpu.memory_space<vmem>>, vector<18x16x64xf32>
    %100 = vector.extract_strided_slice %99 {offsets = [0, 0, 0], sizes = [16, 16, 64], strides = [1, 1, 1]} : vector<18x16x64xf32> to vector<16x16x64xf32>
    %101 = vector.extract_strided_slice %53 {offsets = [0, 2, 0], sizes = [1, 1, 64], strides = [1, 1, 1]} : vector<3x3x64xf32> to vector<1x1x64xf32>
    %102 = vector.shape_cast %101 : vector<1x1x64xf32> to vector<64xf32>
    %103 = vector.shape_cast %102 : vector<64xf32> to vector<1x1x64xf32>
    %104 = vector.broadcast %103 : vector<1x1x64xf32> to vector<16x16x64xf32>
    %105 = arith.mulf %100, %104 : vector<16x16x64xf32>
    %106 = arith.addf %98, %105 : vector<16x16x64xf32>
    %107 = vector.extract_strided_slice %99 {offsets = [1, 0, 0], sizes = [16, 16, 64], strides = [1, 1, 1]} : vector<18x16x64xf32> to vector<16x16x64xf32>
    %108 = vector.extract_strided_slice %53 {offsets = [1, 2, 0], sizes = [1, 1, 64], strides = [1, 1, 1]} : vector<3x3x64xf32> to vector<1x1x64xf32>
    %109 = vector.shape_cast %108 : vector<1x1x64xf32> to vector<64xf32>
    %110 = vector.shape_cast %109 : vector<64xf32> to vector<1x1x64xf32>
    %111 = vector.broadcast %110 : vector<1x1x64xf32> to vector<16x16x64xf32>
    %112 = arith.mulf %107, %111 : vector<16x16x64xf32>
    %113 = arith.addf %106, %112 : vector<16x16x64xf32>
    %114 = vector.extract_strided_slice %99 {offsets = [2, 0, 0], sizes = [16, 16, 64], strides = [1, 1, 1]} : vector<18x16x64xf32> to vector<16x16x64xf32>
    %115 = vector.extract_strided_slice %53 {offsets = [2, 2, 0], sizes = [1, 1, 64], strides = [1, 1, 1]} : vector<3x3x64xf32> to vector<1x1x64xf32>
    %116 = vector.shape_cast %115 : vector<1x1x64xf32> to vector<64xf32>
    %117 = vector.shape_cast %116 : vector<64xf32> to vector<1x1x64xf32>
    %118 = vector.broadcast %117 : vector<1x1x64xf32> to vector<16x16x64xf32>
    %119 = arith.mulf %114, %118 : vector<16x16x64xf32>
    %120 = arith.addf %113, %119 : vector<16x16x64xf32>
    %121 = vector.shape_cast %120 : vector<16x16x64xf32> to vector<256x64xf32>
    %122 = tpu.transpose %121, [1, 0] : vector<256x64xf32> -> vector<64x256xf32>
    %cst_46 = arith.constant 5.000000e-01 : f32
    %123 = vector.broadcast %cst_46 : f32 to vector<64x256xf32>
    %124 = arith.mulf %123, %122 : vector<64x256xf32>
    %cst_47 = arith.constant 0.707106769 : f32
    %125 = vector.broadcast %cst_47 : f32 to vector<64x256xf32>
    %126 = arith.mulf %122, %125 : vector<64x256xf32>
    %127 = math.absf %126 : vector<64x256xf32>
    %cst_48 = arith.constant 0.327591091 : f32
    %128 = vector.broadcast %cst_48 : f32 to vector<64x256xf32>
    %129 = arith.mulf %128, %127 : vector<64x256xf32>
    %cst_49 = arith.constant 1.000000e+00 : f32
    %130 = vector.broadcast %cst_49 : f32 to vector<64x256xf32>
    %131 = arith.addf %130, %129 : vector<64x256xf32>
    %cst_50 = arith.constant 1.000000e+00 : f32
    %132 = vector.broadcast %cst_50 : f32 to vector<64x256xf32>
    %133 = arith.divf %132, %131 : vector<64x256xf32>
    %cst_51 = arith.constant 1.06140542 : f32
    %134 = vector.broadcast %cst_51 : f32 to vector<64x256xf32>
    %135 = arith.mulf %134, %133 : vector<64x256xf32>
    %cst_52 = arith.constant -1.45315206 : f32
    %136 = vector.broadcast %cst_52 : f32 to vector<64x256xf32>
    %137 = arith.addf %135, %136 : vector<64x256xf32>
    %138 = arith.mulf %137, %133 : vector<64x256xf32>
    %cst_53 = arith.constant 1.42141378 : f32
    %139 = vector.broadcast %cst_53 : f32 to vector<64x256xf32>
    %140 = arith.addf %138, %139 : vector<64x256xf32>
    %141 = arith.mulf %140, %133 : vector<64x256xf32>
    %cst_54 = arith.constant -0.284496725 : f32
    %142 = vector.broadcast %cst_54 : f32 to vector<64x256xf32>
    %143 = arith.addf %141, %142 : vector<64x256xf32>
    %144 = arith.mulf %143, %133 : vector<64x256xf32>
    %cst_55 = arith.constant 0.254829586 : f32
    %145 = vector.broadcast %cst_55 : f32 to vector<64x256xf32>
    %146 = arith.addf %144, %145 : vector<64x256xf32>
    %147 = arith.mulf %146, %133 : vector<64x256xf32>
    %cst_56 = arith.constant 0.000000e+00 : f32
    %148 = vector.broadcast %cst_56 : f32 to vector<64x256xf32>
    %149 = arith.subf %148, %127 : vector<64x256xf32>
    %150 = arith.mulf %149, %127 : vector<64x256xf32>
    %151 = math.exp %150 : vector<64x256xf32>
    %152 = arith.mulf %147, %151 : vector<64x256xf32>
    %cst_57 = arith.constant 1.000000e+00 : f32
    %153 = vector.broadcast %cst_57 : f32 to vector<64x256xf32>
    %154 = arith.subf %153, %152 : vector<64x256xf32>
    %cst_58 = arith.constant 0.000000e+00 : f32
    %155 = vector.broadcast %cst_58 : f32 to vector<64x256xf32>
    %156 = arith.cmpf oge, %126, %155 : vector<64x256xf32>
    %cst_59 = arith.constant 0.000000e+00 : f32
    %157 = vector.broadcast %cst_59 : f32 to vector<64x256xf32>
    %158 = arith.subf %157, %154 : vector<64x256xf32>
    %159 = arith.select %156, %154, %158 : vector<64x256xi1>, vector<64x256xf32>
    %cst_60 = arith.constant 1.000000e+00 : f32
    %160 = vector.broadcast %cst_60 : f32 to vector<64x256xf32>
    %161 = arith.addf %160, %159 : vector<64x256xf32>
    %162 = arith.mulf %124, %161 : vector<64x256xf32>
    %c0_61 = arith.constant 0 : index
    %c0_62 = arith.constant 0 : index
    %163 = vector.load %arg4[%c0_61, %c0_62] : memref<32x64xf32, #tpu.memory_space<vmem>>, vector<32x64xf32>
    %cst_63 = arith.constant dense<0.000000e+00> : vector<32x256xf32>
    %164 = tpu.matmul %163, %162, %cst_63 {dimension_numbers = #tpu.dot_dimension_numbers<[1], [0], [0], [1], [0, 0, 1, 1], [], []>} : vector<32x64xf32>, vector<64x256xf32>, vector<32x256xf32> -> vector<32x256xf32>
    %c0_64 = arith.constant 0 : index
    %c0_65 = arith.constant 0 : index
    %c0_66 = arith.constant 0 : index
    %165 = vector.load %arg5[%c0_64, %c0_65, %c0_66] : memref<1x32x256xf32, #tpu.memory_space<vmem>>, vector<1x32x256xf32>
    %166 = vector.shape_cast %165 : vector<1x32x256xf32> to vector<32x256xf32>
    %167 = vector.shape_cast %164 : vector<32x256xf32> to vector<1x32x256xf32>
    tpu.vector_store %arg5[%c0_64, %c0_65, %c0_66], %167 {strides = array<i32>} : memref<1x32x256xf32, #tpu.memory_space<vmem>>, vector<1x32x256xf32>,
    return
  }
  func.func @transform_0(%arg0: i32) -> (i32, i32, i32) {
    %c0_i32 = arith.constant 0 : i32
    %c0_i32_0 = arith.constant 0 : i32
    %c0_i32_1 = arith.constant 0 : i32
    return %arg0, %c0_i32, %c0_i32_0 : i32, i32, i32
  }
  func.func @transform_1(%arg0: i32) -> (i32, i32) {
    %c0_i32 = arith.constant 0 : i32
    %c0_i32_0 = arith.constant 0 : i32
    %c0_i32_1 = arith.constant 0 : i32
    return %c0_i32, %c0_i32_0 : i32, i32
  }
  func.func @transform_2(%arg0: i32) -> (i32, i32, i32) {
    %c0_i32 = arith.constant 0 : i32
    %c0_i32_0 = arith.constant 0 : i32
    %c0_i32_1 = arith.constant 0 : i32
    %c0_i32_2 = arith.constant 0 : i32
    return %c0_i32, %c0_i32_0, %c0_i32_1 : i32, i32, i32
  }
  func.func @transform_3(%arg0: i32) -> (i32, i32) {
    %c0_i32 = arith.constant 0 : i32
    %c0_i32_0 = arith.constant 0 : i32
    %c0_i32_1 = arith.constant 0 : i32
    return %c0_i32, %c0_i32_0 : i32, i32
  }
  func.func @transform_4(%arg0: i32) -> (i32, i32, i32) {
    %c0_i32 = arith.constant 0 : i32
    %c0_i32_0 = arith.constant 0 : i32
    %c0_i32_1 = arith.constant 0 : i32
    return %arg0, %c0_i32, %c0_i32_0 : i32, i32, i32
  }
}

</mosaic_0001>

<bundles_post_ra>
// kernel: tpu_custom_call.1
= control target key start
LH: loop header
LB: loop body
LE: loop exit
PB: predicated region body
PF: predicated region fallthrough
CT: control target
= control target key end

     0   :  { %9 = vsyncpa [#allocation4], 0  ;;  %s4561_s0 = inlined_call_operand.hbm [shape: f32[2,32,256], index: 0, kind: input, shape index: {}]   ;;  %s4562_s1 = inlined_call_operand.vmem [shape: f32[64,32], index: 1, kind: input, shape index: {}]   ;;  %s4563_s2 = inlined_call_operand.vmem [shape: f32[3,3,64], index: 2, kind: input, shape index: {}]   ;;  %s4564_s3 = inlined_call_operand.vmem [shape: f32[32,64], index: 3, kind: input, shape index: {}]   ;;  %s4565_s4 = inlined_call_operand.hbm [shape: f32[2,32,256], index: 4, kind: output, shape index: {}]  }
   0x1   :  { %11 = vsyncpa [#allocation4 + $0x1], 0 }
   0x2   :  { %12 = vsyncpa [#allocation5], 0 }
   0x3   :  { %14 = vsyncpa [#allocation5 + $0x1], 0  ;;  %s2721_s15 = smov 0   ;;  %s2723_s16 = smov 0  }
   0x4   :  { %s2725_s17 = smov 0   ;;  %s2727_s18 = smov 0  }
   0x5 LB: > { %s2742_s19 = sadd.s32 4294967295, %s2687_s18   ;;  %s2360_s20 = sadd.s32 4294967294, %s2687_s18   ;;  %s2687_s18 = sphi %s2727_s18, %s4678_s18   ;;  %s2683_s17 = sphi %s2725_s17, %s4677_s17   ;;  %s2679_s16 = sphi %s2723_s16, %s4676_s16   ;;  %s2675_s15 = sphi %s2721_s15, %s4675_s15  }
   0x6   : > { %s2746_s21 = sadd.s32 1, %s2687_s18   ;;  %s27_s22 = sadd.s32 1, %s2683_s17 }
   0x7   : > { %s24_s23 = ssub.s32 %s2687_s18, %s2746_s21  ;;  %p34_p0 = scmp.ne.s32.totalorder %s2683_s17, %s2679_s16 }
   0x8   : > { %p25_p1 = scmp.eq.s32.totalorder %s24_s23, 0  ;;  %p35_p2 = scmp.eq.s32.totalorder %s2687_s18, 0 }
   0x9   : > { %p40_p3 = scmp.ne.s32.totalorder %s2679_s16, %s2675_s15  ;;  %p41_p4 = scmp.eq.s32.totalorder %s2742_s19, 0 }
   0xa   : > { %s2758_s24 = scalar_select %p25_p1, %s2683_s17, %s27_s22  }
   0xb   : > { %p2760_p5 = por %p35_p2, %p34_p0  ;;  %p2764_p6 = por %p41_p4, %p40_p3 }
   0xc   : > { %p127_p7 = scmp.eq.s32.totalorder %s2742_s19, 1  ;;  %p133_p8 = scmp.eq.s32.totalorder %s2360_s20, 1 }
   0xd   : > { %p2424_p10 = scmp.lt.s32.totalorder %s2687_s18, 2  ;;  %s162_s29 = sand.u32 1, %s2683_s17  }
   0xe   : > { %p2771_p11 = por %p127_p7, %p34_p0  ;;  %p2775_p12 = por %p133_p8, %p40_p3 }
   0xf   : > { %s2386_s30 = sshll.u32 %s2687_s18, 10  ;;  %s2363_s5 = sshll.u32 %s162_s29, 6 }
  0x10   : > { %s4595_s27 = scalar_select %p2771_p11, 1, 0 }
  0x11   : > { %s4596_s28 = scalar_select %p2775_p12, 1, 0 }
  0x12   : > { %s2784_s8 = scalar_lea.hbm %s4561_s0, %s2386_s30  ;;  %s166_s9 = scalar_lea.vmem [#allocation3], %s2363_s5 }
  0x13   : > { %s173_s10 = sshll.u32 %s166_s9, 4  ;;  %p2788_p13 = pnand %p2424_p10, %p2760_p5  ;;  %s2792_s10 = int_to_ptr.vmem [resolvable:$true] %s173_s10 }
  0x14   : > { %s2794_s12 = scalar_lea.sflag [#allocation4], %s162_s29  ;;  %s2591_s13 = scalar_lea.hbm %s2784_s8, 1024 }
  0x15   : > { %p2592_p0 = scmp.ne.s32.totalorder %s2784_s8, %s2591_s13  ;;  %p2593_p1 = pneg %p2788_p13 }
  0x16   : > { %s2596_s22 = scalar_lea.hbm %s4561_s0, 2048  ;;  %p2597_p4 = scmp.lt.u32.totalorder %s2784_s8, %s4561_s0 }
  0x17   : > { %p2594_p2 = pnand %p2593_p1, %p2592_p0  ;;  %p2598_p5 = scmp.lt.u32.totalorder %s2596_s22, %s2591_s13 }
  0x18   : > { %p2600_p8 = scmp.lt.u32.totalorder %s2591_s13, %s2784_s8 }
  0x19   : > { %p2595_p3 = pneg %p2594_p2  ;;  %p2599_p7 = por %p2598_p5, %p2597_p4 }
  0x1b   : > { %p2601_p10 = por %p2600_p8, %p2599_p7 }
  0x1d   : > { %p2602_p9 = pnand %p2601_p10, %p2595_p3 }
  0x1f   : > { %2605 = shalt.err (!%p2602_p9)
}
  0x20   : > { %s2606_s29 = scalar_lea.vmem %s2792_s10, 1024  ;;  %s2689_s30 = smov [#allocation3]  }
  0x21   : > { %p2607_p0 = scmp.ne.s32.totalorder %s2792_s10, %s2606_s29  ;;  %s2611_s5 = sshll.u32 %s2689_s30, 4  ;;  %s2612_s5 = int_to_ptr.vmem [resolvable:$false] %s2611_s5 }
  0x22   : > { %s2613_s6 = scalar_lea.vmem %s2612_s5, 2048  ;;  %p2614_p11 = scmp.lt.s32.totalorder %s2792_s10, %s2612_s5 }
  0x23   : > { %p2609_p2 = pnand %p2607_p0, %p2593_p1  ;;  %p2615_p4 = scmp.lt.s32.totalorder %s2613_s6, %s2606_s29 }
  0x25   : > { %p2610_p12 = pneg %p2609_p2  ;;  %p2616_p5 = por %p2615_p4, %p2614_p11 }
  0x27   : > { %p2617_p7 = pnand %p2616_p5, %p2610_p12 }
  0x29   : > { %2620 = shalt.err (!%p2617_p7)
}
  0x2a   : > { %s2690_s7 = smov 256   ;;  %s2691_s9 = smov 16  }
  0x2b   : > { %2419 = dma.hbm_to_vmem [thread:$0]  (!%p2788_p13), %s2784_s8, 1024, %s2792_s10, %s2794_s12, %s2690_s7, %s2690_s7, %s2691_s9  }
  0x2c   : > { %p2366_p9 = scmp.ge.s32.totalorder %s2687_s18, 1  ;;  %p181_p1 = scmp.lt.s32.totalorder %s2687_s18, 3 }
  0x2e   : > { %p182_p3 = pnand %p2366_p9, %p181_p1 }
  0x30   : > { %185 = sbr.rel (%p182_p3) target bundleno = 1042 (0x412), region = 36 }
  0x37   : > { %s2825_s13 = sand.u32 1, %s2679_s16  }
  0x38   : > { %s2367_s14 = sshll.u32 %s2825_s13, 6  ;;  %s188_s20 = scalar_lea.sflag [#allocation4], %s2825_s13 }
  0x39   : > { %s191_s22 = scalar_lea.vmem [#allocation3], %s2367_s14 }
  0x3a   : > { %2666 = dma.done.wait (%p2764_p6), %s188_s20, 1024  }
  0x3b   : > { %2668 = vsyncadd (%p2764_p6), %s188_s20, 4294966272  ;;  %v4567_v0 = vmov 0.0   ;;  %v225_v1 = vld [vmem:[%s191_s22 + $0x8] sm:$0xff]  ;;  %v227_v2 = vld [vmem:[%s191_s22 + $0x18] sm:$0xff]  ;;  %vm232_vm0 = vcmask 261120   ;;  %vm866_vm1 = vcmask 523264  }
  0x3c   : > { %321 = vmatprep.mubr.f32.mxu0 %v4567_v0  ;;  %2240 = vmatprep.mubr.f32.mxu1 %v4567_v0  ;;  %v224_v3 = vld [vmem:[%s191_s22] sm:$0xff]  ;;  %v2388_v4 = vpack.c.bf16 %v227_v2, %v225_v1  ;;  %v226_v5 = vld [vmem:[%s191_s22 + $0x10] sm:$0xff]  ;;  %v229_v6 = vld [vmem:[%s191_s22 + $0x28] sm:$0xff]  ;;  %867 = vst.msk [vmem:[#allocation2] sm:$0xff] %vm866_vm1, %v4567_v0  ;;  %vm876_vm15 = vcmask 516096   ;;  %s215_s26 = scalar_lea.vmem [#allocation6], %s2367_s14 }
  0x3d   : > { %v231_v7 = vld [vmem:[%s191_s22 + $0x38] sm:$0xff]  ;;  %v2390_v8 = vpack.c.bf16 %v226_v5, %v224_v3  ;;  %v228_v10 = vld [vmem:[%s191_s22 + $0x20] sm:$0xff]  ;;  %v230_v11 = vld [vmem:[%s191_s22 + $0x30] sm:$0xff]  ;;  %868 = vst.msk [vmem:[#allocation2 + $0x8] sm:$0xff] %vm866_vm1, %v4567_v0  ;;  %s2287_s8 = sshll.u32 %s215_s26, 4  ;;  %s2387_s10 = sshll.u32 %s2742_s19, 10  ;;  %s4512_s8 = int_to_ptr.vmem [resolvable:$true] %s2287_s8 }
  0x3e   : > { %v2392_v9 = vpack.c.bf16 %v231_v7, %v229_v6  ;;  %2389 = vmatprep.subr.bf16.mxu0 %v2388_v4  ;;  %v2394_v12 = vpack.c.bf16 %v230_v11, %v228_v10  ;;  %v216_v13 = vld [vmem:[%s4562_s1] sm:$0xff]  ;;  %v217_v14 = vld [vmem:[%s4562_s1 + $0x8] sm:$0xff]  ;;  %v218_v15 = vld [vmem:[%s4562_s1 + $0x10] sm:$0xff]  ;;  %872 = vst.msk [vmem:[#allocation2 + $0x198] sm:$0xff] %vm866_vm1, %v4567_v0  ;;  %s4517_s12 = scalar_lea.hbm %s4565_s4, %s2387_s10  ;;  %s2274_s23 = scalar_lea.sflag [#allocation5], %s2825_s13 }
  0x3f   : > { %2391 = vmatpush1.bf16.msra.mxu0 %v2390_v8  ;;  %v219_v16 = vld [vmem:[%s4562_s1 + $0x18] sm:$0xff]  ;;  %v220_v17 = vld [vmem:[%s4562_s1 + $0x20] sm:$0xff]  ;;  %v221_v18 = vld [vmem:[%s4562_s1 + $0x28] sm:$0xff]  ;;  %873 = vst.msk [vmem:[#allocation2 + $0x1a0] sm:$0xff] %vm866_vm1, %v4567_v0  ;;  %s2621_s25 = scalar_lea.vmem %s4512_s8, 1024  ;;  %p4672_p11 = scmp.ne.s32.totalorder %s4595_s27, 0 }
  0x40   : > { %2393 = vmatprep.subr.bf16.mxu0 %v2392_v9  ;;  %v222_v19 = vld [vmem:[%s4562_s1 + $0x30] sm:$0xff]  ;;  %v223_v20 = vld [vmem:[%s4562_s1 + $0x38] sm:$0xff]  ;;  %p2622_p6 = scmp.ne.s32.totalorder %s4512_s8, %s2621_s25  ;;  %s2693_s19 = smov [#allocation6]  }
  0x41   : > { %s2625_s29 = sshll.u32 %s2693_s19, 4  ;;  %s2626_s29 = int_to_ptr.vmem [resolvable:$false] %s2625_s29 }
  0x42   : > { %p2623_p12 = pnand %p2622_p6, %p4672_p11  ;;  %s2627_s30 = scalar_lea.vmem %s2626_s29, 2048 }
  0x43   : > { %2395 = vmatpush1.bf16.msra.mxu0 %v2394_v12  ;;  %p2628_p8 = scmp.lt.s32.totalorder %s4512_s8, %s2626_s29  ;;  %p2629_p10 = scmp.lt.s32.totalorder %s2627_s30, %s2621_s25 }
  0x44   : > { %p2624_p13 = pneg %p2623_p12 }
  0x45   : > { %p2630_p0 = por %p2629_p10, %p2628_p8 }
  0x46   : > { %2369 = vmatmul.mubr.msk.f32.vlgmr.msra.gmra.mrb[0].mxu0 %vm232_vm0, %v216_v13 }
  0x47   : > { %327 = vmatprep.mubr.f32.mxu0 %v4567_v0  ;;  %p2631_p2 = pnand %p2630_p0, %p2624_p13 }
  0x4a   : > { %2370 = vmatmul.mubr.msk.f32.gmra.mrb[2].mxu0 %vm232_vm0, %v217_v14 }
  0x4b   : > { %333 = vmatprep.mubr.f32.mxu0 %v4567_v0 }
  0x4e   : > { %2371 = vmatmul.mubr.msk.f32.gmra.mrb[4].mxu0 %vm232_vm0, %v218_v15 }
  0x4f   : > { %339 = vmatprep.mubr.f32.mxu0 %v4567_v0 }
  0x52   : > { %2372 = vmatmul.mubr.msk.f32.gmra.mrb[6].mxu0 %vm232_vm0, %v219_v16 }
  0x53   : > { %345 = vmatprep.mubr.f32.mxu0 %v4567_v0 }
  0x56   : > { %2373 = vmatmul.mubr.msk.f32.gmra.mrb[8].mxu0 %vm232_vm0, %v220_v17 }
  0x57   : > { %351 = vmatprep.mubr.f32.mxu0 %v4567_v0 }
  0x5a   : > { %2374 = vmatmul.mubr.msk.f32.gmra.mrb[10].mxu0 %vm232_vm0, %v221_v18 }
  0x5b   : > { %357 = vmatprep.mubr.f32.mxu0 %v4567_v0 }
  0x5e   : > { %2375 = vmatmul.mubr.msk.f32.gmra.mrb[12].mxu0 %vm232_vm0, %v222_v19 }
  0x5f   : > { %363 = vmatprep.mubr.f32.mxu0 %v4567_v0 }
  0x62   : > { %2376 = vmatmul.mubr.msk.f32.gmra.mrb[14].mxu0 %vm232_vm0, %v223_v20 }
 0x119   : > { %v323_v21 = vpop.f32.mrb[0].mxu0 }
 0x11a   : > { %v2884_v22 = vmul.f32 0.70710677, %v323_v21  ;;  %v325_v23 = vpop.f32.mrb[1].mxu0  ;;  %v2902_v49 = vmul.f32 0.5, %v323_v21 }
 0x11b   : > { %v2886_v24 = vmul.f32 0.70710677, %v325_v23  ;;  %v2904_v50 = vmul.f32 0.5, %v325_v23 }
 0x11c   : > { %v402_v25 = vand.u32 2147483647, %v2884_v22  ;;  %vm722_vm2 = vcmp.ge.f32.partialorder %v2884_v22, 0.0 }
 0x11d   : > { %v403_v26 = vand.u32 2147483647, %v2886_v24  ;;  %v329_v27 = vpop.f32.mrb[2].mxu0  ;;  %vm723_vm3 = vcmp.ge.f32.partialorder %v2886_v24, 0.0 }
 0x11e   : > { %v2890_v28 = vmul.f32 0.70710677, %v329_v27  ;;  %v331_v29 = vpop.f32.mrb[3].mxu0  ;;  %v626_v30 = vsub.f32 0.0, %v402_v25  ;;  %v418_v32 = vmul.f32 0.3275911, %v402_v25 }
 0x11f   : > { %v627_v33 = vsub.f32 0.0, %v403_v26  ;;  %v2893_v34 = vmul.f32 0.70710677, %v331_v29  ;;  %v419_v37 = vmul.f32 0.3275911, %v403_v26  ;;  %v2907_v54 = vmul.f32 0.5, %v329_v27 }
 0x120   : > { %v404_v31 = vand.u32 2147483647, %v2890_v28  ;;  %v642_v39 = vmul.f32 %v626_v30, %v402_v25  ;;  %v434_v41 = vadd.f32 1.0, %v418_v32  ;;  %v2910_v58 = vmul.f32 0.5, %v331_v29 }
 0x121   : > { %v335_v35 = vpop.f32.mrb[4].mxu0  ;;  %v405_v38 = vand.u32 2147483647, %v2893_v34  ;;  %v643_v42 = vmul.f32 %v627_v33, %v403_v26  ;;  %v435_v51 = vadd.f32 1.0, %v419_v37  ;;  %vm724_vm4 = vcmp.ge.f32.partialorder %v2890_v28, 0.0 }
 0x122   : > { %v337_v36 = vpop.f32.mrb[5].mxu0  ;;  %v628_v40 = vsub.f32 0.0, %v404_v31  ;;  %v2896_v43 = vmul.f32 0.70710677, %v335_v35  ;;  %v420_v45 = vmul.f32 0.3275911, %v404_v31  ;;  %2463 = vrcp.f32 %v434_v41 }
 0x123   : > { %v629_v46 = vsub.f32 0.0, %v405_v38  ;;  %v2898_v47 = vmul.f32 0.70710677, %v337_v36  ;;  %v658_v53 = vmul.f32 1.442695, %v642_v39  ;;  %2465 = vrcp.f32 %v435_v51 }
 0x124   : > { %v406_v52 = vand.u32 2147483647, %v2896_v43  ;;  %v644_v55 = vmul.f32 %v628_v40, %v404_v31  ;;  %v660_v57 = vmul.f32 1.442695, %v643_v42  ;;  %v421_v59 = vmul.f32 0.3275911, %v405_v38 }
 0x125   : > { %v341_v44 = vpop.f32.mrb[6].mxu0  ;;  %v407_v56 = vand.u32 2147483647, %v2898_v47  ;;  %v436_v61 = vadd.f32 1.0, %v420_v45  ;;  %v645_v62 = vmul.f32 %v629_v46, %v405_v38  ;;  %2467 = vpow2.f32 %v658_v53 }
 0x126   : > { %v2900_v48 = vpop.f32.mrb[7].mxu0  ;;  %v630_v63 = vsub.f32 0.0, %v406_v52  ;;  %v2914_v1 = vmul.f32 0.70710677, %v341_v44  ;;  %v422_v2 = vmul.f32 0.3275911, %v406_v52  ;;  %2469 = vpow2.f32 %v660_v57 }
 0x127   : > { %v631_v3 = vsub.f32 0.0, %v407_v56  ;;  %v2917_v4 = vmul.f32 0.70710677, %v2900_v48  ;;  %v662_v6 = vmul.f32 1.442695, %v644_v55  ;;  %v2921_v7 = vmul.f32 0.5, %v335_v35 }
 0x128   : > { %v408_v8 = vand.u32 2147483647, %v2914_v1  ;;  %v437_v9 = vadd.f32 1.0, %v421_v59  ;;  %v423_v10 = vmul.f32 0.3275911, %v407_v56  ;;  %2471 = vrcp.f32 %v436_v61 }
 0x129   : > { %v2912_v60 = vpop.f32.mrb[8].mxu0  ;;  %v409_v11 = vand.u32 2147483647, %v2917_v4  ;;  %v664_v13 = vmul.f32 1.442695, %v645_v62  ;;  %v646_v14 = vmul.f32 %v630_v63, %v406_v52  ;;  %v438_v17 = vadd.f32 1.0, %v422_v2 }
 0x12a   : > { %v2919_v5 = vpop.f32.mrb[9].mxu0  ;;  %v632_v15 = vsub.f32 0.0, %v408_v8  ;;  %v2929_v18 = vmul.f32 0.5, %v337_v36  ;;  %v647_v19 = vmul.f32 %v631_v3, %v407_v56  ;;  %2473 = vpow2.f32 %v662_v6 }
 0x12b   : > { %v633_v20 = vsub.f32 0.0, %v409_v11  ;;  %v424_v21 = vmul.f32 0.3275911, %v408_v8  ;;  %v425_v23 = vmul.f32 0.3275911, %v409_v11  ;;  %2475 = vrcp.f32 %v437_v9 }
 0x12c   : > { %v2932_v25 = vmul.f32 0.70710677, %v2912_v60  ;;  %v439_v26 = vadd.f32 1.0, %v423_v10  ;;  %v2934_v27 = vmul.f32 0.5, %v341_v44  ;;  %v2937_v29 = vmul.f32 0.70710677, %v2919_v5  ;;  %v2944_v36 = vpop.eup %2463 }
 0x12d   : > { %v2925_v12 = vpop.f32.mrb[10].mxu0  ;;  %2477 = vpow2.f32 %v664_v13  ;;  %v666_v31 = vmul.f32 1.442695, %v646_v14  ;;  %v648_v32 = vmul.f32 %v632_v15, %v408_v8  ;;  %v668_v37 = vmul.f32 1.442695, %v647_v19  ;;  %v2947_v45 = vpop.eup %2465 }
 0x12e   : > { %v2927_v16 = vpop.f32.mrb[11].mxu0  ;;  %v410_v33 = vand.u32 2147483647, %v2932_v25  ;;  %2479 = vrcp.f32 %v438_v17  ;;  %v649_v38 = vmul.f32 %v633_v20, %v409_v11  ;;  %v411_v39 = vand.u32 2147483647, %v2937_v29 }
 0x12f   : > { %v440_v40 = vadd.f32 1.0, %v424_v21  ;;  %v441_v41 = vadd.f32 1.0, %v425_v23  ;;  %2481 = vrcp.f32 %v439_v26  ;;  %v2950_v52 = vmul.f32 0.70710677, %v2925_v12  ;;  %v2954_v55 = vpop.eup %2467 }
 0x130   : > { %v426_v42 = vmul.f32 0.3275911, %v410_v33  ;;  %v634_v44 = vsub.f32 0.0, %v410_v33  ;;  %v427_v46 = vmul.f32 0.3275911, %v411_v39  ;;  %v635_v51 = vsub.f32 0.0, %v411_v39  ;;  %v2961_v62 = vpop.eup %2469 }
 0x131   : > { %v2939_v30 = vpop.f32.mrb[12].mxu0  ;;  %2483 = vpow2.f32 %v666_v31  ;;  %v670_v56 = vmul.f32 1.442695, %v648_v32  ;;  %v2957_v59 = vmul.f32 0.70710677, %v2927_v16  ;;  %v2967_v8 = vmul.f32 0.5, %v2900_v48 }
 0x132   : > { %4598 = vst [vmem:[#allocation9_spill] sm:$0xff] %v2939_v30  ;;  %v2942_v35 = vpop.f32.mrb[13].mxu0  ;;  %v650_v57 = vmul.f32 %v634_v44, %v410_v33  ;;  %2485 = vpow2.f32 %v668_v37  ;;  %v672_v63 = vmul.f32 1.442695, %v649_v38  ;;  %v651_v2 = vmul.f32 %v635_v51, %v411_v39  ;;  %v2964_v6 = vpop.eup %2471 }
 0x133   : > { %4599 = vst [vmem:[#allocation10_spill] sm:$0xff] %v2942_v35  ;;  %4601 = vst [vmem:[#allocation12_spill] sm:$0xff] %v2957_v59  ;;  %v412_v3 = vand.u32 2147483647, %v2950_v52  ;;  %2487 = vrcp.f32 %v440_v40  ;;  %v442_v9 = vadd.f32 1.0, %v426_v42  ;;  %v443_v11 = vadd.f32 1.0, %v427_v46 }
 0x134   : > { %v413_v10 = vand.u32 2147483647, %v2957_v59  ;;  %2489 = vrcp.f32 %v441_v41  ;;  %v2970_v15 = vpop.eup %2473  ;;  %v674_v17 = vmul.f32 1.442695, %v650_v57  ;;  %v676_v23 = vmul.f32 1.442695, %v651_v2 }
 0x135   : > { %v2952_v53 = vpop.f32.mrb[14].mxu0  ;;  %v428_v13 = vmul.f32 0.3275911, %v412_v3  ;;  %v636_v14 = vsub.f32 0.0, %v412_v3  ;;  %2491 = vpow2.f32 %v670_v56  ;;  %v2972_v21 = vpop.eup %2475  ;;  %v2975_v48 = vmul.f32 0.70710677, %v2939_v30 }
 0x136   : > { %4600 = vst [vmem:[#allocation11_spill] sm:$0xff] %v2952_v53  ;;  %v2959_v61 = vpop.f32.mrb[15].mxu0  ;;  %v429_v19 = vmul.f32 0.3275911, %v413_v10  ;;  %v637_v20 = vsub.f32 0.0, %v413_v10  ;;  %2493 = vpow2.f32 %v672_v63  ;;  %v2985_v39 = vmul.f32 0.5, %v2912_v60 }
 0x137   : > { %4602 = vst [vmem:[#allocation13_spill] sm:$0xff] %v2959_v61  ;;  %v652_v26 = vmul.f32 %v636_v14, %v412_v3  ;;  %4603 = vst [vmem:[#allocation14_spill] sm:$0xff] %v2975_v48  ;;  %v2977_v31 = vpop.eup %2477  ;;  %2495 = vrcp.f32 %v442_v9  ;;  %v444_v32 = vadd.f32 1.0, %v428_v13  ;;  %v2980_v37 = vmul.f32 0.70710677, %v2942_v35 }
 0x138   : > { %v653_v33 = vmul.f32 %v637_v20, %v413_v10  ;;  %v2982_v38 = vpop.eup %2479  ;;  %4605 = vst [vmem:[#allocation16_spill] sm:$0xff] %v2985_v39  ;;  %2497 = vrcp.f32 %v443_v11  ;;  %v445_v40 = vadd.f32 1.0, %v429_v19  ;;  %v414_v41 = vand.u32 2147483647, %v2975_v48 }
 0x139   : > { %4604 = vst [vmem:[#allocation15_spill] sm:$0xff] %v2980_v37  ;;  %2499 = vpow2.f32 %v674_v17  ;;  %v2989_v42 = vmul.f32 0.5, %v2919_v5  ;;  %v678_v44 = vmul.f32 1.442695, %v652_v26  ;;  %v415_v46 = vand.u32 2147483647, %v2980_v37  ;;  %v2992_v51 = vpop.eup %2481 }
 0x13a   : > { %2501 = vpow2.f32 %v676_v23  ;;  %v680_v56 = vmul.f32 1.442695, %v653_v33  ;;  %v430_v57 = vmul.f32 0.3275911, %v414_v41  ;;  %v638_v63 = vsub.f32 0.0, %v414_v41 }
 0x13b   : > { %4606 = vst [vmem:[#allocation17_spill] sm:$0xff] %v2989_v42  ;;  %v2994_v2 = vpop.eup %2483  ;;  %2503 = vrcp.f32 %v444_v32  ;;  %v431_v60 = vmul.f32 0.3275911, %v415_v46  ;;  %v639_v3 = vsub.f32 0.0, %v415_v46  ;;  %v2997_v9 = vmul.f32 0.70710677, %v2952_v53 }
 0x13c   : > { %v2999_v10 = vpop.eup %2485  ;;  %2505 = vrcp.f32 %v445_v40  ;;  %v446_v5 = vadd.f32 1.0, %v430_v57  ;;  %v654_v11 = vmul.f32 %v638_v63, %v414_v41  ;;  %v3002_v13 = vmul.f32 0.70710677, %v2959_v61 }
 0x13d   : > { %4607 = vst [vmem:[#allocation18_spill] sm:$0xff] %v2997_v9  ;;  %v3004_v14 = vpop.eup %2487  ;;  %2507 = vpow2.f32 %v678_v44  ;;  %v447_v17 = vadd.f32 1.0, %v431_v60  ;;  %v655_v19 = vmul.f32 %v639_v3, %v415_v46  ;;  %v416_v20 = vand.u32 2147483647, %v2997_v9 }
 0x13e   : > { %4608 = vst [vmem:[#allocation19_spill] sm:$0xff] %v3002_v13  ;;  %v3007_v23 = vpop.eup %2489  ;;  %v3010_v26 = vmul.f32 0.5, %v2925_v12  ;;  %2509 = vpow2.f32 %v680_v56  ;;  %v682_v32 = vmul.f32 1.442695, %v654_v11  ;;  %v417_v33 = vand.u32 2147483647, %v3002_v13 }
 0x13f   : > { %v3013_v40 = vpop.eup %2491  ;;  %2511 = vrcp.f32 %v446_v5  ;;  %v684_v41 = vmul.f32 1.442695, %v655_v19  ;;  %v432_v57 = vmul.f32 0.3275911, %v416_v20  ;;  %v640_v63 = vsub.f32 0.0, %v416_v20 }
 0x140   : > { %4609 = vst [vmem:[#allocation20_spill] sm:$0xff] %v3010_v26  ;;  %v3015_v44 = vpop.eup %2493  ;;  %2513 = vrcp.f32 %v447_v17  ;;  %v433_v46 = vmul.f32 0.3275911, %v417_v33  ;;  %v641_v60 = vsub.f32 0.0, %v417_v33  ;;  %v482_v3 = vmul.f32 1.0614054, %v2944_v36 }
 0x141   : > { %v3018_v0 = vpop.eup %2495  ;;  %2515 = vpow2.f32 %v682_v32  ;;  %v448_v12 = vadd.f32 1.0, %v432_v57  ;;  %v656_v56 = vmul.f32 %v640_v63, %v416_v20  ;;  %v483_v11 = vmul.f32 1.0614054, %v2947_v45 }
 0x142   : > { %v3021_v61 = vpop.eup %2497  ;;  %v449_v5 = vadd.f32 1.0, %v433_v46  ;;  %v657_v19 = vmul.f32 %v641_v60, %v417_v33  ;;  %v498_v13 = vadd.f32 -1.4531521, %v482_v3  ;;  %v484_v53 = vmul.f32 1.0614054, %v2964_v6 }
 0x143   : > { %v3024_v35 = vpop.eup %2499  ;;  %v3027_v17 = vmul.f32 0.5, %v2927_v16  ;;  %2517 = vpow2.f32 %v684_v41  ;;  %v499_v9 = vadd.f32 -1.4531521, %v483_v11  ;;  %v485_v32 = vmul.f32 1.0614054, %v2972_v21 }
 0x144   : > { %4610 = vst [vmem:[#allocation21_spill] sm:$0xff] %v3024_v35  ;;  %v3030_v57 = vpop.eup %2501  ;;  %2519 = vrcp.f32 %v448_v12  ;;  %v3032_v20 = vmul.f32 1.442695, %v656_v56  ;;  %v514_v63 = vmul.f32 %v2944_v36, %v498_v13  ;;  %v500_v33 = vadd.f32 -1.4531521, %v484_v53 }
 0x145   : > { %4611 = vst [vmem:[#allocation22_spill] sm:$0xff] %v3027_v17  ;;  %4612 = vst [vmem:[#allocation23_spill] sm:$0xff] %v3030_v57  ;;  %v3035_v46 = vpop.eup %2503  ;;  %2521 = vrcp.f32 %v449_v5  ;;  %v515_v60 = vmul.f32 %v2947_v45, %v499_v9  ;;  %v501_v3 = vadd.f32 -1.4531521, %v485_v32  ;;  %v486_v16 = vmul.f32 1.0614054, %v2982_v38 }
 0x146   : > { %v3039_v41 = vpop.eup %2505  ;;  %v3041_v11 = vmul.f32 1.442695, %v657_v19  ;;  %v530_v17 = vadd.f32 1.4214138, %v514_v63  ;;  %v516_v12 = vmul.f32 %v2964_v6, %v500_v33  ;;  %v487_v56 = vmul.f32 1.0614054, %v2992_v51 }
 0x147   : > { %v3045_v37 = vpop.eup %2507  ;;  %v531_v53 = vadd.f32 1.4214138, %v515_v60  ;;  %v517_v13 = vmul.f32 %v2972_v21, %v501_v3  ;;  %v502_v5 = vadd.f32 -1.4531521, %v486_v16  ;;  %v488_v9 = vmul.f32 1.0614054, %v3004_v14 }
 0x148   : > { %4613 = vst [vmem:[#allocation24_spill] sm:$0xff] %v3045_v37  ;;  %v3049_v32 = vpop.eup %2509  ;;  %v546_v26 = vmul.f32 %v2944_v36, %v530_v17  ;;  %v532_v42 = vadd.f32 1.4214138, %v516_v12  ;;  %v503_v19 = vadd.f32 -1.4531521, %v487_v56  ;;  %vm725_vm5 = vcmp.ge.f32.partialorder %v2893_v34, 0.0 }
 0x149   : > { %4614 = vst [vmem:[#allocation25_spill] sm:$0xff] %v3049_v32  ;;  %v489_v63 = vmul.f32 1.0614054, %v3007_v23  ;;  %v3053_v30 = vpop.eup %2511  ;;  %v547_v33 = vmul.f32 %v2947_v45, %v531_v53  ;;  %v533_v39 = vadd.f32 1.4214138, %v517_v13  ;;  %v518_v60 = vmul.f32 %v2982_v38, %v502_v5 }
 0x14a   : > { %v504_v37 = vadd.f32 -1.4531521, %v488_v9  ;;  %v3057_v3 = vpop.eup %2513  ;;  %v562_v16 = vadd.f32 -0.28449672, %v546_v26  ;;  %v548_v57 = vmul.f32 %v2964_v6, %v532_v42  ;;  %v519_v32 = vmul.f32 %v2992_v51, %v503_v19 }
 0x14b   : > { %v505_v17 = vadd.f32 -1.4531521, %v489_v63  ;;  %v3061_v12 = vpop.eup %2515  ;;  %v563_v56 = vadd.f32 -0.28449672, %v547_v33  ;;  %v549_v48 = vmul.f32 %v2972_v21, %v533_v39  ;;  %v534_v35 = vadd.f32 1.4214138, %v518_v60 }
 0x14c   : > { %4615 = vst [vmem:[#allocation26_spill] sm:$0xff] %v3061_v12  ;;  %v520_v53 = vmul.f32 %v3004_v14, %v504_v37  ;;  %v578_v13 = vmul.f32 %v2944_v36, %v562_v16  ;;  %v564_v5 = vadd.f32 -0.28449672, %v548_v57  ;;  %v535_v9 = vadd.f32 1.4214138, %v519_v32 }
 0x14d   : > { %v521_v59 = vmul.f32 %v3007_v23, %v505_v17  ;;  %v3067_v26 = vpop.eup %2517  ;;  %v579_v42 = vmul.f32 %v2947_v45, %v563_v56  ;;  %v565_v19 = vadd.f32 -0.28449672, %v549_v48  ;;  %v550_v63 = vmul.f32 %v2982_v38, %v534_v35 }
 0x14e   : > { %4616 = vst [vmem:[#allocation27_spill] sm:$0xff] %v3067_v26  ;;  %v536_v12 = vadd.f32 1.4214138, %v520_v53  ;;  %v3071_v33 = vpop.eup %2519  ;;  %v594_v39 = vadd.f32 0.2548296, %v578_v13  ;;  %v580_v60 = vmul.f32 %v2964_v6, %v564_v5  ;;  %v551_v37 = vmul.f32 %v2992_v51, %v535_v9 }
 0x14f   : > { %v537_v16 = vadd.f32 1.4214138, %v521_v59  ;;  %v3075_v57 = vpop.eup %2521  ;;  %v595_v32 = vadd.f32 0.2548296, %v579_v42  ;;  %v581_v17 = vmul.f32 %v2972_v21, %v565_v19  ;;  %v566_v56 = vadd.f32 -0.28449672, %v550_v63 }
 0x150   : > { %v552_v48 = vmul.f32 %v3004_v14, %v536_v12  ;;  %v610_v35 = vmul.f32 %v2944_v36, %v594_v39  ;;  %v596_v53 = vadd.f32 0.2548296, %v580_v60  ;;  %v567_v13 = vadd.f32 -0.28449672, %v551_v37 }
 0x151   : > { %v553_v5 = vmul.f32 %v3007_v23, %v537_v16  ;;  %v611_v59 = vmul.f32 %v2947_v45, %v595_v32  ;;  %v597_v9 = vadd.f32 0.2548296, %v581_v17  ;;  %v582_v42 = vmul.f32 %v2982_v38, %v566_v56 }
 0x152   : > { %v568_v26 = vadd.f32 -0.28449672, %v552_v48  ;;  %v690_v12 = vmul.f32 %v2954_v55, %v610_v35  ;;  %v612_v19 = vmul.f32 %v2964_v6, %v596_v53  ;;  %v583_v36 = vmul.f32 %v2992_v51, %v567_v13 }
 0x153   : > { %v569_v63 = vadd.f32 -0.28449672, %v553_v5  ;;  %v691_v39 = vmul.f32 %v2961_v62, %v611_v59  ;;  %v613_v60 = vmul.f32 %v2972_v21, %v597_v9  ;;  %v598_v37 = vadd.f32 0.2548296, %v582_v42 }
 0x154   : > { %v584_v45 = vmul.f32 %v3004_v14, %v568_v26  ;;  %vm726_vm6 = vcmp.ge.f32.partialorder %v2896_v43, 0.0  ;;  %v706_v16 = vsub.f32 1.0, %v690_v12  ;;  %v692_v32 = vmul.f32 %v2970_v15, %v612_v19 }
 0x155   : > { %v599_v17 = vadd.f32 0.2548296, %v583_v36  ;;  %v585_v55 = vmul.f32 %v3007_v23, %v569_v63  ;;  %vm727_vm7 = vcmp.ge.f32.partialorder %v2898_v47, 0.0  ;;  %v707_v6 = vsub.f32 1.0, %v691_v39 }
 0x156   : > { %v693_v56 = vmul.f32 %v2977_v31, %v613_v60  ;;  %v614_v62 = vmul.f32 %v2982_v38, %v598_v37  ;;  %v600_v48 = vadd.f32 0.2548296, %v584_v45  ;;  %v738_v21 = vsub.f32 0.0, %v706_v16 }
 0x157   : > { %v708_v35 = vsub.f32 1.0, %v692_v32  ;;  %v615_v26 = vmul.f32 %v2992_v51, %v599_v17  ;;  %v601_v53 = vadd.f32 0.2548296, %v585_v55  ;;  %vm728_vm8 = vcmp.ge.f32.partialorder %v2914_v1, 0.0 }
 0x158   : > { %v739_v13 = vsub.f32 0.0, %v707_v6  ;;  %v709_v15 = vsub.f32 1.0, %v693_v56  ;;  %v694_v5 = vmul.f32 %v2994_v2, %v614_v62  ;;  %v616_v59 = vmul.f32 %v3004_v14, %v600_v48 }
 0x159   : > { %v754_v9 = vsel %vm722_vm2, %v706_v16, %v738_v21  ;;  %v740_v31 = vsub.f32 0.0, %v708_v35  ;;  %v695_v38 = vmul.f32 %v2999_v10, %v615_v26  ;;  %v617_v42 = vmul.f32 %v3007_v23, %v601_v53 }
 0x15a   : > { %v770_v12 = vadd.f32 1.0, %v754_v9  ;;  %v755_v51 = vsel %vm723_vm3, %v707_v6, %v739_v13  ;;  %v741_v19 = vsub.f32 0.0, %v709_v15  ;;  %v710_v36 = vsub.f32 1.0, %v694_v5 }
 0x15b   : > { %vm729_vm9 = vcmp.ge.f32.partialorder %v2917_v4, 0.0  ;;  %v771_v63 = vadd.f32 1.0, %v755_v51  ;;  %v756_v2 = vsel %vm724_vm4, %v708_v35, %v740_v31  ;;  %v711_v14 = vsub.f32 1.0, %v695_v38 }
 0x15c   : > { %v696_v22 = vmul.f32 %v3013_v40, %v616_v59  ;;  %v786_v39 = vmul.f32 %v770_v12, %v2902_v49  ;;  %v772_v10 = vadd.f32 1.0, %v756_v2  ;;  %v757_v23 = vsel %vm725_vm5, %v709_v15, %v741_v19 }
 0x15d   : > { %v742_v60 = vsub.f32 0.0, %v710_v36  ;;  %v787_v24 = vmul.f32 %v771_v63, %v2904_v50  ;;  %v773_v37 = vadd.f32 1.0, %v757_v23  ;;  %v743_v45 = vsub.f32 0.0, %v711_v14 }
 0x15e   : > { %v712_v16 = vsub.f32 1.0, %v696_v22  ;;  %802 = vxpose.xlu0.b32.start [1/8] (short) %v786_v39, 128  ;;  %v788_v32 = vmul.f32 %v772_v10, %v2907_v54  ;;  %v697_v40 = vmul.f32 %v3015_v44, %v617_v42  ;;  %v490_v49 = vmul.f32 1.0614054, %v3018_v0 }
 0x15f   : > { %v758_v28 = vsel %vm726_vm6, %v710_v36, %v742_v60  ;;  %834 = vxpose.xlu1.b32.start [1/8] (short) %v787_v24, 128  ;;  %v789_v34 = vmul.f32 %v773_v37, %v2910_v58  ;;  %v759_v50 = vsel %vm727_vm7, %v711_v14, %v743_v45  ;;  %v491_v54 = vmul.f32 1.0614054, %v3021_v61 }
 0x160   : > { %v774_v17 = vadd.f32 1.0, %v758_v28  ;;  %v744_v55 = vsub.f32 0.0, %v712_v16  ;;  %v775_v6 = vadd.f32 1.0, %v759_v50  ;;  %v713_v56 = vsub.f32 1.0, %v697_v40 }
 0x161   : > { %v506_v62 = vadd.f32 -1.4531521, %v490_v49  ;;  %2523 = vpow2.f32 %v3032_v20  ;;  %v492_v44 = vmul.f32 1.0614054, %v3035_v46  ;;  %v493_v48 = vmul.f32 1.0614054, %v3039_v41 }
 0x162   : > { %v760_v43 = vsel %vm728_vm8, %v712_v16, %v744_v55  ;;  %803 = vxpose.xlu0.b32.cont [2/8] (short) %v788_v32, 128  ;;  %v790_v58 = vmul.f32 %v774_v17, %v2921_v7  ;;  %v745_v21 = vsub.f32 0.0, %v713_v56  ;;  %v791_v26 = vmul.f32 %v775_v6, %v2929_v18 }
 0x163   : > { %v776_v47 = vadd.f32 1.0, %v760_v43  ;;  %v522_v35 = vmul.f32 %v3018_v0, %v506_v62  ;;  %835 = vxpose.xlu1.b32.cont [2/8] (short) %v789_v34, 128  ;;  %v507_v53 = vadd.f32 -1.4531521, %v491_v54  ;;  %v508_v13 = vadd.f32 -1.4531521, %v492_v44 }
 0x164   : > { %v509_v20 = vadd.f32 -1.4531521, %v493_v48  ;;  %v761_v15 = vsel %vm729_vm9, %v713_v56, %v745_v21  ;;  %v494_v59 = vmul.f32 1.0614054, %v3053_v30  ;;  %v495_v12 = vmul.f32 1.0614054, %v3057_v3 }
 0x165   : > { %v792_v1 = vmul.f32 %v776_v47, %v2934_v27  ;;  %v538_v5 = vadd.f32 1.4214138, %v522_v35  ;;  %v777_v9 = vadd.f32 1.0, %v761_v15  ;;  %v523_v7 = vmul.f32 %v3021_v61, %v507_v53  ;;  %v4617_v35 = vld [vmem:[#allocation12_spill] sm:$0xff] }
 0x166   : > { %v524_v31 = vmul.f32 %v3035_v46, %v508_v13  ;;  %v525_v38 = vmul.f32 %v3039_v41, %v509_v20  ;;  %804 = vxpose.xlu0.b32.cont [3/8] (short) %v790_v58, 128  ;;  %v510_v42 = vadd.f32 -1.4531521, %v494_v59  ;;  %v496_v27 = vmul.f32 1.0614054, %v3071_v33 }
 0x167   : > { %v554_v18 = vmul.f32 %v3018_v0, %v538_v5  ;;  %836 = vxpose.xlu1.b32.cont [3/8] (short) %v791_v26, 128  ;;  %v793_v4 = vmul.f32 %v777_v9, %v2967_v8  ;;  %v539_v51 = vadd.f32 1.4214138, %v523_v7  ;;  %v511_v14 = vadd.f32 -1.4531521, %v495_v12  ;;  %v4618_v26 = vld [vmem:[#allocation21_spill] sm:$0xff] }
 0x168   : > { %v540_v19 = vadd.f32 1.4214138, %v524_v31  ;;  %v541_v36 = vadd.f32 1.4214138, %v525_v38  ;;  %v526_v2 = vmul.f32 %v3053_v30, %v510_v42  ;;  %v512_v22 = vadd.f32 -1.4531521, %v496_v27 }
 0x169   : > { %v570_v63 = vadd.f32 -0.28449672, %v554_v18  ;;  %v555_v39 = vmul.f32 %v3021_v61, %v539_v51  ;;  %v497_v60 = vmul.f32 1.0614054, %v3075_v57  ;;  %v527_v37 = vmul.f32 %v3057_v3, %v511_v14  ;;  %v4619_v18 = vld [vmem:[#allocation14_spill] sm:$0xff]  ;;  %v4620_v42 = vld [vmem:[#allocation23_spill] sm:$0xff] }
 0x16a   : > { %v556_v10 = vmul.f32 %v3035_v46, %v540_v19  ;;  %v557_v23 = vmul.f32 %v3039_v41, %v541_v36  ;;  %805 = vxpose.xlu0.b32.cont [4/8] (short) %v792_v1, 128  ;;  %v542_v8 = vadd.f32 1.4214138, %v526_v2  ;;  %v528_v45 = vmul.f32 %v3071_v33, %v512_v22  ;;  %v4621_v27 = vld [vmem:[#allocation24_spill] sm:$0xff]  ;;  %v4622_v51 = vld [vmem:[#allocation25_spill] sm:$0xff] }
 0x16b   : > { %v586_v24 = vmul.f32 %v3018_v0, %v570_v63  ;;  %v2524_v16 = vpop.eup %2523  ;;  %2525 = vpow2.f32 %v3041_v11  ;;  %837 = vxpose.xlu1.b32.cont [4/8] (short) %v793_v4, 128  ;;  %v571_v32 = vadd.f32 -0.28449672, %v555_v39  ;;  %v543_v17 = vadd.f32 1.4214138, %v527_v37 }
 0x16c   : > { %v572_v28 = vadd.f32 -0.28449672, %v556_v10  ;;  %v573_v40 = vadd.f32 -0.28449672, %v557_v23  ;;  %v558_v34 = vmul.f32 %v3053_v30, %v542_v8  ;;  %v544_v50 = vadd.f32 1.4214138, %v528_v45 }
 0x16d   : > { %v602_v49 = vadd.f32 0.2548296, %v586_v24  ;;  %vm730_vm10 = vcmp.ge.f32.partialorder %v2932_v25, 0.0  ;;  %v587_v55 = vmul.f32 %v3021_v61, %v571_v32  ;;  %v513_v62 = vadd.f32 -1.4531521, %v497_v60  ;;  %v4623_v60 = vld [vmem:[#allocation26_spill] sm:$0xff] }
 0x16e   : > { %v588_v6 = vmul.f32 %v3035_v46, %v572_v28  ;;  %v589_v56 = vmul.f32 %v3039_v41, %v573_v40  ;;  %v574_v54 = vadd.f32 -0.28449672, %v558_v34  ;;  %v559_v43 = vmul.f32 %v3057_v3, %v543_v17  ;;  %v4625_v25 = vld [vmem:[#allocation16_spill] sm:$0xff] }
 0x16f   : > { %v618_v11 = vmul.f32 %v3018_v0, %v602_v49  ;;  %v560_v44 = vmul.f32 %v3071_v33, %v544_v50  ;;  %v603_v48 = vadd.f32 0.2548296, %v587_v55  ;;  %v529_v21 = vmul.f32 %v3075_v57, %v513_v62  ;;  %v4624_v49 = vld [vmem:[#allocation27_spill] sm:$0xff] }
 0x170   : > { %v604_v58 = vadd.f32 0.2548296, %v588_v6  ;;  %v605_v47 = vadd.f32 0.2548296, %v589_v56  ;;  %vm731_vm11 = vcmp.ge.f32.partialorder %v2937_v29, 0.0  ;;  %vm732_vm12 = vcmp.ge.f32.partialorder %v2950_v52, 0.0 }
 0x171   : > { %vm733_vm13 = vcmp.ge.f32.partialorder %v4617_v35, 0.0  ;;  %v698_v53 = vmul.f32 %v4618_v26, %v618_v11  ;;  %v590_v0 = vmul.f32 %v3053_v30, %v574_v54  ;;  %v575_v13 = vadd.f32 -0.28449672, %v559_v43  ;;  %v4628_v52 = vld [vmem:[#allocation20_spill] sm:$0xff] }
 0x172   : > { %v576_v20 = vadd.f32 -0.28449672, %v560_v44  ;;  %v619_v1 = vmul.f32 %v3021_v61, %v603_v48  ;;  %v620_v15 = vmul.f32 %v3035_v46, %v604_v58  ;;  %v621_v5 = vmul.f32 %v3039_v41, %v605_v47  ;;  %v4626_v48 = vld [vmem:[#allocation9_spill] sm:$0xff] }
 0x173   : > { %v545_v59 = vadd.f32 1.4214138, %v529_v21  ;;  %v714_v9 = vsub.f32 1.0, %v698_v53  ;;  %v606_v7 = vadd.f32 0.2548296, %v590_v0  ;;  %v591_v31 = vmul.f32 %v3057_v3, %v575_v13  ;;  %v4627_v58 = vld [vmem:[#allocation17_spill] sm:$0xff] }
 0x174   : > { %v592_v38 = vmul.f32 %v3071_v33, %v576_v20  ;;  %vm734_vm14 = vcmp.ge.f32.partialorder %v4619_v18, 0.0  ;;  %v699_v12 = vmul.f32 %v4620_v42, %v619_v1  ;;  %v700_v4 = vmul.f32 %v4621_v27, %v620_v15  ;;  %v4630_v1 = vld [vmem:[#allocation15_spill] sm:$0xff]  ;;  %v4631_v15 = vld [vmem:[#allocation18_spill] sm:$0xff] }
 0x175   : > { %v701_v19 = vmul.f32 %v4622_v51, %v621_v5  ;;  %v561_v61 = vmul.f32 %v3075_v57, %v545_v59  ;;  %v746_v46 = vsub.f32 0.0, %v714_v9  ;;  %v622_v41 = vmul.f32 %v3053_v30, %v606_v7  ;;  %v3179_v2 = vpop.eup %2525  ;;  %v4632_v5 = vld [vmem:[#allocation22_spill] sm:$0xff]  ;;  %v4634_v27 = vld [vmem:[#allocation11_spill] sm:$0xff] }
 0x176   : > { %v607_v36 = vadd.f32 0.2548296, %v591_v31  ;;  %v608_v63 = vadd.f32 0.2548296, %v592_v38  ;;  %v715_v14 = vsub.f32 1.0, %v699_v12  ;;  %v716_v22 = vsub.f32 1.0, %v700_v4 }
 0x177   : > { %v717_v39 = vsub.f32 1.0, %v701_v19  ;;  %v577_v10 = vadd.f32 -0.28449672, %v561_v61  ;;  %v762_v23 = vsel %vm730_vm10, %v714_v9, %v746_v46  ;;  %v702_v24 = vmul.f32 %v4623_v60, %v622_v41  ;;  %v4633_v18 = vld [vmem:[#allocation10_spill] sm:$0xff]  ;;  %v4635_v41 = vld [vmem:[#allocation19_spill] sm:$0xff] }
 0x178   : > { %v623_v8 = vmul.f32 %v3057_v3, %v607_v36  ;;  %v624_v37 = vmul.f32 %v3071_v33, %v608_v63  ;;  %v778_v45 = vadd.f32 1.0, %v762_v23  ;;  %v747_v32 = vsub.f32 0.0, %v715_v14  ;;  %v4636_v63 = vld [vmem:[#allocation13_spill] sm:$0xff] }
 0x179   : > { %v748_v30 = vsub.f32 0.0, %v716_v22  ;;  %v749_v28 = vsub.f32 0.0, %v717_v39  ;;  %v718_v40 = vsub.f32 1.0, %v702_v24  ;;  %v593_v50 = vmul.f32 %v3075_v57, %v577_v10  ;;  %v941_v24 = vld [vmem:[%s4563_s2] sm:$0x7] }
 0x17a   : > { %v3187_v34 = vmul.f32 %v4624_v49, %v623_v8  ;;  %v3189_v17 = vmul.f32 %v2524_v16, %v624_v37  ;;  %v794_v55 = vmul.f32 %v778_v45, %v4625_v25  ;;  %v763_v6 = vsel %vm731_vm11, %v715_v14, %v747_v32  ;;  %v942_v8 = vld [vmem:[%s4563_s2 + $0x4] sm:$0x7] }
 0x17b   : > { %v764_v3 = vsel %vm732_vm12, %v716_v22, %v748_v30  ;;  %v765_v33 = vsel %vm733_vm13, %v717_v39, %v749_v28  ;;  %v779_v56 = vadd.f32 1.0, %v763_v6  ;;  %v750_v54 = vsub.f32 0.0, %v718_v40  ;;  %v944_v49 = vld [vmem:[#allocation2] sm:$0xff] }
 0x17c   : > { %v780_v62 = vadd.f32 1.0, %v764_v3  ;;  %v781_v11 = vadd.f32 1.0, %v765_v33  ;;  %806 = vxpose.xlu0.b32.cont [5/8] (short) %v794_v55, 128  ;;  %v719_v16 = vsub.f32 1.0, %v3187_v34  ;;  %v720_v43 = vsub.f32 1.0, %v3189_v17  ;;  %v943_v17 = vld [vmem:[%s4563_s2 + $0x8] sm:$0x7] }
 0x17d   : > { %v609_v44 = vadd.f32 0.2548296, %v593_v50  ;;  %v382_v29 = vmul.f32 0.5, %v4626_v48  ;;  %v795_v47 = vmul.f32 %v779_v56, %v4627_v58  ;;  %v766_v35 = vsel %vm734_vm14, %v718_v40, %v750_v54  ;;  %v1184_v55 = vld [vmem:[#allocation2 + $0x1] sm:$0xff] }
 0x17e   : > { %v796_v21 = vmul.f32 %v780_v62, %v4628_v52  ;;  %v4629_v26 = vmov 0.0   ;;  %v782_v53 = vadd.f32 1.0, %v766_v35  ;;  %v751_v0 = vsub.f32 0.0, %v719_v16  ;;  %v1424_v3 = vld [vmem:[#allocation2 + $0x2] sm:$0xff] }
 0x17f   : > { %877 = vst.msk [vmem:[#allocation2 + $0x18] sm:$0x1] %vm876_vm15, %v4629_v26  ;;  %878 = vst.msk [vmem:[#allocation2 + $0x30] sm:$0x1] %vm876_vm15, %v4629_v26  ;;  %v752_v13 = vsub.f32 0.0, %v720_v43  ;;  %v625_v20 = vmul.f32 %v3075_v57, %v609_v44  ;;  %vm735_vm0 = vcmp.ge.f32.partialorder %v4630_v1, 0.0  ;;  %838 = vxpose.xlu1.b32.cont [5/8] (short) %v795_v47, 128  ;;  %v797_v59 = vmul.f32 %v781_v11, %v4632_v5 }
 0x180   : > { %879 = vst.msk [vmem:[#allocation2 + $0x48] sm:$0x1] %vm876_vm15, %v4629_v26  ;;  %880 = vst.msk [vmem:[#allocation2 + $0x60] sm:$0x1] %vm876_vm15, %v4629_v26  ;;  %vm736_vm2 = vcmp.ge.f32.partialorder %v4631_v15, 0.0  ;;  %vm869_vm3 = vcmask 517120   ;;  %807 = vxpose.xlu0.b32.cont [6/8] (short) %v796_v21, 128  ;;  %v798_v9 = vmul.f32 %v782_v53, %v382_v29  ;;  %v767_v7 = vsel %vm735_vm0, %v719_v16, %v751_v0 }
 0x181   : > { %881 = vst.msk [vmem:[#allocation2 + $0x78] sm:$0x1] %vm876_vm15, %v4629_v26  ;;  %882 = vst.msk [vmem:[#allocation2 + $0x90] sm:$0x1] %vm876_vm15, %v4629_v26  ;;  %v768_v31 = vsel %vm736_vm2, %v720_v43, %v752_v13  ;;  %v705_v38 = vmul.f32 %v3179_v2, %v625_v20  ;;  %v383_v57 = vmul.f32 0.5, %v4633_v18  ;;  %v783_v42 = vadd.f32 1.0, %v767_v7 }
 0x182   : > { %883 = vst.msk [vmem:[#allocation2 + $0xa8] sm:$0x1] %vm876_vm15, %v4629_v26  ;;  %884 = vst.msk [vmem:[#allocation2 + $0xc0] sm:$0x1] %vm876_vm15, %v4629_v26  ;;  %v784_v12 = vadd.f32 1.0, %v768_v31  ;;  %v384_v4 = vmul.f32 0.5, %v4634_v27  ;;  %v980_v39 = vlaneseq }
 0x183   : > { %885 = vst.msk [vmem:[#allocation2 + $0xd8] sm:$0x1] %vm876_vm15, %v4629_v26  ;;  %886 = vst.msk [vmem:[#allocation2 + $0xf0] sm:$0x1] %vm876_vm15, %v4629_v26  ;;  %v721_v51 = vsub.f32 1.0, %v705_v38  ;;  %839 = vxpose.xlu1.b32.cont [6/8] (short) %v797_v59, 128  ;;  %v799_v19 = vmul.f32 %v783_v42, %v383_v57  ;;  %vm737_vm4 = vcmp.ge.f32.partialorder %v4635_v41, 0.0 }
 0x184   : > { %887 = vst.msk [vmem:[#allocation2 + $0x108] sm:$0x1] %vm876_vm15, %v4629_v26  ;;  %888 = vst.msk [vmem:[#allocation2 + $0x120] sm:$0x1] %vm876_vm15, %v4629_v26  ;;  %808 = vxpose.xlu0.b32.cont [7/8] (short) %v798_v9, 128  ;;  %v800_v61 = vmul.f32 %v784_v12, %v384_v4  ;;  %v385_v2 = vmul.f32 0.5, %v4636_v63  ;;  %v981_v10 = vshrl.u32 %v980_v39, 7 }
 0x185   : > { %889 = vst.msk [vmem:[#allocation2 + $0x138] sm:$0x1] %vm876_vm15, %v4629_v26  ;;  %890 = vst.msk [vmem:[#allocation2 + $0x150] sm:$0x1] %vm876_vm15, %v4629_v26  ;;  %v753_v46 = vsub.f32 0.0, %v721_v51  ;;  %v945_v54 = vld [vmem:[#allocation2 + $0x8] sm:$0xff] }
 0x186   : > { %891 = vst.msk [vmem:[#allocation2 + $0x168] sm:$0x1] %vm876_vm15, %v4629_v26  ;;  %892 = vst.msk [vmem:[#allocation2 + $0x180] sm:$0x1] %vm876_vm15, %v4629_v26  ;;  %v982_v60 = vsub.s32 0, %v981_v10  ;;  %v1222_v32 = vsub.s32 1, %v981_v10 }
 0x187   : > { %893 = vst.msk [vmem:[#allocation2 + $0x29] sm:$0x1] %vm876_vm15, %v4629_v26  ;;  %894 = vst.msk [vmem:[#allocation2 + $0x41] sm:$0x1] %vm876_vm15, %v4629_v26  ;;  %v769_v36 = vsel %vm737_vm4, %v721_v51, %v753_v46  ;;  %840 = vxpose.xlu1.b32.cont [7/8] (short) %v799_v19, 128  ;;  %v1462_v40 = vsub.s32 2, %v981_v10 }
 0x188   : > { %895 = vst.msk [vmem:[#allocation2 + $0x59] sm:$0x1] %vm876_vm15, %v4629_v26  ;;  %896 = vst.msk [vmem:[#allocation2 + $0x71] sm:$0x1] %vm876_vm15, %v4629_v26  ;;  %v785_v14 = vadd.f32 1.0, %v769_v36  ;;  %809 = vxpose.xlu0.b32.end [8/8] (short) %v800_v61, 128  ;;  %v3290_v30 = vrot.slane %v941_v24, %v982_v60  ;;  %v3292_v28 = vrot.slane %v942_v8, %v982_v60 }
 0x189   : > { %897 = vst.msk [vmem:[#allocation2 + $0x89] sm:$0x1] %vm876_vm15, %v4629_v26  ;;  %898 = vst.msk [vmem:[#allocation2 + $0xa1] sm:$0x1] %vm876_vm15, %v4629_v26  ;;  %v3298_v6 = vrot.slane %v941_v24, %v1222_v32  ;;  %v3303_v62 = vrot.slane %v942_v8, %v1222_v32  ;;  %v3305_v11 = vrot.slane %v941_v24, %v1462_v40 }
 0x18a   : > { %899 = vst.msk [vmem:[#allocation2 + $0xb9] sm:$0x1] %vm876_vm15, %v4629_v26  ;;  %900 = vst.msk [vmem:[#allocation2 + $0xd1] sm:$0x1] %vm876_vm15, %v4629_v26  ;;  %v801_v22 = vmul.f32 %v785_v14, %v385_v2  ;;  %v984_v33 = vmul.f32 %v3290_v30, %v944_v49  ;;  %v3307_v44 = vrot.slane %v943_v17, %v982_v60 }
 0x18b   : > { %901 = vst.msk [vmem:[#allocation2 + $0xe9] sm:$0x1] %vm876_vm15, %v4629_v26  ;;  %902 = vst.msk [vmem:[#allocation2 + $0x101] sm:$0x1] %vm876_vm15, %v4629_v26  ;;  %v3309_v29 = vrot.slane %v943_v17, %v1222_v32  ;;  %v3312_v58 = vmul.f32 %v3298_v6, %v1184_v55  ;;  %v3315_v47 = vmul.f32 %v3305_v11, %v1424_v3 }
 0x18c   : > { %903 = vst.msk [vmem:[#allocation2 + $0x119] sm:$0x1] %vm876_vm15, %v4629_v26  ;;  %904 = vst.msk [vmem:[#allocation2 + $0x131] sm:$0x1] %vm876_vm15, %v4629_v26  ;;  %841 = vxpose.xlu1.b32.end [8/8] (short) %v801_v22, 128  ;;  %v3317_v52 = vrot.slane %v942_v8, %v1462_v40  ;;  %v3319_v21 = vrot.slane %v943_v17, %v1462_v40  ;;  %v985_v1 = vmul.f32 %v3290_v30, %v945_v54 }
 0x18d   : > { %905 = vst.msk [vmem:[#allocation2 + $0x149] sm:$0x1] %vm876_vm15, %v4629_v26  ;;  %906 = vst.msk [vmem:[#allocation2 + $0x161] sm:$0x1] %vm876_vm15, %v4629_v26 }
 0x18e   : > { %907 = vst.msk [vmem:[#allocation2 + $0x179] sm:$0x1] %vm876_vm15, %v4629_v26  ;;  %908 = vst.msk [vmem:[#allocation2 + $0x191] sm:$0x1] %vm876_vm15, %v4629_v26 }
 0x18f   : > { %870 = vst.msk [vmem:[#allocation2 + $0x10] sm:$0x3] %vm869_vm3, %v4629_v26  ;;  %874 = vst.msk [vmem:[#allocation2 + $0x1a8] sm:$0x3] %vm869_vm3, %v4629_v26 }
 0x196   : > { %v1185_v16 = vld [vmem:[#allocation2 + $0x9] sm:$0xff] }
 0x197   : > { %v1425_v43 = vld [vmem:[#allocation2 + $0xa] sm:$0xff]  ;;  %v3325_v5 = vmul.f32 %v3298_v6, %v1185_v16 }
 0x198   : > { %v3328_v59 = vmul.f32 %v3305_v11, %v1425_v43 }
 0x1ec   : > { %v818_v23 = vpop.trf.xlu0 }
 0x1ed   : > { %909 = vst.msk [vmem:[#allocation2 + $0x19] sm:$0xff] %vm866_vm1, %v818_v23 }
 0x1f0   : > { %v850_v37 = vpop.trf.xlu1  ;;  %v819_v45 = vpop.trf.xlu0 }
 0x1f1   : > { %925 = vst.msk [vmem:[#allocation2 + $0xd9] sm:$0xff] %vm866_vm1, %v850_v37  ;;  %910 = vst.msk [vmem:[#allocation2 + $0x21] sm:$0xff] %vm866_vm1, %v819_v45 }
 0x1f4   : > { %v851_v34 = vpop.trf.xlu1  ;;  %v820_v50 = vpop.trf.xlu0  ;;  %v946_v25 = vld [vmem:[#allocation2 + $0x18] sm:$0xff] }
 0x1f5   : > { %926 = vst.msk [vmem:[#allocation2 + $0xe1] sm:$0xff] %vm866_vm1, %v851_v34  ;;  %911 = vst.msk [vmem:[#allocation2 + $0x31] sm:$0xff] %vm866_vm1, %v820_v50  ;;  %v1052_v56 = vmul.f32 %v3292_v28, %v946_v25  ;;  %v1186_v48 = vld [vmem:[#allocation2 + $0x19] sm:$0xff]  ;;  %v986_v0 = vmul.f32 %v3290_v30, %v946_v25 }
 0x1f6   : > { %v3332_v7 = vmul.f32 %v3298_v6, %v1186_v48  ;;  %v1292_v31 = vmul.f32 %v3303_v62, %v1186_v48 }
 0x1f7   : > { %v1084_v9 = vadd.f32 %v1052_v56, %v984_v33 }
 0x1f8   : > { %v852_v35 = vpop.trf.xlu1  ;;  %v821_v53 = vpop.trf.xlu0  ;;  %v1426_v13 = vld [vmem:[#allocation2 + $0x1a] sm:$0xff]  ;;  %v1427_v18 = vld [vmem:[#allocation2 + $0x22] sm:$0xff] }
 0x1f9   : > { %927 = vst.msk [vmem:[#allocation2 + $0xf1] sm:$0xff] %vm866_vm1, %v852_v35  ;;  %v947_v20 = vld [vmem:[#allocation2 + $0x20] sm:$0xff]  ;;  %912 = vst.msk [vmem:[#allocation2 + $0x39] sm:$0xff] %vm866_vm1, %v821_v53  ;;  %v962_v57 = vld [vmem:[#allocation2 + $0xd8] sm:$0xff]  ;;  %v3349_v19 = vmul.f32 %v3305_v11, %v1426_v13  ;;  %v3352_v61 = vmul.f32 %v3317_v52, %v1426_v13  ;;  %v3358_v41 = vmul.f32 %v3317_v52, %v1427_v18 }
 0x1fa   : > { %v1187_v15 = vld [vmem:[#allocation2 + $0x21] sm:$0xff]  ;;  %v1053_v38 = vmul.f32 %v3292_v28, %v947_v20  ;;  %v1202_v42 = vld [vmem:[#allocation2 + $0xd9] sm:$0xff]  ;;  %v3337_v12 = vmul.f32 %v3292_v28, %v962_v57  ;;  %v3343_v4 = vmul.f32 %v3307_v44, %v962_v57  ;;  %v987_v10 = vmul.f32 %v3290_v30, %v947_v20 }
 0x1fb   : > { %v3340_v27 = vmul.f32 %v3303_v62, %v1202_v42  ;;  %v3346_v51 = vmul.f32 %v3309_v29, %v1202_v42  ;;  %v3355_v46 = vmul.f32 %v3303_v62, %v1187_v15  ;;  %v3363_v23 = vmul.f32 %v3298_v6, %v1187_v15 }
 0x1fc   : > { %v853_v36 = vpop.trf.xlu1  ;;  %v1442_v63 = vld [vmem:[#allocation2 + $0xda] sm:$0xff]  ;;  %v822_v2 = vpop.trf.xlu0  ;;  %v948_v14 = vld [vmem:[#allocation2 + $0x30] sm:$0xff]  ;;  %v1085_v39 = vadd.f32 %v1053_v38, %v985_v1  ;;  %v3366_v60 = vmul.f32 %v3305_v11, %v1427_v18  ;;  %v3375_v32 = vld [vmem:[#allocation2 + $0xe2] sm:$0xff]  ;;  %v3378_v40 = vmul.f32 %v3290_v30, %v962_v57  ;;  %v3381_v49 = vmul.f32 %v3298_v6, %v1202_v42 }
 0x1fd   : > { %4637 = vst [vmem:[#allocation12_spill] sm:$0xff] %v3346_v51  ;;  %v1188_v22 = vld [vmem:[#allocation2 + $0x31] sm:$0xff]  ;;  %928 = vst.msk [vmem:[#allocation2 + $0xf9] sm:$0xff] %vm866_vm1, %v853_v36  ;;  %v1120_v24 = vmul.f32 %v3307_v44, %v948_v14  ;;  %v1054_v8 = vmul.f32 %v3292_v28, %v948_v14  ;;  %v3371_v37 = vld [vmem:[#allocation2 + $0xe0] sm:$0xff]  ;;  %v3384_v34 = vmul.f32 %v3317_v52, %v1442_v63 }
 0x1fe   : > { %913 = vst.msk [vmem:[#allocation2 + $0x49] sm:$0xff] %vm866_vm1, %v822_v2  ;;  %4638 = vst [vmem:[#allocation21_spill] sm:$0xff] %v3371_v37  ;;  %v3373_v45 = vld [vmem:[#allocation2 + $0xe1] sm:$0xff]  ;;  %v3388_v17 = vmul.f32 %v3292_v28, %v3371_v37  ;;  %v3395_v25 = vmul.f32 %v3319_v21, %v1442_v63  ;;  %v3398_v3 = vmul.f32 %v3298_v6, %v1188_v22 }
 0x1ff   : > { %4639 = vst [vmem:[#allocation14_spill] sm:$0xff] %v3373_v45  ;;  %4640 = vst [vmem:[#allocation23_spill] sm:$0xff] %v3375_v32  ;;  %v3392_v50 = vmul.f32 %v3303_v62, %v3373_v45  ;;  %v1152_v55 = vadd.f32 %v1120_v24, %v1084_v9  ;;  %v1360_v33 = vmul.f32 %v3309_v29, %v1188_v22 }
 0x200   : > { %4641 = vst [vmem:[#allocation24_spill] sm:$0xff] %v3381_v49  ;;  %4642 = vst [vmem:[#allocation25_spill] sm:$0xff] %v3395_v25  ;;  %v3402_v56 = vmul.f32 %v3303_v62, %v1188_v22  ;;  %v854_v54 = vpop.trf.xlu1  ;;  %v823_v16 = vpop.trf.xlu0  ;;  %v1428_v43 = vld [vmem:[#allocation2 + $0x32] sm:$0xff]  ;;  %v1086_v35 = vadd.f32 %v1054_v8, %v986_v0  ;;  %v988_v53 = vmul.f32 %v3290_v30, %v948_v14  ;;  %v1429_v38 = vld [vmem:[#allocation2 + $0x3a] sm:$0xff] }
 0x201   : > { %v949_v48 = vld [vmem:[#allocation2 + $0x38] sm:$0xff]  ;;  %929 = vst.msk [vmem:[#allocation2 + $0x109] sm:$0xff] %vm866_vm1, %v854_v54  ;;  %v3406_v13 = vld [vmem:[#allocation2 + $0xf0] sm:$0xff]  ;;  %v3410_v20 = vmul.f32 %v3317_v52, %v3375_v32  ;;  %v3413_v1 = vmul.f32 %v3305_v11, %v1442_v63  ;;  %914 = vst.msk [vmem:[#allocation2 + $0x51] sm:$0xff] %vm866_vm1, %v823_v16  ;;  %v1256_v15 = vadd.f32 %v3312_v58, %v1152_v55 }
 0x202   : > { %4643 = vst [vmem:[#allocation26_spill] sm:$0xff] %v3406_v13  ;;  %v1121_v9 = vmul.f32 %v3307_v44, %v949_v48  ;;  %v1189_v0 = vld [vmem:[#allocation2 + $0x39] sm:$0xff]  ;;  %v3418_v18 = vld [vmem:[#allocation2 + $0xf1] sm:$0xff]  ;;  %v3422_v57 = vmul.f32 %v3307_v44, %v3371_v37  ;;  %v3426_v42 = vmul.f32 %v3309_v29, %v3373_v45  ;;  %v1055_v36 = vmul.f32 %v3292_v28, %v949_v48 }
 0x203   : > { %4644 = vst [vmem:[#allocation27_spill] sm:$0xff] %v3410_v20  ;;  %4645 = vst [vmem:[#allocation16_spill] sm:$0xff] %v3413_v1  ;;  %v3431_v63 = vmul.f32 %v3307_v44, %v3406_v13  ;;  %v3435_v58 = vmul.f32 %v3298_v6, %v3418_v18  ;;  %v3439_v2 = vmul.f32 %v3309_v29, %v3418_v18 }
 0x204   : > { %4646 = vst [vmem:[#allocation9_spill] sm:$0xff] %v3418_v18  ;;  %4647 = vst [vmem:[#allocation17_spill] sm:$0xff] %v3422_v57  ;;  %v1324_v14 = vadd.f32 %v1292_v31, %v1256_v15  ;;  %v3442_v22 = vmul.f32 %v3305_v11, %v1428_v43  ;;  %v1153_v24 = vadd.f32 %v1121_v9, %v1085_v39  ;;  %v855_v8 = vpop.trf.xlu1  ;;  %v824_v54 = vpop.trf.xlu0 }
 0x205   : > { %4648 = vst [vmem:[#allocation20_spill] sm:$0xff] %v3426_v42  ;;  %4649 = vst [vmem:[#allocation15_spill] sm:$0xff] %v3435_v58  ;;  %v3446_v55 = vmul.f32 %v3292_v28, %v3406_v13  ;;  %v1600_v16 = vmul.f32 %v3319_v21, %v1428_v43  ;;  %v1361_v26 = vmul.f32 %v3309_v29, %v1189_v0  ;;  %v950_v32 = vld [vmem:[#allocation2 + $0x48] sm:$0xff] }
 0x206   : > { %v3451_v58 = vmul.f32 %v3319_v21, %v1429_v38  ;;  %v3454_v31 = vmul.f32 %v3317_v52, %v1428_v43  ;;  %930 = vst.msk [vmem:[#allocation2 + $0x111] sm:$0xff] %vm866_vm1, %v855_v8  ;;  %915 = vst.msk [vmem:[#allocation2 + $0x61] sm:$0xff] %vm866_vm1, %v824_v54  ;;  %v1392_v39 = vadd.f32 %v1360_v33, %v1324_v14  ;;  %v1190_v42 = vld [vmem:[#allocation2 + $0x49] sm:$0xff] }
 0x207   : > { %v1257_v15 = vadd.f32 %v3325_v5, %v1153_v24  ;;  %v1122_v9 = vmul.f32 %v3307_v44, %v950_v32  ;;  %v1295_v13 = vmul.f32 %v3303_v62, %v1189_v0  ;;  %v1087_v25 = vadd.f32 %v1055_v36, %v987_v10 }
 0x208   : > { %v3462_v1 = vmul.f32 %v3317_v52, %v1429_v38  ;;  %v1056_v45 = vmul.f32 %v3292_v28, %v950_v32  ;;  %v989_v43 = vmul.f32 %v3290_v30, %v949_v48  ;;  %v1496_v8 = vadd.f32 %v3315_v47, %v1392_v39  ;;  %v856_v14 = vpop.trf.xlu1  ;;  %v825_v24 = vpop.trf.xlu0  ;;  %v3472_v10 = vld [vmem:[#allocation2 + $0x50] sm:$0xff] }
 0x209   : > { %v1325_v54 = vadd.f32 %v3355_v46, %v1257_v15  ;;  %v1154_v33 = vadd.f32 %v1122_v9, %v1086_v35  ;;  %v3469_v5 = vmul.f32 %v3298_v6, %v1189_v0  ;;  %v1362_v57 = vmul.f32 %v3309_v29, %v1190_v42  ;;  %931 = vst.msk [vmem:[#allocation2 + $0x121] sm:$0xff] %vm866_vm1, %v856_v14  ;;  %v3482_v46 = vld [vmem:[#allocation2 + $0xf2] sm:$0xff]  ;;  %v1430_v15 = vld [vmem:[#allocation2 + $0x4a] sm:$0xff] }
 0x20a   : > { %v3475_v36 = vmul.f32 %v3303_v62, %v1190_v42  ;;  %v3479_v48 = vmul.f32 %v3305_v11, %v1429_v38  ;;  %v990_v47 = vmul.f32 %v3290_v30, %v950_v32  ;;  %4650 = vst [vmem:[#allocation18_spill] sm:$0xff] %v3482_v46  ;;  %916 = vst.msk [vmem:[#allocation2 + $0x69] sm:$0xff] %vm866_vm1, %v825_v24  ;;  %v1191_v9 = vld [vmem:[#allocation2 + $0x51] sm:$0xff] }
 0x20b   : > { %v1564_v35 = vadd.f32 %v3352_v61, %v1496_v8  ;;  %v1393_v0 = vadd.f32 %v1361_v26, %v1325_v54  ;;  %v1258_v39 = vadd.f32 %v3332_v7, %v1154_v33  ;;  %v3488_v20 = vmul.f32 %v3298_v6, %v1190_v42  ;;  %v3490_v14 = vld [vmem:[#allocation2 + $0xf8] sm:$0xff] }
 0x20c   : > { %4651 = vst [vmem:[#allocation22_spill] sm:$0xff] %v3490_v14  ;;  %v1123_v38 = vmul.f32 %v3307_v44, %v3472_v10  ;;  %v1431_v32 = vld [vmem:[#allocation2 + $0x52] sm:$0xff]  ;;  %v1088_v37 = vadd.f32 %v1056_v45, %v988_v53  ;;  %v3496_v24 = vmul.f32 %v3319_v21, %v3482_v46  ;;  %v3500_v26 = vmul.f32 %v3307_v44, %v3490_v14  ;;  %v857_v54 = vpop.trf.xlu1  ;;  %v826_v45 = vpop.trf.xlu0 }
 0x20d   : > { %v3502_v7 = vld [vmem:[#allocation2 + $0xf9] sm:$0xff]  ;;  %v1632_v61 = vadd.f32 %v1600_v16, %v1564_v35  ;;  %v1497_v42 = vadd.f32 %v3328_v59, %v1393_v0  ;;  %v1326_v8 = vadd.f32 %v3402_v56, %v1258_v39  ;;  %v1602_v53 = vmul.f32 %v3319_v21, %v1430_v15  ;;  %932 = vst.msk [vmem:[#allocation2 + $0x129] sm:$0xff] %vm866_vm1, %v857_v54  ;;  %v3522_v0 = vld [vmem:[#allocation2 + $0x61] sm:$0xff] }
 0x20e   : > { %4652 = vst [vmem:[#allocation10_spill] sm:$0xff] %v3502_v7  ;;  %v3508_v33 = vmul.f32 %v3309_v29, %v3502_v7  ;;  %v1155_v46 = vadd.f32 %v1123_v38, %v1087_v25  ;;  %v1363_v51 = vmul.f32 %v3309_v29, %v1191_v9  ;;  %v3512_v14 = vld [vmem:[#allocation2 + $0x60] sm:$0xff]  ;;  %v1057_v16 = vmul.f32 %v3292_v28, %v3472_v10 }
 0x20f   : > { %917 = vst.msk [vmem:[#allocation2 + $0x79] sm:$0xff] %vm866_vm1, %v826_v45  ;;  %1664 = vxpose.xlu1.b32.start [1/16] (narrow) %v1632_v61, 64  ;;  %v1565_v59 = vadd.f32 %v3358_v41, %v1497_v42  ;;  %v1394_v56 = vadd.f32 %v1362_v57, %v1326_v8  ;;  %v1603_v35 = vmul.f32 %v3319_v21, %v1431_v32 }
 0x210   : > { %4653 = vst [vmem:[#allocation11_spill] sm:$0xff] %v3508_v33  ;;  %v1124_v25 = vmul.f32 %v3307_v44, %v3512_v14  ;;  %v1259_v39 = vadd.f32 %v3363_v23, %v1155_v46  ;;  %v3526_v38 = vmul.f32 %v3317_v52, %v1430_v15  ;;  %v1297_v54 = vmul.f32 %v3303_v62, %v1191_v9  ;;  %v858_v45 = vpop.trf.xlu1  ;;  %v827_v7 = vpop.trf.xlu0 }
 0x211   : > { %v1058_v61 = vmul.f32 %v3292_v28, %v3512_v14  ;;  %v1633_v41 = vadd.f32 %v3451_v58, %v1565_v59  ;;  %v1498_v57 = vadd.f32 %v3349_v19, %v1394_v56  ;;  %v3534_v8 = vmul.f32 %v3317_v52, %v1431_v32  ;;  %v3538_v46 = vld [vmem:[#allocation2 + $0x68] sm:$0xff]  ;;  %933 = vst.msk [vmem:[#allocation2 + $0x139] sm:$0xff] %vm866_vm1, %v858_v45 }
 0x212   : > { %v1156_v42 = vadd.f32 %v1124_v25, %v1088_v37  ;;  %v1327_v49 = vadd.f32 %v1295_v13, %v1259_v39  ;;  %v1364_v23 = vmul.f32 %v3309_v29, %v3522_v0  ;;  %v1089_v33 = vadd.f32 %v1057_v16, %v989_v43  ;;  %918 = vst.msk [vmem:[#allocation2 + $0x81] sm:$0xff] %vm866_vm1, %v827_v7  ;;  %v1432_v58 = vld [vmem:[#allocation2 + $0x62] sm:$0xff]  ;;  %v3553_v16 = vld [vmem:[#allocation2 + $0x6a] sm:$0xff] }
 0x213   : > { %v3541_v18 = vmul.f32 %v3305_v11, %v1430_v15  ;;  %1665 = vxpose.xlu1.b32.cont [2/16] (narrow) %v1633_v41, 64  ;;  %v1566_v19 = vadd.f32 %v3454_v31, %v1498_v57  ;;  %v1125_v13 = vmul.f32 %v3307_v44, %v3538_v46  ;;  %v3549_v59 = vld [vmem:[#allocation2 + $0x69] sm:$0xff]  ;;  %v1298_v43 = vmul.f32 %v3303_v62, %v3522_v0 }
 0x214   : > { %v1260_v37 = vadd.f32 %v3398_v3, %v1156_v42  ;;  %v1395_v15 = vadd.f32 %v1363_v51, %v1327_v49  ;;  %v1090_v56 = vadd.f32 %v1058_v61, %v990_v47  ;;  %v991_v7 = vmul.f32 %v3290_v30, %v3472_v10  ;;  %v859_v57 = vpop.trf.xlu1  ;;  %v828_v42 = vpop.trf.xlu0 }
 0x215   : > { %v3558_v31 = vmul.f32 %v3298_v6, %v1191_v9  ;;  %v1634_v3 = vadd.f32 %v1602_v53, %v1566_v19  ;;  %v1157_v39 = vadd.f32 %v1125_v13, %v1089_v33  ;;  %v3562_v41 = vmul.f32 %v3305_v11, %v1431_v32  ;;  %934 = vst.msk [vmem:[#allocation2 + $0x141] sm:$0xff] %vm866_vm1, %v859_v57 }
 0x216   : > { %v1328_v25 = vadd.f32 %v3475_v36, %v1260_v37  ;;  %v1499_v51 = vadd.f32 %v3366_v60, %v1395_v15  ;;  %v1604_v49 = vmul.f32 %v3319_v21, %v1432_v58  ;;  %v1365_v47 = vmul.f32 %v3309_v29, %v3549_v59  ;;  %v3568_v10 = vld [vmem:[#allocation2 + $0x78] sm:$0xff]  ;;  %919 = vst.msk [vmem:[#allocation2 + $0x91] sm:$0xff] %vm866_vm1, %v828_v42 }
 0x217   : > { %v1059_v9 = vmul.f32 %v3292_v28, %v3538_v46  ;;  %1666 = vxpose.xlu1.b32.cont [3/16] (narrow) %v1634_v3, 64  ;;  %v1261_v32 = vadd.f32 %v3469_v5, %v1157_v39  ;;  %v1605_v60 = vmul.f32 %v3319_v21, %v3553_v16  ;;  %v1126_v33 = vmul.f32 %v3307_v44, %v3568_v10  ;;  %v3579_v53 = vld [vmem:[#allocation2 + $0x79] sm:$0xff] }
 0x218   : > { %v1396_v36 = vadd.f32 %v1364_v23, %v1328_v25  ;;  %v1567_v61 = vadd.f32 %v3462_v1, %v1499_v51  ;;  %v3583_v45 = vmul.f32 %v3317_v52, %v1432_v58  ;;  %v1299_v19 = vmul.f32 %v3303_v62, %v3549_v59  ;;  %v860_v3 = vpop.trf.xlu1  ;;  %v829_v25 = vpop.trf.xlu0 }
 0x219   : > { %v1060_v23 = vmul.f32 %v3292_v28, %v3568_v10  ;;  %v1329_v37 = vadd.f32 %v1297_v54, %v1261_v32  ;;  %v1158_v13 = vadd.f32 %v1126_v33, %v1090_v56  ;;  %v3592_v15 = vmul.f32 %v3317_v52, %v3553_v16  ;;  %v3596_v57 = vld [vmem:[#allocation2 + $0x80] sm:$0xff]  ;;  %935 = vst.msk [vmem:[#allocation2 + $0x151] sm:$0xff] %vm866_vm1, %v860_v3 }
 0x21a   : > { %v1500_v5 = vadd.f32 %v3442_v22, %v1396_v36  ;;  %v1635_v1 = vadd.f32 %v1603_v35, %v1567_v61  ;;  %v1366_v39 = vmul.f32 %v3309_v29, %v3579_v53  ;;  %v1091_v42 = vadd.f32 %v1059_v9, %v991_v7  ;;  %920 = vst.msk [vmem:[#allocation2 + $0x99] sm:$0xff] %vm866_vm1, %v829_v25  ;;  %v1434_v36 = vld [vmem:[#allocation2 + $0x7a] sm:$0xff] }
 0x21b   : > { %v992_v51 = vmul.f32 %v3290_v30, %v3512_v14  ;;  %v1397_v54 = vadd.f32 %v1365_v47, %v1329_v37  ;;  %v1262_v56 = vadd.f32 %v3488_v20, %v1158_v13  ;;  %v3604_v35 = vld [vmem:[#allocation2 + $0x81] sm:$0xff]  ;;  %v1232_v32 = vmul.f32 %v3298_v6, %v3522_v0 }
 0x21c   : > { %v1568_v22 = vadd.f32 %v3526_v38, %v1500_v5  ;;  %1667 = vxpose.xlu1.b32.cont [4/16] (narrow) %v1635_v1, 64  ;;  %v1127_v7 = vmul.f32 %v3307_v44, %v3596_v57  ;;  %v3610_v14 = vld [vmem:[#allocation2 + $0x82] sm:$0xff]  ;;  %v1300_v33 = vmul.f32 %v3303_v62, %v3579_v53  ;;  %v3615_v38 = vmul.f32 %v3305_v11, %v1432_v58  ;;  %v861_v5 = vpop.trf.xlu1  ;;  %v830_v37 = vpop.trf.xlu0 }
 0x21d   : > { %v1092_v9 = vadd.f32 %v1060_v23, %v992_v51  ;;  %v1501_v47 = vadd.f32 %v3479_v48, %v1397_v54  ;;  %v1330_v61 = vadd.f32 %v1298_v43, %v1262_v56  ;;  %v993_v0 = vmul.f32 %v3290_v30, %v3538_v46  ;;  %v3623_v25 = vld [vmem:[#allocation2 + $0x90] sm:$0xff]  ;;  %936 = vst.msk [vmem:[#allocation2 + $0x159] sm:$0xff] %vm866_vm1, %v861_v5 }
 0x21e   : > { %v1636_v20 = vadd.f32 %v1604_v49, %v1568_v22  ;;  %v1606_v13 = vmul.f32 %v3319_v21, %v1434_v36  ;;  %v1159_v3 = vadd.f32 %v1127_v7, %v1091_v42  ;;  %v1367_v23 = vmul.f32 %v3309_v29, %v3604_v35  ;;  %921 = vst.msk [vmem:[#allocation2 + $0xa9] sm:$0xff] %vm866_vm1, %v830_v37  ;;  %v3634_v1 = vld [vmem:[#allocation2 + $0x91] sm:$0xff] }
 0x21f   : > { %v1061_v58 = vmul.f32 %v3292_v28, %v3596_v57  ;;  %v1569_v48 = vadd.f32 %v3534_v8, %v1501_v47  ;;  %v1398_v46 = vadd.f32 %v1366_v39, %v1330_v61  ;;  %v1607_v43 = vmul.f32 %v3319_v21, %v3610_v14 }
 0x220   : > { %v1128_v49 = vmul.f32 %v3307_v44, %v3623_v25  ;;  %1668 = vxpose.xlu1.b32.cont [5/16] (narrow) %v1636_v20, 64  ;;  %v1263_v42 = vadd.f32 %v3558_v31, %v1159_v3  ;;  %v3638_v51 = vmul.f32 %v3317_v52, %v1434_v36  ;;  %v1233_v22 = vmul.f32 %v3298_v6, %v3549_v59  ;;  %v862_v20 = vpop.trf.xlu1  ;;  %v831_v47 = vpop.trf.xlu0 }
 0x221   : > { %v1301_v8 = vmul.f32 %v3303_v62, %v3604_v35  ;;  %v1637_v39 = vadd.f32 %v1605_v60, %v1569_v48  ;;  %v1502_v54 = vadd.f32 %v3541_v18, %v1398_v46  ;;  %v3647_v7 = vmul.f32 %v3305_v11, %v3553_v16  ;;  %v3651_v5 = vld [vmem:[#allocation2 + $0x98] sm:$0xff]  ;;  %937 = vst.msk [vmem:[#allocation2 + $0x169] sm:$0xff] %vm866_vm1, %v862_v20 }
 0x222   : > { %v1160_v56 = vadd.f32 %v1128_v49, %v1092_v9  ;;  %v1331_v31 = vadd.f32 %v1299_v19, %v1263_v42  ;;  %v1368_v61 = vmul.f32 %v3309_v29, %v3634_v1  ;;  %v1093_v59 = vadd.f32 %v1061_v58, %v993_v0  ;;  %922 = vst.msk [vmem:[#allocation2 + $0xb1] sm:$0xff] %vm866_vm1, %v831_v47  ;;  %v3660_v60 = vld [vmem:[#allocation2 + $0x92] sm:$0xff]  ;;  %v3674_v42 = vld [vmem:[#allocation2 + $0x9a] sm:$0xff] }
 0x223   : > { %v3655_v37 = vmul.f32 %v3317_v52, %v3610_v14  ;;  %v1570_v18 = vadd.f32 %v3583_v45, %v1502_v54  ;;  %v1129_v19 = vmul.f32 %v3307_v44, %v3651_v5  ;;  %v3664_v9 = vld [vmem:[#allocation2 + $0x99] sm:$0xff]  ;;  %v1062_v0 = vmul.f32 %v3292_v28, %v3623_v25 }
 0x224   : > { %v1264_v16 = vadd.f32 %v1232_v32, %v1160_v56  ;;  %1669 = vxpose.xlu1.b32.cont [6/16] (narrow) %v1637_v39, 64  ;;  %v1399_v3 = vadd.f32 %v1367_v23, %v1331_v31  ;;  %v994_v58 = vmul.f32 %v3290_v30, %v3568_v10  ;;  %v1234_v48 = vmul.f32 %v3298_v6, %v3579_v53  ;;  %v863_v56 = vpop.trf.xlu1  ;;  %v832_v39 = vpop.trf.xlu0 }
 0x225   : > { %v1302_v45 = vmul.f32 %v3303_v62, %v3634_v1  ;;  %v1638_v32 = vadd.f32 %v1606_v13, %v1570_v18  ;;  %v1161_v49 = vadd.f32 %v1129_v19, %v1093_v59  ;;  %v3677_v54 = vmul.f32 %v3305_v11, %v1434_v36  ;;  %v3684_v20 = vld [vmem:[#allocation2 + $0xa8] sm:$0xff]  ;;  %938 = vst.msk [vmem:[#allocation2 + $0x171] sm:$0xff] %vm866_vm1, %v863_v56 }
 0x226   : > { %v1332_v46 = vadd.f32 %v1300_v33, %v1264_v16  ;;  %v1503_v23 = vadd.f32 %v3562_v41, %v1399_v3  ;;  %v1608_v10 = vmul.f32 %v3319_v21, %v3660_v60  ;;  %v1369_v53 = vmul.f32 %v3309_v29, %v3664_v9  ;;  %923 = vst.msk [vmem:[#allocation2 + $0xc1] sm:$0xff] %vm866_vm1, %v832_v39  ;;  %v3692_v31 = vld [vmem:[#allocation2 + $0xa9] sm:$0xff] }
 0x227   : > { %v1063_v33 = vmul.f32 %v3292_v28, %v3651_v5  ;;  %v1265_v13 = vadd.f32 %v1233_v22, %v1161_v49  ;;  %v1094_v47 = vadd.f32 %v1062_v0, %v994_v58  ;;  %v1130_v41 = vmul.f32 %v3307_v44, %v3684_v20 }
 0x228   : > { %v1400_v36 = vadd.f32 %v1368_v61, %v1332_v46  ;;  %1670 = vxpose.xlu1.b32.cont [7/16] (narrow) %v1638_v32, 64  ;;  %v1571_v59 = vadd.f32 %v3592_v15, %v1503_v23  ;;  %v1609_v18 = vmul.f32 %v3319_v21, %v3674_v42  ;;  %v1542_v16 = vmul.f32 %v3317_v52, %v3660_v60  ;;  %v864_v58 = vpop.trf.xlu1  ;;  %v833_v32 = vpop.trf.xlu0 }
 0x229   : > { %v995_v19 = vmul.f32 %v3290_v30, %v3596_v57  ;;  %v1333_v61 = vadd.f32 %v1301_v8, %v1265_v13  ;;  %v1162_v0 = vadd.f32 %v1130_v41, %v1094_v47  ;;  %v1235_v3 = vmul.f32 %v3298_v6, %v3604_v35  ;;  %v3706_v49 = vld [vmem:[#allocation2 + $0xb0] sm:$0xff]  ;;  %939 = vst.msk [vmem:[#allocation2 + $0x181] sm:$0xff] %vm866_vm1, %v864_v58 }
 0x22a   : > { %v1504_v22 = vadd.f32 %v3615_v38, %v1400_v36  ;;  %v1639_v46 = vadd.f32 %v1607_v43, %v1571_v59  ;;  %v1370_v15 = vmul.f32 %v3309_v29, %v3692_v31  ;;  %v1303_v39 = vmul.f32 %v3303_v62, %v3664_v9  ;;  %924 = vst.msk [vmem:[#allocation2 + $0xc9] sm:$0xff] %vm866_vm1, %v833_v32  ;;  %v3713_v8 = vld [vmem:[#allocation2 + $0xaa] sm:$0xff]  ;;  %v3717_v23 = vld [vmem:[#allocation2 + $0xb2] sm:$0xff] }
 0x22b   : > { %v1095_v56 = vadd.f32 %v1063_v33, %v995_v19  ;;  %v1401_v38 = vadd.f32 %v1369_v53, %v1333_v61  ;;  %v1266_v35 = vadd.f32 %v1234_v48, %v1162_v0  ;;  %v3715_v43 = vld [vmem:[#allocation2 + $0xb1] sm:$0xff]  ;;  %v1064_v33 = vmul.f32 %v3292_v28, %v3684_v20 }
 0x22c   : > { %v1572_v57 = vadd.f32 %v3638_v51, %v1504_v22  ;;  %1671 = vxpose.xlu1.b32.cont [8/16] (narrow) %v1639_v46, 64  ;;  %v1131_v36 = vmul.f32 %v3307_v44, %v3706_v49  ;;  %v1475_v13 = vmul.f32 %v3305_v11, %v3610_v14  ;;  %v1543_v51 = vmul.f32 %v3317_v52, %v3674_v42  ;;  %v865_v19 = vpop.trf.xlu1 }
 0x22d   : > { %v996_v48 = vmul.f32 %v3290_v30, %v3623_v25  ;;  %v1505_v47 = vadd.f32 %v3647_v7, %v1401_v38  ;;  %v1334_v41 = vadd.f32 %v1302_v45, %v1266_v35  ;;  %v1236_v59 = vmul.f32 %v3298_v6, %v3634_v1  ;;  %v960_v58 = vld [vmem:[#allocation2 + $0xc0] sm:$0xff]  ;;  %940 = vst.msk [vmem:[#allocation2 + $0x189] sm:$0xff] %vm866_vm1, %v865_v19 }
 0x22e   : > { %v1640_v53 = vadd.f32 %v1608_v10, %v1572_v57  ;;  %v1610_v22 = vmul.f32 %v3319_v21, %v3713_v8  ;;  %v1163_v61 = vadd.f32 %v1131_v36, %v1095_v56  ;;  %v1371_v14 = vmul.f32 %v3309_v29, %v3715_v43  ;;  %v3741_v32 = vld [vmem:[#allocation2 + $0xc1] sm:$0xff] }
 0x22f   : > { %v1611_v0 = vmul.f32 %v3319_v21, %v3717_v23  ;;  %v1573_v25 = vadd.f32 %v3655_v37, %v1505_v47  ;;  %v1402_v7 = vadd.f32 %v1370_v15, %v1334_v41  ;;  %v1096_v45 = vadd.f32 %v1064_v33, %v996_v48 }
 0x230   : > { %v1132_v1 = vmul.f32 %v3307_v44, %v960_v58  ;;  %1672 = vxpose.xlu1.b32.cont [9/16] (narrow) %v1640_v53, 64  ;;  %v1267_v10 = vadd.f32 %v1235_v3, %v1163_v61  ;;  %v1304_v46 = vmul.f32 %v3303_v62, %v3692_v31  ;;  %v1000_v56 = vmul.f32 %v3290_v30, %v960_v58 }
 0x231   : > { %v1065_v57 = vmul.f32 %v3292_v28, %v3706_v49  ;;  %v1641_v38 = vadd.f32 %v1609_v18, %v1573_v25  ;;  %v1506_v35 = vadd.f32 %v3677_v54, %v1402_v7  ;;  %v1476_v15 = vmul.f32 %v3305_v11, %v3660_v60  ;;  %v3754_v48 = vld [vmem:[#allocation2 + $0xc8] sm:$0xff] }
 0x232   : > { %v1164_v37 = vadd.f32 %v1132_v1, %v1096_v45  ;;  %v1335_v33 = vadd.f32 %v1303_v39, %v1267_v10  ;;  %v1544_v3 = vmul.f32 %v3317_v52, %v3713_v8  ;;  %v1100_v36 = vadd.f32 %v3337_v12, %v1000_v56  ;;  %v3760_v18 = vld [vmem:[#allocation2 + $0xc2] sm:$0xff] }
 0x233   : > { %v997_v53 = vmul.f32 %v3290_v30, %v3651_v5  ;;  %v1574_v47 = vadd.f32 %v1542_v16, %v1506_v35  ;;  %v1372_v54 = vmul.f32 %v3309_v29, %v3741_v32  ;;  %v1240_v60 = vmul.f32 %v3298_v6, %v3741_v32  ;;  %v3767_v25 = vld [vmem:[#allocation2 + $0xc9] sm:$0xff] }
 0x234   : > { %v1268_v41 = vadd.f32 %v1236_v59, %v1164_v37  ;;  %1673 = vxpose.xlu1.b32.cont [10/16] (narrow) %v1641_v38, 64  ;;  %v1403_v39 = vadd.f32 %v1371_v14, %v1335_v33  ;;  %v1168_v19 = vadd.f32 %v3431_v63, %v1100_v36  ;;  %v1133_v61 = vmul.f32 %v3307_v44, %v3754_v48  ;;  %v3784_v37 = vld [vmem:[#allocation2 + $0xca] sm:$0xff] }
 0x235   : > { %v1097_v12 = vadd.f32 %v1065_v57, %v997_v53  ;;  %v1642_v5 = vadd.f32 %v1610_v22, %v1574_v47  ;;  %v1237_v59 = vmul.f32 %v3298_v6, %v3664_v9  ;;  %v1305_v7 = vmul.f32 %v3303_v62, %v3715_v43 }
 0x236   : > { %v1336_v16 = vadd.f32 %v1304_v46, %v1268_v41  ;;  %v1507_v45 = vadd.f32 %v1475_v13, %v1403_v39  ;;  %v1612_v14 = vmul.f32 %v3319_v21, %v3760_v18  ;;  %v1272_v1 = vadd.f32 %v1240_v60, %v1168_v19 }
 0x237   : > { %v1165_v63 = vadd.f32 %v1133_v61, %v1097_v12  ;;  %v1480_v56 = vmul.f32 %v3305_v11, %v3760_v18  ;;  %v1373_v22 = vmul.f32 %v3309_v29, %v3767_v25  ;;  %v1001_v46 = vmul.f32 %v3290_v30, %v3754_v48 }
 0x238   : > { %v1404_v10 = vadd.f32 %v1372_v54, %v1336_v16  ;;  %1674 = vxpose.xlu1.b32.cont [11/16] (narrow) %v1642_v5, 64  ;;  %v1575_v9 = vadd.f32 %v1543_v51, %v1507_v45  ;;  %v1340_v57 = vadd.f32 %v3340_v27, %v1272_v1  ;;  %v1477_v38 = vmul.f32 %v3305_v11, %v3674_v42  ;;  %v3806_v5 = vld [vmem:[#allocation2 + $0xfa] sm:$0xff]  ;;  %v4654_v1 = vld [vmem:[#allocation9_spill] sm:$0xff] }
 0x239   : > { %v1269_v13 = vadd.f32 %v1237_v59, %v1165_v63  ;;  %v1101_v33 = vadd.f32 %v3388_v17, %v1001_v46  ;;  %v998_v36 = vmul.f32 %v3290_v30, %v3684_v20  ;;  %v1066_v53 = vmul.f32 %v3292_v28, %v960_v58  ;;  %v3796_v17 = vld [vmem:[#allocation2 + $0x108] sm:$0xff] }
 0x23a   : > { %v1508_v35 = vadd.f32 %v1476_v15, %v1404_v10  ;;  %v1643_v47 = vadd.f32 %v1611_v0, %v1575_v9  ;;  %v1408_v41 = vadd.f32 %v3439_v2, %v1340_v57  ;;  %v1545_v27 = vmul.f32 %v3317_v52, %v3717_v23  ;;  %v4655_v10 = vld [vmem:[#allocation11_spill] sm:$0xff] }
 0x23b   : > { %v1337_v51 = vadd.f32 %v1305_v7, %v1269_v13  ;;  %v1169_v42 = vadd.f32 %v3500_v26, %v1101_v33  ;;  %v1241_v15 = vmul.f32 %v3298_v6, %v3767_v25  ;;  %v1098_v60 = vadd.f32 %v1066_v53, %v998_v36  ;;  %v3835_v53 = vld [vmem:[#allocation2 + $0x110] sm:$0xff] }
 0x23c   : > { %v1576_v54 = vadd.f32 %v1544_v3, %v1508_v35  ;;  %1675 = vxpose.xlu1.b32.cont [12/16] (narrow) %v1643_v47, 64  ;;  %v1512_v20 = vadd.f32 %v1480_v56, %v1408_v41  ;;  %v1613_v0 = vmul.f32 %v3319_v21, %v3784_v37  ;;  %v1238_v2 = vmul.f32 %v3298_v6, %v3692_v31  ;;  %v4657_v35 = vld [vmem:[#allocation12_spill] sm:$0xff]  ;;  %v4658_v47 = vld [vmem:[#allocation18_spill] sm:$0xff] }
 0x23d   : > { %v1405_v39 = vadd.f32 %v1373_v22, %v1337_v51  ;;  %v1273_v19 = vadd.f32 %v1241_v15, %v1169_v42  ;;  %v1166_v3 = vadd.f32 %v3343_v4, %v1098_v60  ;;  %v1102_v26 = vadd.f32 %v3446_v55, %v3378_v40  ;;  %v3817_v55 = vld [vmem:[#allocation2 + $0x109] sm:$0xff] }
 0x23e   : > { %v1644_v58 = vadd.f32 %v1612_v14, %v1576_v54  ;;  %v1580_v12 = vadd.f32 %v3384_v34, %v1512_v20  ;;  %v1481_v16 = vmul.f32 %v3305_v11, %v3784_v37  ;;  %v1138_v59 = vmul.f32 %v3307_v44, %v3796_v17  ;;  %v4659_v51 = vld [vmem:[#allocation21_spill] sm:$0xff]  ;;  %v4660_v54 = vld [vmem:[#allocation27_spill] sm:$0xff] }
 0x23f   : > { %v1509_v61 = vadd.f32 %v1477_v38, %v1405_v39  ;;  %v1341_v31 = vadd.f32 %v3392_v50, %v1273_v19  ;;  %v1617_v7 = vmul.f32 %v3319_v21, %v3806_v5  ;;  %v1270_v4 = vadd.f32 %v1238_v2, %v1166_v3  ;;  %v3844_v60 = vld [vmem:[#allocation2 + $0x10a] sm:$0xff]  ;;  %v4662_v39 = vld [vmem:[#allocation22_spill] sm:$0xff] }
 0x240   : > { %v1306_v40 = vmul.f32 %v3303_v62, %v3741_v32  ;;  %1676 = vxpose.xlu1.b32.cont [13/16] (narrow) %v1644_v58, 64  ;;  %v1648_v34 = vadd.f32 %v3496_v24, %v1580_v12  ;;  %v1170_v14 = vadd.f32 %v1138_v59, %v1102_v26  ;;  %v1310_v63 = vmul.f32 %v3303_v62, %v4654_v1  ;;  %v4656_v24 = vld [vmem:[#allocation24_spill] sm:$0xff]  ;;  %v4663_v19 = vld [vmem:[#allocation14_spill] sm:$0xff]  ;;  %v3855_v59 = vld [vmem:[#allocation2 + $0x120] sm:$0xff] }
 0x241   : > { %v1577_v45 = vadd.f32 %v1545_v27, %v1509_v61  ;;  %v1409_v56 = vadd.f32 %v4655_v10, %v1341_v31  ;;  %v999_v22 = vmul.f32 %v3290_v30, %v3706_v49  ;;  %v1067_v46 = vmul.f32 %v3292_v28, %v3754_v48  ;;  %v4666_v10 = vld [vmem:[#allocation10_spill] sm:$0xff] }
 0x242   : > { %v1338_v50 = vadd.f32 %v1306_v40, %v1270_v4  ;;  %1696 = vxpose.xlu0.b32.start [1/16] (narrow) %v1648_v34, 64  ;;  %v1478_v9 = vmul.f32 %v3305_v11, %v3713_v8  ;;  %v1274_v57 = vadd.f32 %v4656_v24, %v1170_v14  ;;  %v1378_v13 = vmul.f32 %v3309_v29, %v3817_v55  ;;  %v4664_v4 = vld [vmem:[#allocation16_spill] sm:$0xff] }
 0x243   : > { %v1645_v32 = vadd.f32 %v1613_v0, %v1577_v45  ;;  %v1513_v38 = vadd.f32 %v1481_v16, %v1409_v56  ;;  %v1546_v36 = vmul.f32 %v3317_v52, %v3760_v18  ;;  %v1099_v49 = vadd.f32 %v1067_v46, %v999_v22  ;;  %v4661_v18 = vld [vmem:[#allocation17_spill] sm:$0xff]  ;;  %v4667_v22 = vld [vmem:[#allocation26_spill] sm:$0xff] }
 0x244   : > { %v1406_v33 = vadd.f32 %v4657_v35, %v1338_v50  ;;  %v1342_v48 = vadd.f32 %v1310_v63, %v1274_v57  ;;  %v1550_v41 = vmul.f32 %v3317_v52, %v4658_v47  ;;  %v1239_v8 = vmul.f32 %v3298_v6, %v3715_v43  ;;  %v3866_v45 = vld [vmem:[#allocation2 + $0x111] sm:$0xff]  ;;  %v3882_v35 = vld [vmem:[#allocation2 + $0x128] sm:$0xff] }
 0x245   : > { %1677 = vxpose.xlu1.b32.cont [14/16] (narrow) %v1645_v32, 64  ;;  %v1003_v27 = vmul.f32 %v3290_v30, %v4659_v51  ;;  %v1581_v42 = vadd.f32 %v4660_v54, %v1513_v38  ;;  %v1167_v20 = vadd.f32 %v4661_v18, %v1099_v49  ;;  %v1071_v0 = vmul.f32 %v3292_v28, %v4662_v39  ;;  %v3888_v51 = vld [vmem:[#allocation2 + $0x112] sm:$0xff] }
 0x246   : > { %v1510_v15 = vadd.f32 %v1478_v9, %v1406_v33  ;;  %v1410_v2 = vadd.f32 %v1378_v13, %v1342_v48  ;;  %v1307_v58 = vmul.f32 %v3303_v62, %v3767_v25  ;;  %v1139_v43 = vmul.f32 %v3307_v44, %v3835_v53  ;;  %v4668_v9 = vld [vmem:[#allocation20_spill] sm:$0xff] }
 0x247   : > { %v1243_v3 = vmul.f32 %v3298_v6, %v4663_v19  ;;  %v1649_v26 = vadd.f32 %v1617_v7, %v1581_v42  ;;  %v1271_v61 = vadd.f32 %v1239_v8, %v1167_v20  ;;  %v1103_v16 = vadd.f32 %v1071_v0, %v1003_v27  ;;  %v4665_v7 = vld [vmem:[#allocation25_spill] sm:$0xff]  ;;  %v3890_v27 = vld [vmem:[#allocation2 + $0x121] sm:$0xff] }
 0x248   : > { %v1578_v12 = vadd.f32 %v1546_v36, %v1510_v15  ;;  %v3859_v31 = vmul.f32 %v3305_v11, %v4658_v47  ;;  %v1514_v40 = vadd.f32 %v4664_v4, %v1410_v2  ;;  %v1618_v25 = vmul.f32 %v3319_v21, %v3844_v60  ;;  %v4669_v36 = vld [vmem:[#allocation23_spill] sm:$0xff] }
 0x249   : > { %v1479_v34 = vmul.f32 %v3305_v11, %v3717_v23  ;;  %1697 = vxpose.xlu0.b32.cont [2/16] (narrow) %v1649_v26, 64  ;;  %v1339_v1 = vadd.f32 %v1307_v58, %v1271_v61  ;;  %v1171_v63 = vadd.f32 %v1139_v43, %v1103_v16  ;;  %v1311_v56 = vmul.f32 %v3303_v62, %v4666_v10  ;;  %v3904_v43 = vld [vmem:[#allocation2 + $0x138] sm:$0xff]  ;;  %v3911_v61 = vld [vmem:[#allocation2 + $0x122] sm:$0xff] }
 0x24a   : > { %v1646_v14 = vadd.f32 %v4665_v7, %v1578_v12  ;;  %v1582_v50 = vadd.f32 %v1550_v41, %v1514_v40  ;;  %v1004_v46 = vmul.f32 %v3290_v30, %v4667_v22  ;;  %v1072_v32 = vmul.f32 %v3292_v28, %v3796_v17  ;;  %v3913_v16 = vld [vmem:[#allocation2 + $0x129] sm:$0xff] }
 0x24b   : > { %v1140_v23 = vmul.f32 %v3307_v44, %v3855_v59  ;;  %v1407_v24 = vadd.f32 %v4668_v9, %v1339_v1  ;;  %v1547_v57 = vmul.f32 %v3317_v52, %v3784_v37  ;;  %v1275_v13 = vadd.f32 %v1243_v3, %v1171_v63  ;;  %v4670_v3 = vld [vmem:[#allocation15_spill] sm:$0xff] }
 0x24c   : > { %1678 = vxpose.xlu1.b32.cont [15/16] (narrow) %v1646_v14, 64  ;;  %v1379_v38 = vmul.f32 %v3309_v29, %v3866_v45  ;;  %v1650_v33 = vadd.f32 %v1618_v25, %v1582_v50  ;;  %v1615_v49 = vmul.f32 %v3319_v21, %v4669_v36  ;;  %v1483_v48 = vmul.f32 %v3305_v11, %v4669_v36 }
 0x24d   : > { %v1104_v47 = vadd.f32 %v1072_v32, %v1004_v46  ;;  %v1511_v41 = vadd.f32 %v1479_v34, %v1407_v24  ;;  %v1343_v8 = vadd.f32 %v1311_v56, %v1275_v13  ;;  %v1005_v37 = vmul.f32 %v3290_v30, %v4662_v39 }
 0x24e   : > { %v1073_v54 = vmul.f32 %v3292_v28, %v3835_v53  ;;  %1698 = vxpose.xlu0.b32.cont [3/16] (narrow) %v1650_v33, 64  ;;  %v1551_v42 = vmul.f32 %v3317_v52, %v3806_v5  ;;  %v1312_v18 = vmul.f32 %v3303_v62, %v3817_v55  ;;  %v1141_v20 = vmul.f32 %v3307_v44, %v3882_v35 }
 0x24f   : > { %v1172_v15 = vadd.f32 %v1140_v23, %v1104_v47  ;;  %v1579_v0 = vadd.f32 %v1547_v57, %v1511_v41  ;;  %v1411_v2 = vadd.f32 %v1379_v38, %v1343_v8  ;;  %v1245_v39 = vmul.f32 %v3298_v6, %v4666_v10  ;;  %v3931_v23 = vld [vmem:[#allocation2 + $0x12a] sm:$0xff]  ;;  %v3935_v57 = vld [vmem:[#allocation2 + $0x139] sm:$0xff] }
 0x250   : > { %v1105_v58 = vadd.f32 %v1073_v54, %v1005_v37  ;;  %v1619_v19 = vmul.f32 %v3319_v21, %v3888_v51  ;;  %v1380_v12 = vmul.f32 %v3309_v29, %v3890_v27  ;;  %v1313_v4 = vmul.f32 %v3303_v62, %v3866_v45 }
 0x251   : > { %v1276_v26 = vadd.f32 %v4670_v3, %v1172_v15  ;;  %v1647_v40 = vadd.f32 %v1615_v49, %v1579_v0  ;;  %v1515_v25 = vadd.f32 %v1483_v48, %v1411_v2  ;;  %v1006_v7 = vmul.f32 %v3290_v30, %v3796_v17  ;;  %v3929_v17 = vld [vmem:[#allocation2 + $0x140] sm:$0xff] }
 0x252   : > { %v1173_v34 = vadd.f32 %v1141_v20, %v1105_v58  ;;  %v1552_v1 = vmul.f32 %v3317_v52, %v3844_v60  ;;  %v1074_v63 = vmul.f32 %v3292_v28, %v3855_v59  ;;  %v1142_v10 = vmul.f32 %v3307_v44, %v3904_v43  ;;  %v3954_v15 = vld [vmem:[#allocation2 + $0x141] sm:$0xff]  ;;  %v3958_v20 = vld [vmem:[#allocation2 + $0x150] sm:$0xff] }
 0x253   : > { %v1344_v14 = vadd.f32 %v1312_v18, %v1276_v26  ;;  %1679 = vxpose.xlu1.b32.end [16/16] (narrow) %v1647_v40, 64  ;;  %v1583_v56 = vadd.f32 %v1551_v42, %v1515_v25  ;;  %v1620_v50 = vmul.f32 %v3319_v21, %v3911_v61  ;;  %v1381_v46 = vmul.f32 %v3309_v29, %v3913_v16  ;;  %v3966_v26 = vld [vmem:[#allocation2 + $0x13a] sm:$0xff] }
 0x254   : > { %v1277_v22 = vadd.f32 %v1245_v39, %v1173_v34  ;;  %v1485_v9 = vmul.f32 %v3305_v11, %v3806_v5  ;;  %v1106_v24 = vadd.f32 %v1074_v63, %v1006_v7  ;;  %v1246_v13 = vmul.f32 %v3298_v6, %v3817_v55  ;;  %v3976_v7 = vld [vmem:[#allocation2 + $0x142] sm:$0xff]  ;;  %v3980_v63 = vld [vmem:[#allocation2 + $0x158] sm:$0xff] }
 0x255   : > { %v1412_v32 = vadd.f32 %v1380_v12, %v1344_v14  ;;  %v1651_v38 = vadd.f32 %v1619_v19, %v1583_v56  ;;  %v1314_v36 = vmul.f32 %v3303_v62, %v3890_v27  ;;  %v1007_v49 = vmul.f32 %v3290_v30, %v3835_v53 }
 0x256   : > { %v1345_v33 = vadd.f32 %v1313_v4, %v1277_v22  ;;  %v1174_v47 = vadd.f32 %v1142_v10, %v1106_v24  ;;  %v1075_v5 = vmul.f32 %v3292_v28, %v3882_v35  ;;  %v1143_v41 = vmul.f32 %v3307_v44, %v3929_v17  ;;  %v3986_v22 = vld [vmem:[#allocation2 + $0x151] sm:$0xff] }
 0x257   : > { %v1516_v48 = vadd.f32 %v3859_v31, %v1412_v32  ;;  %1699 = vxpose.xlu0.b32.cont [4/16] (narrow) %v1651_v38, 64  ;;  %v1553_v55 = vmul.f32 %v3317_v52, %v3888_v51  ;;  %v1621_v37 = vmul.f32 %v3319_v21, %v3931_v23  ;;  %v1382_v53 = vmul.f32 %v3309_v29, %v3935_v57 }
 0x258   : > { %v1413_v8 = vadd.f32 %v1381_v46, %v1345_v33  ;;  %v1278_v31 = vadd.f32 %v1246_v13, %v1174_v47  ;;  %v1107_v42 = vadd.f32 %v1075_v5, %v1007_v49  ;;  %v1247_v18 = vmul.f32 %v3298_v6, %v3866_v45  ;;  %v4004_v5 = vld [vmem:[#allocation2 + $0x152] sm:$0xff] }
 0x259   : > { %v1584_v54 = vadd.f32 %v1552_v1, %v1516_v48  ;;  %v1486_v2 = vmul.f32 %v3305_v11, %v3844_v60  ;;  %v1315_v58 = vmul.f32 %v3303_v62, %v3913_v16  ;;  %v1008_v39 = vmul.f32 %v3290_v30, %v3855_v59 }
 0x25a   : > { %v1517_v0 = vadd.f32 %v1485_v9, %v1413_v8  ;;  %v1346_v3 = vadd.f32 %v1314_v36, %v1278_v31  ;;  %v1175_v12 = vadd.f32 %v1143_v41, %v1107_v42  ;;  %v1076_v45 = vmul.f32 %v3292_v28, %v3904_v43 }
 0x25b   : > { %v1652_v19 = vadd.f32 %v1620_v50, %v1584_v54  ;;  %v1554_v40 = vmul.f32 %v3317_v52, %v3911_v61  ;;  %v1383_v60 = vmul.f32 %v3309_v29, %v3954_v15  ;;  %v1144_v25 = vmul.f32 %v3307_v44, %v3958_v20 }
 0x25c   : > { %v1585_v4 = vadd.f32 %v1553_v55, %v1517_v0  ;;  %v1414_v59 = vadd.f32 %v1382_v53, %v1346_v3  ;;  %v1279_v34 = vadd.f32 %v1247_v18, %v1175_v12  ;;  %v1108_v14 = vadd.f32 %v1076_v45, %v1008_v39  ;;  %v4028_v45 = vld [vmem:[#allocation2 + $0x15a] sm:$0xff] }
 0x25d   : > { %1700 = vxpose.xlu0.b32.cont [5/16] (narrow) %v1652_v19, 64  ;;  %v1248_v1 = vmul.f32 %v3298_v6, %v3890_v27  ;;  %v1622_v56 = vmul.f32 %v3319_v21, %v3966_v26  ;;  %v1487_v50 = vmul.f32 %v3305_v11, %v3888_v51  ;;  %v1316_v46 = vmul.f32 %v3303_v62, %v3935_v57 }
 0x25e   : > { %v1653_v10 = vadd.f32 %v1621_v37, %v1585_v4  ;;  %v1518_v32 = vadd.f32 %v1486_v2, %v1414_v59  ;;  %v1347_v9 = vadd.f32 %v1315_v58, %v1279_v34  ;;  %v1176_v24 = vadd.f32 %v1144_v25, %v1108_v14  ;;  %v4010_v37 = vld [vmem:[#allocation2 + $0x159] sm:$0xff] }
 0x25f   : > { %v1009_v27 = vmul.f32 %v3290_v30, %v3882_v35  ;;  %v1555_v13 = vmul.f32 %v3317_v52, %v3931_v23  ;;  %v1623_v38 = vmul.f32 %v3319_v21, %v3976_v7  ;;  %v1077_v51 = vmul.f32 %v3292_v28, %v3929_v17  ;;  %v4002_v35 = vld [vmem:[#allocation2 + $0x168] sm:$0xff] }
 0x260   : > { %v1145_v33 = vmul.f32 %v3307_v44, %v3980_v63  ;;  %v1586_v36 = vadd.f32 %v1554_v40, %v1518_v32  ;;  %v1415_v49 = vadd.f32 %v1383_v60, %v1347_v9  ;;  %v1280_v48 = vadd.f32 %v1248_v1, %v1176_v24  ;;  %v4032_v60 = vld [vmem:[#allocation2 + $0x169] sm:$0xff] }
 0x261   : > { %1701 = vxpose.xlu0.b32.cont [6/16] (narrow) %v1653_v10, 64  ;;  %v1384_v47 = vmul.f32 %v3309_v29, %v3986_v22  ;;  %v1488_v41 = vmul.f32 %v3305_v11, %v3911_v61  ;;  %v1556_v8 = vmul.f32 %v3317_v52, %v3966_v26  ;;  %v1109_v55 = vadd.f32 %v1077_v51, %v1009_v27  ;;  %v976_v51 = vld [vmem:[#allocation2 + $0x180] sm:$0xff] }
 0x262   : > { %v1249_v53 = vmul.f32 %v3298_v6, %v3913_v16  ;;  %v1654_v54 = vadd.f32 %v1622_v56, %v1586_v36  ;;  %v1519_v31 = vadd.f32 %v1487_v50, %v1415_v49  ;;  %v1348_v42 = vadd.f32 %v1316_v46, %v1280_v48 }
 0x263   : > { %v1010_v18 = vmul.f32 %v3290_v30, %v3904_v43  ;;  %v1177_v0 = vadd.f32 %v1145_v33, %v1109_v55  ;;  %v1317_v2 = vmul.f32 %v3303_v62, %v3954_v15  ;;  %v1078_v61 = vmul.f32 %v3292_v28, %v3958_v20  ;;  %v4026_v43 = vld [vmem:[#allocation2 + $0x170] sm:$0xff] }
 0x264   : > { %v1146_v58 = vmul.f32 %v3307_v44, %v4002_v35  ;;  %v1587_v39 = vadd.f32 %v1555_v13, %v1519_v31  ;;  %v1416_v19 = vadd.f32 %v1384_v47, %v1348_v42  ;;  %v1624_v16 = vmul.f32 %v3319_v21, %v4004_v5  ;;  %v4050_v13 = vld [vmem:[#allocation2 + $0x171] sm:$0xff] }
 0x265   : > { %1702 = vxpose.xlu0.b32.cont [7/16] (narrow) %v1654_v54, 64  ;;  %v1385_v3 = vmul.f32 %v3309_v29, %v4010_v37  ;;  %v1281_v12 = vadd.f32 %v1249_v53, %v1177_v0  ;;  %v1489_v4 = vmul.f32 %v3305_v11, %v3931_v23  ;;  %v1110_v40 = vadd.f32 %v1078_v61, %v1010_v18  ;;  %v978_v61 = vld [vmem:[#allocation2 + $0x198] sm:$0xff] }
 0x266   : > { %v1250_v25 = vmul.f32 %v3298_v6, %v3935_v57  ;;  %v1655_v59 = vadd.f32 %v1623_v38, %v1587_v39  ;;  %v1520_v34 = vadd.f32 %v1488_v41, %v1416_v19  ;;  %v1318_v14 = vmul.f32 %v3303_v62, %v3986_v22  ;;  %v1216_v19 = vld [vmem:[#allocation2 + $0x181] sm:$0xff] }
 0x267   : > { %v1011_v1 = vmul.f32 %v3290_v30, %v3929_v17  ;;  %v1349_v10 = vadd.f32 %v1317_v2, %v1281_v12  ;;  %v1178_v56 = vadd.f32 %v1146_v58, %v1110_v40  ;;  %v1079_v50 = vmul.f32 %v3292_v28, %v3980_v63  ;;  %v977_v2 = vld [vmem:[#allocation2 + $0x188] sm:$0xff]  ;;  %v4079_v40 = vld [vmem:[#allocation2 + $0x172] sm:$0xff] }
 0x268   : > { %v1147_v23 = vmul.f32 %v3307_v44, %v4026_v43  ;;  %v1588_v46 = vadd.f32 %v1556_v8, %v1520_v34  ;;  %v1557_v57 = vmul.f32 %v3317_v52, %v3976_v7  ;;  %v1625_v32 = vmul.f32 %v3319_v21, %v4028_v45  ;;  %v4060_v8 = vld [vmem:[#allocation2 + $0x16a] sm:$0xff] }
 0x269   : > { %1703 = vxpose.xlu0.b32.cont [8/16] (narrow) %v1655_v59, 64  ;;  %v1386_v9 = vmul.f32 %v3309_v29, %v4032_v60  ;;  %v1417_v17 = vadd.f32 %v1385_v3, %v1349_v10  ;;  %v1282_v24 = vadd.f32 %v1250_v25, %v1178_v56  ;;  %v1111_v27 = vadd.f32 %v1079_v50, %v1011_v1 }
 0x26a   : > { %v1251_v38 = vmul.f32 %v3298_v6, %v3954_v15  ;;  %v1656_v33 = vadd.f32 %v1624_v16, %v1588_v46  ;;  %v1490_v36 = vmul.f32 %v3305_v11, %v3966_v26  ;;  %v1319_v49 = vmul.f32 %v3303_v62, %v4010_v37 }
 0x26b   : > { %v1012_v48 = vmul.f32 %v3290_v30, %v3958_v20  ;;  %v1521_v47 = vadd.f32 %v1489_v4, %v1417_v17  ;;  %v1350_v41 = vadd.f32 %v1318_v14, %v1282_v24  ;;  %v1179_v55 = vadd.f32 %v1147_v23, %v1111_v27  ;;  %v1456_v23 = vld [vmem:[#allocation2 + $0x182] sm:$0xff] }
 0x26c   : > { %v1080_v53 = vmul.f32 %v3292_v28, %v4002_v35  ;;  %v1558_v15 = vmul.f32 %v3317_v52, %v4004_v5  ;;  %v1387_v26 = vmul.f32 %v3309_v29, %v4050_v13  ;;  %v1148_v54 = vmul.f32 %v3307_v44, %v976_v51 }
 0x26d   : > { %1704 = vxpose.xlu0.b32.cont [9/16] (narrow) %v1656_v33, 64  ;;  %v1252_v20 = vmul.f32 %v3298_v6, %v3986_v22  ;;  %v1589_v31 = vadd.f32 %v1557_v57, %v1521_v47  ;;  %v1418_v42 = vadd.f32 %v1386_v9, %v1350_v41  ;;  %v1283_v18 = vadd.f32 %v1251_v38, %v1179_v55 }
 0x26e   : > { %v1112_v0 = vadd.f32 %v1080_v53, %v1012_v48  ;;  %v1626_v58 = vmul.f32 %v3319_v21, %v4060_v8  ;;  %v1491_v39 = vmul.f32 %v3305_v11, %v3976_v7  ;;  %v1320_v16 = vmul.f32 %v3303_v62, %v4032_v60  ;;  %v979_v48 = vld [vmem:[#allocation2 + $0x1a0] sm:$0xff] }
 0x26f   : > { %v1013_v3 = vmul.f32 %v3290_v30, %v3980_v63  ;;  %v1657_v22 = vadd.f32 %v1625_v32, %v1589_v31  ;;  %v1522_v12 = vadd.f32 %v1490_v36, %v1418_v42  ;;  %v1351_v4 = vadd.f32 %v1319_v49, %v1283_v18  ;;  %v1217_v32 = vld [vmem:[#allocation2 + $0x189] sm:$0xff]  ;;  %v1218_v31 = vld [vmem:[#allocation2 + $0x199] sm:$0xff] }
 0x270   : > { %v1180_v25 = vadd.f32 %v1148_v54, %v1112_v0  ;;  %v1559_v59 = vmul.f32 %v3317_v52, %v4028_v45  ;;  %v1081_v34 = vmul.f32 %v3292_v28, %v4026_v43  ;;  %v1149_v7 = vmul.f32 %v3307_v44, %v977_v2 }
 0x271   : > { %v1150_v14 = vmul.f32 %v3307_v44, %v978_v61  ;;  %1705 = vxpose.xlu0.b32.cont [10/16] (narrow) %v1657_v22, 64  ;;  %v1590_v1 = vadd.f32 %v1558_v15, %v1522_v12  ;;  %v1419_v10 = vadd.f32 %v1387_v26, %v1351_v4  ;;  %v1388_v56 = vmul.f32 %v3309_v29, %v1216_v19 }
 0x272   : > { %v1284_v63 = vadd.f32 %v1252_v20, %v1180_v25  ;;  %v1627_v50 = vmul.f32 %v3319_v21, %v4079_v40  ;;  %v1492_v46 = vmul.f32 %v3305_v11, %v4004_v5  ;;  %v1113_v57 = vadd.f32 %v1081_v34, %v1013_v3  ;;  %v1219_v3 = vld [vmem:[#allocation2 + $0x1a1] sm:$0xff] }
 0x273   : > { %v1253_v9 = vmul.f32 %v3298_v6, %v4010_v37  ;;  %v1658_v17 = vadd.f32 %v1626_v58, %v1590_v1  ;;  %v1523_v24 = vadd.f32 %v1491_v39, %v1419_v10  ;;  %v1014_v38 = vmul.f32 %v3290_v30, %v4002_v35 }
 0x274   : > { %v1352_v27 = vadd.f32 %v1320_v16, %v1284_v63  ;;  %v1560_v33 = vmul.f32 %v3317_v52, %v4060_v8  ;;  %v1181_v36 = vadd.f32 %v1149_v7, %v1113_v57  ;;  %v1321_v49 = vmul.f32 %v3303_v62, %v4050_v13  ;;  %v1459_v57 = vld [vmem:[#allocation2 + $0x1a2] sm:$0xff] }
 0x275   : > { %v1082_v5 = vmul.f32 %v3292_v28, %v976_v51  ;;  %1706 = vxpose.xlu0.b32.cont [11/16] (narrow) %v1658_v17, 64  ;;  %v1591_v47 = vadd.f32 %v1559_v59, %v1523_v24  ;;  %v1628_v37 = vmul.f32 %v3319_v21, %v1456_v23  ;;  %v1389_v55 = vmul.f32 %v3309_v29, %v1217_v32 }
 0x276   : > { %v1420_v41 = vadd.f32 %v1388_v56, %v1352_v27  ;;  %v1285_v53 = vadd.f32 %v1253_v9, %v1181_v36  ;;  %v1254_v35 = vmul.f32 %v3298_v6, %v4032_v60  ;;  %v1015_v26 = vmul.f32 %v3290_v30, %v4026_v43  ;;  %v1457_v60 = vld [vmem:[#allocation2 + $0x18a] sm:$0xff] }
 0x277   : > { %v1114_v15 = vadd.f32 %v1082_v5, %v1014_v38  ;;  %v1659_v54 = vadd.f32 %v1627_v50, %v1591_v47  ;;  %v1083_v51 = vmul.f32 %v3292_v28, %v977_v2  ;;  %v1151_v42 = vmul.f32 %v3307_v44, %v979_v48 }
 0x278   : > { %v1524_v20 = vadd.f32 %v1492_v46, %v1420_v41  ;;  %v1353_v18 = vadd.f32 %v1321_v49, %v1285_v53  ;;  %v1493_v0 = vmul.f32 %v3305_v11, %v4028_v45  ;;  %v1322_v58 = vmul.f32 %v3303_v62, %v1216_v19 }
 0x279   : > { %v1182_v61 = vadd.f32 %v1150_v14, %v1114_v15  ;;  %1707 = vxpose.xlu0.b32.cont [12/16] (narrow) %v1659_v54, 64  ;;  %v1115_v16 = vadd.f32 %v1083_v51, %v1015_v26  ;;  %v1255_v30 = vmul.f32 %v3298_v6, %v4050_v13  ;;  %v1561_v28 = vmul.f32 %v3317_v52, %v4079_v40  ;;  %v1458_v6 = vld [vmem:[#allocation2 + $0x19a] sm:$0xff] }
 0x27a   : > { %v1592_v39 = vadd.f32 %v1560_v33, %v1524_v20  ;;  %v1421_v43 = vadd.f32 %v1389_v55, %v1353_v18  ;;  %v1390_v44 = vmul.f32 %v3309_v29, %v1218_v31  ;;  %v1323_v12 = vmul.f32 %v3303_v62, %v1217_v32 }
 0x27b   : > { %v1286_v2 = vadd.f32 %v1254_v35, %v1182_v61  ;;  %v1183_v45 = vadd.f32 %v1151_v42, %v1115_v16  ;;  %v1629_v4 = vmul.f32 %v3319_v21, %v1457_v60  ;;  %v1494_v59 = vmul.f32 %v3305_v11, %v4060_v8 }
 0x27c   : > { %v1660_v22 = vadd.f32 %v1628_v37, %v1592_v39  ;;  %v1525_v19 = vadd.f32 %v1493_v0, %v1421_v43  ;;  %v1391_v34 = vmul.f32 %v3309_v29, %v1219_v3  ;;  %v1562_v1 = vmul.f32 %v3317_v52, %v1456_v23 }
 0x27d   : > { %v1354_v25 = vadd.f32 %v1322_v58, %v1286_v2  ;;  %v1287_v13 = vadd.f32 %v1255_v30, %v1183_v45  ;;  %v1495_v62 = vmul.f32 %v3305_v11, %v4079_v40  ;;  %v1630_v50 = vmul.f32 %v3319_v21, %v1458_v6 }
 0x27e   : > { %1708 = vxpose.xlu0.b32.cont [13/16] (narrow) %v1660_v22, 64  ;;  %v1593_v7 = vadd.f32 %v1561_v28, %v1525_v19  ;;  %v1563_v8 = vmul.f32 %v3317_v52, %v1457_v60  ;;  %v1631_v17 = vmul.f32 %v3319_v21, %v1459_v57 }
 0x27f   : > { %v1422_v14 = vadd.f32 %v1390_v44, %v1354_v25  ;;  %v1355_v10 = vadd.f32 %v1323_v12, %v1287_v13 }
 0x280   : > { %v1661_v63 = vadd.f32 %v1629_v4, %v1593_v7 }
 0x281   : > { %v1526_v56 = vadd.f32 %v1494_v59, %v1422_v14  ;;  %v1423_v46 = vadd.f32 %v1391_v34, %v1355_v10 }
 0x282   : > { %1709 = vxpose.xlu0.b32.cont [14/16] (narrow) %v1661_v63, 64 }
 0x283   : > { %v1594_v32 = vadd.f32 %v1562_v1, %v1526_v56  ;;  %v1527_v9 = vadd.f32 %v1495_v62, %v1423_v46 }
 0x285   : > { %v1662_v29 = vadd.f32 %v1630_v50, %v1594_v32  ;;  %v1595_v24 = vadd.f32 %v1563_v8, %v1527_v9 }
 0x287   : > { %1710 = vxpose.xlu0.b32.cont [15/16] (narrow) %v1662_v29, 64  ;;  %v1663_v23 = vadd.f32 %v1631_v17, %v1595_v24 }
 0x28b   : > { %1711 = vxpose.xlu0.b32.end [16/16] (narrow) %v1663_v23, 64 }
 0x297   : > { %v4128_v27 = vpop.trf.xlu1 }
 0x298   : > { %v4131_v11 = vmul.f32 0.70710677, %v4128_v27 }
 0x29a   : > { %v1760_v40 = vand.u32 2147483647, %v4131_v11  ;;  %vm2080_vm5 = vcmp.ge.f32.partialorder %v4131_v11, 0.0 }
 0x29b   : > { %v4134_v38 = vpop.trf.xlu1 }
 0x29c   : > { %v1776_v52 = vmul.f32 0.3275911, %v1760_v40  ;;  %v4137_v33 = vmul.f32 0.70710677, %v4134_v38  ;;  %v1984_v16 = vsub.f32 0.0, %v1760_v40 }
 0x29e   : > { %v1792_v36 = vadd.f32 1.0, %v1776_v52  ;;  %v1762_v21 = vand.u32 2147483647, %v4137_v33  ;;  %v2000_v12 = vmul.f32 %v1984_v16, %v1760_v40  ;;  %vm2082_vm6 = vcmp.ge.f32.partialorder %v4137_v33, 0.0 }
 0x29f   : > { %v4140_v49 = vpop.trf.xlu1 }
 0x2a0   : > { %2527 = vrcp.f32 %v1792_v36  ;;  %v1778_v5 = vmul.f32 0.3275911, %v1762_v21  ;;  %v4143_v48 = vmul.f32 0.70710677, %v4140_v49  ;;  %v1986_v59 = vsub.f32 0.0, %v1762_v21 }
 0x2a1   : > { %v2016_v56 = vmul.f32 1.442695, %v2000_v12 }
 0x2a2   : > { %v1794_v47 = vadd.f32 1.0, %v1778_v5  ;;  %v1764_v41 = vand.u32 2147483647, %v4143_v48  ;;  %v2002_v8 = vmul.f32 %v1986_v59, %v1762_v21  ;;  %vm2084_vm7 = vcmp.ge.f32.partialorder %v4143_v48, 0.0 }
 0x2a3   : > { %v4146_v37 = vpop.trf.xlu1 }
 0x2a4   : > { %2529 = vrcp.f32 %v1794_v47  ;;  %v4149_v55 = vmul.f32 0.70710677, %v4146_v37  ;;  %v1780_v53 = vmul.f32 0.3275911, %v1764_v41  ;;  %v1988_v6 = vsub.f32 0.0, %v1764_v41 }
 0x2a5   : > { %v2020_v47 = vmul.f32 1.442695, %v2002_v8 }
 0x2a6   : > { %v4152_v15 = vand.u32 2147483647, %v4149_v55  ;;  %v1796_v35 = vadd.f32 1.0, %v1780_v53  ;;  %v2004_v32 = vmul.f32 %v1988_v6, %v1764_v41  ;;  %vm2086_vm8 = vcmp.ge.f32.partialorder %v4149_v55, 0.0 }
 0x2a7   : > { %v4154_v26 = vpop.trf.xlu1 }
 0x2a8   : > { %v1782_v54 = vmul.f32 0.3275911, %v4152_v15  ;;  %v4158_v20 = vmul.f32 0.70710677, %v4154_v26  ;;  %2531 = vrcp.f32 %v1796_v35  ;;  %v1990_v24 = vsub.f32 0.0, %v4152_v15 }
 0x2aa   : > { %v4160_v31 = vpop.eup %2527  ;;  %v1798_v51 = vadd.f32 1.0, %v1782_v54  ;;  %v4163_v42 = vand.u32 2147483647, %v4158_v20  ;;  %vm2088_vm9 = vcmp.ge.f32.partialorder %v4158_v20, 0.0 }
 0x2ab   : > { %v4165_v18 = vpop.trf.xlu1  ;;  %v1840_v0 = vmul.f32 1.0614054, %v4160_v31 }
 0x2ac   : > { %2533 = vrcp.f32 %v1798_v51  ;;  %v1784_v61 = vmul.f32 0.3275911, %v4163_v42  ;;  %v4170_v58 = vmul.f32 0.70710677, %v4165_v18  ;;  %v2024_v51 = vmul.f32 1.442695, %v2004_v32 }
 0x2ad   : > { %v1856_v39 = vadd.f32 -1.4531521, %v1840_v0  ;;  %v2006_v0 = vmul.f32 %v1990_v24, %v4152_v15  ;;  %v1992_v6 = vsub.f32 0.0, %v4163_v42 }
 0x2ae   : > { %v4172_v60 = vpop.eup %2529  ;;  %v1800_v30 = vadd.f32 1.0, %v1784_v61  ;;  %v4175_v43 = vand.u32 2147483647, %v4170_v58  ;;  %vm2090_vm10 = vcmp.ge.f32.partialorder %v4170_v58, 0.0 }
 0x2af   : > { %v4177_v28 = vpop.trf.xlu1  ;;  %v1842_v2 = vmul.f32 1.0614054, %v4172_v60  ;;  %v1872_v44 = vmul.f32 %v4160_v31, %v1856_v39  ;;  %v2028_v59 = vmul.f32 1.442695, %v2006_v0 }
 0x2b0   : > { %2535 = vrcp.f32 %v1800_v30  ;;  %v4182_v3 = vmul.f32 0.70710677, %v4177_v28  ;;  %v1786_v22 = vmul.f32 0.3275911, %v4175_v43 }
 0x2b1   : > { %v1858_v45 = vadd.f32 -1.4531521, %v1842_v2  ;;  %v1888_v4 = vadd.f32 1.4214138, %v1872_v44 }
 0x2b2   : > { %v4186_v19 = vand.u32 2147483647, %v4182_v3  ;;  %v4188_v25 = vpop.eup %2531  ;;  %v1802_v13 = vadd.f32 1.0, %v1786_v22  ;;  %vm2092_vm15 = vcmp.ge.f32.partialorder %v4182_v3, 0.0 }
 0x2b3   : > { %v4190_v34 = vpop.trf.xlu1  ;;  %v1874_v7 = vmul.f32 %v4172_v60, %v1858_v45  ;;  %v1844_v14 = vmul.f32 1.0614054, %v4188_v25  ;;  %v1904_v57 = vmul.f32 %v4160_v31, %v1888_v4 }
 0x2b4   : > { %v1788_v1 = vmul.f32 0.3275911, %v4186_v19  ;;  %2537 = vrcp.f32 %v1802_v13  ;;  %v4196_v10 = vmul.f32 0.70710677, %v4190_v34 }
 0x2b5   : > { %v1890_v62 = vadd.f32 1.4214138, %v1874_v7  ;;  %v1860_v50 = vadd.f32 -1.4531521, %v1844_v14  ;;  %v1920_v5 = vadd.f32 -0.28449672, %v1904_v57 }
 0x2b6   : > { %v4198_v63 = vpop.eup %2533  ;;  %v1804_v46 = vadd.f32 1.0, %v1788_v1  ;;  %v4203_v29 = vand.u32 2147483647, %v4196_v10  ;;  %vm2094_vm0 = vcmp.ge.f32.partialorder %v4196_v10, 0.0 }
 0x2b7   : > { %v1846_v9 = vmul.f32 1.0614054, %v4198_v63  ;;  %v1876_v17 = vmul.f32 %v4188_v25, %v1860_v50  ;;  %v1906_v23 = vmul.f32 %v4172_v60, %v1890_v62  ;;  %v1936_v30 = vmul.f32 %v4160_v31, %v1920_v5 }
 0x2b8   : > { %2539 = vrcp.f32 %v1804_v46  ;;  %v1790_v52 = vmul.f32 0.3275911, %v4203_v29 }
 0x2b9   : > { %v1862_v40 = vadd.f32 -1.4531521, %v1846_v9  ;;  %2541 = vpow2.f32 %v2016_v56  ;;  %v1892_v21 = vadd.f32 1.4214138, %v1876_v17  ;;  %v1922_v61 = vadd.f32 -0.28449672, %v1906_v23 }
 0x2ba   : > { %v4209_v36 = vpop.eup %2535  ;;  %v1806_v35 = vadd.f32 1.0, %v1790_v52  ;;  %v1952_v13 = vadd.f32 0.2548296, %v1936_v30  ;;  %v1994_v56 = vsub.f32 0.0, %v4175_v43  ;;  %v2008_v9 = vmul.f32 %v1992_v6, %v4163_v42 }
 0x2bb   : > { %v1878_v41 = vmul.f32 %v4198_v63, %v1862_v40  ;;  %v1848_v53 = vmul.f32 1.0614054, %v4209_v36  ;;  %v1908_v54 = vmul.f32 %v4188_v25, %v1892_v21  ;;  %v1938_v4 = vmul.f32 %v4172_v60, %v1922_v61 }
 0x2bc   : > { %2543 = vrcp.f32 %v1806_v35  ;;  %v1968_v52 = vmul.f32 %v4160_v31, %v1952_v13  ;;  %v2010_v5 = vmul.f32 %v1994_v56, %v4175_v43  ;;  %v1996_v31 = vsub.f32 0.0, %v4186_v19 }
 0x2bd   : > { %v1894_v39 = vadd.f32 1.4214138, %v1878_v41  ;;  %v1864_v16 = vadd.f32 -1.4531521, %v1848_v53  ;;  %v1924_v2 = vadd.f32 -0.28449672, %v1908_v54  ;;  %2545 = vpow2.f32 %v2020_v47 }
 0x2be   : > { %v4216_v44 = vpop.eup %2537  ;;  %2547 = vpow2.f32 %v2024_v51  ;;  %v1954_v8 = vadd.f32 0.2548296, %v1938_v4  ;;  %v2032_v51 = vmul.f32 1.442695, %v2008_v9  ;;  %v2036_v30 = vmul.f32 1.442695, %v2010_v5 }
 0x2bf   : > { %v1910_v22 = vmul.f32 %v4198_v63, %v1894_v39  ;;  %v1880_v45 = vmul.f32 %v4209_v36, %v1864_v16  ;;  %v1850_v12 = vmul.f32 1.0614054, %v4216_v44  ;;  %v1940_v15 = vmul.f32 %v4188_v25, %v1924_v2 }
 0x2c0   : > { %2549 = vpow2.f32 %v2028_v59  ;;  %v1970_v42 = vmul.f32 %v4172_v60, %v1954_v8  ;;  %v4248_v13 = vmul.f32 0.5, %v4128_v27  ;;  %v4255_v56 = vmul.f32 0.5, %v4134_v38 }
 0x2c1   : > { %v1926_v14 = vadd.f32 -0.28449672, %v1910_v22  ;;  %v1896_v1 = vadd.f32 1.4214138, %v1880_v45  ;;  %v1866_v62 = vadd.f32 -1.4531521, %v1850_v12  ;;  %2551 = vpow2.f32 %v2032_v51 }
 0x2c2   : > { %v4224_v7 = vpop.eup %2539  ;;  %v1956_v32 = vadd.f32 0.2548296, %v1940_v15  ;;  %2553 = vpow2.f32 %v2036_v30 }
 0x2c3   : > { %v1852_v50 = vmul.f32 1.0614054, %v4224_v7  ;;  %v2542_v46 = vpop.eup %2541  ;;  %v1882_v57 = vmul.f32 %v4216_v44, %v1866_v62  ;;  %v1942_v24 = vmul.f32 %v4198_v63, %v1926_v14  ;;  %v1912_v23 = vmul.f32 %v4209_v36, %v1896_v1 }
 0x2c4   : > { %v1972_v54 = vmul.f32 %v4188_v25, %v1956_v32  ;;  %v2048_v16 = vmul.f32 %v2542_v46, %v1968_v52  ;;  %v2012_v25 = vmul.f32 %v1996_v31, %v4186_v19 }
 0x2c5   : > { %v1868_v17 = vadd.f32 -1.4531521, %v1852_v50  ;;  %v1898_v40 = vadd.f32 1.4214138, %v1882_v57  ;;  %v1958_v61 = vadd.f32 0.2548296, %v1942_v24 }
 0x2c6   : > { %v4233_v21 = vpop.eup %2543  ;;  %v1928_v39 = vadd.f32 -0.28449672, %v1912_v23  ;;  %v2064_v59 = vsub.f32 1.0, %v2048_v16  ;;  %v1998_v50 = vsub.f32 0.0, %v4203_v29  ;;  %v2040_v8 = vmul.f32 1.442695, %v2012_v25 }
 0x2c7   : > { %v1884_v47 = vmul.f32 %v4224_v7, %v1868_v17  ;;  %v1914_v41 = vmul.f32 %v4216_v44, %v1898_v40  ;;  %v1854_v53 = vmul.f32 1.0614054, %v4233_v21  ;;  %v2546_v35 = vpop.eup %2545  ;;  %v1974_v4 = vmul.f32 %v4198_v63, %v1958_v61 }
 0x2c8   : > { %v2548_v0 = vpop.eup %2547  ;;  %v2050_v45 = vmul.f32 %v2546_v35, %v1970_v42  ;;  %v1944_v60 = vmul.f32 %v4209_v36, %v1928_v39  ;;  %v2096_v9 = vsub.f32 0.0, %v2064_v59  ;;  %v1732_v17 = vmul.f32 0.5, %v4140_v49 }
 0x2c9   : > { %v1900_v43 = vadd.f32 1.4214138, %v1884_v47  ;;  %v1930_v2 = vadd.f32 -0.28449672, %v1914_v41  ;;  %v1870_v22 = vadd.f32 -1.4531521, %v1854_v53  ;;  %v2052_v12 = vmul.f32 %v2548_v0, %v1972_v54 }
 0x2ca   : > { %v2550_v6 = vpop.eup %2549  ;;  %v2066_v62 = vsub.f32 1.0, %v2050_v45  ;;  %v1960_v57 = vadd.f32 0.2548296, %v1944_v60  ;;  %v2014_v47 = vmul.f32 %v1998_v50, %v4203_v29  ;;  %2555 = vpow2.f32 %v2040_v8 }
 0x2cb   : > { %v1916_v14 = vmul.f32 %v4224_v7, %v1900_v43  ;;  %v1946_v1 = vmul.f32 %v4216_v44, %v1930_v2  ;;  %v1886_v63 = vmul.f32 %v4233_v21, %v1870_v22  ;;  %v2068_v19 = vsub.f32 1.0, %v2052_v12  ;;  %v2552_v51 = vpop.eup %2551 }
 0x2cc   : > { %v2054_v27 = vmul.f32 %v2550_v6, %v1974_v4  ;;  %v2098_v52 = vsub.f32 0.0, %v2066_v62  ;;  %v1976_v49 = vmul.f32 %v4209_v36, %v1960_v57  ;;  %v2112_v54 = vsel %vm2080_vm5, %v2064_v59, %v2096_v9  ;;  %v2554_v16 = vpop.eup %2553 }
 0x2cd   : > { %v1932_v24 = vadd.f32 -0.28449672, %v1916_v14  ;;  %v1962_v23 = vadd.f32 0.2548296, %v1946_v1  ;;  %v1902_v40 = vadd.f32 1.4214138, %v1886_v63 }
 0x2ce   : > { %v2100_v5 = vsub.f32 0.0, %v2068_v19  ;;  %v2070_v42 = vsub.f32 1.0, %v2054_v27  ;;  %v4280_v0 = vmul.f32 0.5, %v4146_v37  ;;  %v2114_v11 = vsel %vm2082_vm6, %v2066_v62, %v2098_v52 }
 0x2cf   : > { %v4245_v15 = vpop.trf.xlu0  ;;  %v1948_v29 = vmul.f32 %v4224_v7, %v1932_v24  ;;  %v1978_v36 = vmul.f32 %v4216_v44, %v1962_v23  ;;  %v1918_v31 = vmul.f32 %v4233_v21, %v1902_v40  ;;  %v2044_v30 = vmul.f32 1.442695, %v2014_v47 }
 0x2d0   : > { %v4259_v46 = vmul.f32 0.70710677, %v4245_v15  ;;  %v2116_v37 = vsel %vm2084_vm7, %v2068_v19, %v2100_v5  ;;  %v2128_v43 = vadd.f32 1.0, %v2112_v54  ;;  %v2102_v2 = vsub.f32 0.0, %v2070_v42 }
 0x2d1   : > { %v2056_v22 = vmul.f32 %v2552_v51, %v1976_v49  ;;  %v4300_v4 = vmul.f32 0.5, %v4154_v26  ;;  %v1964_v33 = vadd.f32 0.2548296, %v1948_v29  ;;  %v2130_v48 = vadd.f32 1.0, %v2114_v11 }
 0x2d2   : > { %v4266_v38 = vand.u32 2147483647, %v4259_v46  ;;  %v4304_v60 = vmul.f32 0.5, %v4165_v18  ;;  %v2058_v25 = vmul.f32 %v2554_v16, %v1978_v36  ;;  %v1934_v59 = vadd.f32 -0.28449672, %v1918_v31 }
 0x2d3   : > { %v4261_v32 = vpop.trf.xlu0  ;;  %v2132_v14 = vadd.f32 1.0, %v2116_v37  ;;  %v2118_v26 = vsel %vm2086_vm8, %v2070_v42, %v2102_v2  ;;  %v2072_v62 = vsub.f32 1.0, %v2056_v22  ;;  %v4316_v18 = vmul.f32 %v2128_v43, %v4248_v13 }
 0x2d4   : > { %v1777_v41 = vmul.f32 0.3275911, %v4266_v38  ;;  %v4272_v53 = vmul.f32 0.70710677, %v4261_v32  ;;  %v1980_v50 = vmul.f32 %v4224_v7, %v1964_v33  ;;  %v4323_v8 = vmul.f32 %v2130_v48, %v4255_v56  ;;  %v2556_v9 = vpop.eup %2555 }
 0x2d5   : > { %v2074_v24 = vsub.f32 1.0, %v2058_v25  ;;  %v1950_v55 = vmul.f32 %v4233_v21, %v1934_v59  ;;  %v1985_v23 = vsub.f32 0.0, %v4266_v38  ;;  %v4330_v13 = vmul.f32 %v2132_v14, %v1732_v17 }
 0x2d6   : > { %v1793_v61 = vadd.f32 1.0, %v1777_v41  ;;  %v4284_v39 = vand.u32 2147483647, %v4272_v53  ;;  %v2134_v52 = vadd.f32 1.0, %v2118_v26  ;;  %v2104_v47 = vsub.f32 0.0, %v2072_v62 }
 0x2d7   : > { %v4275_v35 = vpop.trf.xlu0  ;;  %v4334_v41 = vmul.f32 0.5, %v4245_v15  ;;  %v4342_v51 = vmul.f32 %v2556_v9, %v1980_v50  ;;  %v2398_v29 = vpack.c.bf16 %v4323_v8, %v4316_v18  ;;  %v1966_v36 = vadd.f32 0.2548296, %v1950_v55 }
 0x2d8   : > { %2557 = vrcp.f32 %v1793_v61  ;;  %v1779_v45 = vmul.f32 0.3275911, %v4284_v39  ;;  %v4295_v12 = vmul.f32 0.70710677, %v4275_v35  ;;  %v1987_v56 = vsub.f32 0.0, %v4284_v39 }
 0x2d9   : > { %2559 = vpow2.f32 %v2044_v30  ;;  %v2106_v61 = vsub.f32 0.0, %v2074_v24  ;;  %v2001_v15 = vmul.f32 %v1985_v23, %v4266_v38  ;;  %v4348_v11 = vmul.f32 %v2134_v52, %v4280_v0 }
 0x2da   : > { %v1795_v6 = vadd.f32 1.0, %v1779_v45  ;;  %v1765_v1 = vand.u32 2147483647, %v4295_v12  ;;  %v4356_v43 = vsel %vm2088_vm9, %v2072_v62, %v2104_v47  ;;  %v2003_v2 = vmul.f32 %v1987_v56, %v4284_v39 }
 0x2db   : > { %v4297_v44 = vpop.trf.xlu0  ;;  %v2076_v0 = vsub.f32 1.0, %v4342_v51  ;;  %v4363_v33 = vmul.f32 0.5, %v4261_v32  ;;  %v4373_v39 = vsel %vm2090_vm10, %v2074_v24, %v2106_v61  ;;  %v1982_v59 = vmul.f32 %v4233_v21, %v1966_v36 }
 0x2dc   : > { %v4309_v63 = vmul.f32 0.70710677, %v4297_v44  ;;  %2561 = vrcp.f32 %v1795_v6  ;;  %v1781_v27 = vmul.f32 0.3275911, %v1765_v1  ;;  %v1989_v16 = vsub.f32 0.0, %v1765_v1 }
 0x2dd   : > { %v2018_v6 = vmul.f32 1.442695, %v2001_v15  ;;  %v2022_v50 = vmul.f32 1.442695, %v2003_v2  ;;  %vm2081_vm11 = vcmp.ge.f32.partialorder %v4259_v46, 0.0  ;;  %vm2083_vm12 = vcmp.ge.f32.partialorder %v4272_v53, 0.0 }
 0x2de   : > { %v4320_v57 = vand.u32 2147483647, %v4309_v63  ;;  %v1797_v7 = vadd.f32 1.0, %v1781_v27  ;;  %v2005_v26 = vmul.f32 %v1989_v16, %v1765_v1  ;;  %v4378_v27 = vmul.f32 0.5, %v4275_v35 }
 0x2df   : > { %v4313_v19 = vpop.trf.xlu0  ;;  %v4397_v16 = vmul.f32 0.5, %v4297_v44  ;;  %vm2085_vm13 = vcmp.ge.f32.partialorder %v4295_v12, 0.0  ;;  %vm2087_vm14 = vcmp.ge.f32.partialorder %v4309_v63, 0.0 }
 0x2e0   : > { %v4328_v40 = vmul.f32 0.70710677, %v4313_v19  ;;  %v1783_v5 = vmul.f32 0.3275911, %v4320_v57  ;;  %2563 = vrcp.f32 %v1797_v7  ;;  %v1991_v9 = vsub.f32 0.0, %v4320_v57 }
 0x2e1   : > { %v2026_v47 = vmul.f32 1.442695, %v2005_v26  ;;  %v1737_v18 = vmul.f32 0.5, %v4313_v19 }
 0x2e2   : > { %v1769_v42 = vand.u32 2147483647, %v4328_v40  ;;  %v4340_v54 = vpop.eup %2557  ;;  %v1799_v17 = vadd.f32 1.0, %v1783_v5  ;;  %v2007_v36 = vmul.f32 %v1991_v9, %v4320_v57  ;;  %vm2089_vm2 = vcmp.ge.f32.partialorder %v4328_v40, 0.0 }
 0x2e3   : > { %v4338_v49 = vpop.trf.xlu0  ;;  %v1841_v30 = vmul.f32 1.0614054, %v4340_v54  ;;  %v2560_v38 = vpop.eup %2559  ;;  %v2402_v40 = vpack.c.bf16 %v4348_v11, %v4330_v13 }
 0x2e4   : > { %v1785_v31 = vmul.f32 0.3275911, %v1769_v42  ;;  %v4351_v37 = vmul.f32 0.70710677, %v4338_v49  ;;  %2565 = vrcp.f32 %v1799_v17  ;;  %v1993_v24 = vsub.f32 0.0, %v1769_v42 }
 0x2e5   : > { %v1857_v14 = vadd.f32 -1.4531521, %v1841_v30  ;;  %v4385_v1 = vmul.f32 %v2560_v38, %v1982_v59  ;;  %v1739_v13 = vmul.f32 0.5, %v4338_v49 }
 0x2e6   : > { %v1801_v22 = vadd.f32 1.0, %v1785_v31  ;;  %v1771_v48 = vand.u32 2147483647, %v4351_v37  ;;  %v4369_v20 = vpop.eup %2561  ;;  %v2009_v30 = vmul.f32 %v1993_v24, %v1769_v42  ;;  %vm2091_vm3 = vcmp.ge.f32.partialorder %v4351_v37, 0.0 }
 0x2e7   : > { %v4359_v45 = vpop.trf.xlu0  ;;  %v1843_v58 = vmul.f32 1.0614054, %v4369_v20  ;;  %v1873_v52 = vmul.f32 %v4340_v54, %v1857_v14 }
 0x2e8   : > { %v4367_v25 = vmul.f32 0.70710677, %v4359_v45  ;;  %2567 = vrcp.f32 %v1801_v22  ;;  %v1787_v62 = vmul.f32 0.3275911, %v1771_v48  ;;  %v1995_v56 = vsub.f32 0.0, %v1771_v48 }
 0x2e9   : > { %2569 = vpow2.f32 %v2018_v6  ;;  %v1859_v5 = vadd.f32 -1.4531521, %v1843_v58  ;;  %v1889_v2 = vadd.f32 1.4214138, %v1873_v52  ;;  %v2034_v24 = vmul.f32 1.442695, %v2009_v30 }
 0x2ea   : > { %v1773_v32 = vand.u32 2147483647, %v4367_v25  ;;  %v1803_v23 = vadd.f32 1.0, %v1787_v62  ;;  %v4390_v35 = vpop.eup %2563  ;;  %v2011_v26 = vmul.f32 %v1995_v56, %v1771_v48  ;;  %vm2093_vm4 = vcmp.ge.f32.partialorder %v4367_v25, 0.0 }
 0x2eb   : > { %v4381_v55 = vpop.trf.xlu0  ;;  %v1845_v61 = vmul.f32 1.0614054, %v4390_v35  ;;  %v1875_v31 = vmul.f32 %v4369_v20, %v1859_v5  ;;  %v1905_v62 = vmul.f32 %v4340_v54, %v1889_v2 }
 0x2ec   : > { %v1789_v21 = vmul.f32 0.3275911, %v1773_v32  ;;  %v4388_v7 = vmul.f32 0.70710677, %v4381_v55  ;;  %2571 = vrcp.f32 %v1803_v23  ;;  %v1997_v59 = vsub.f32 0.0, %v1773_v32 }
 0x2ed   : > { %2573 = vpow2.f32 %v2022_v50  ;;  %v1861_v38 = vadd.f32 -1.4531521, %v1845_v61  ;;  %v1891_v57 = vadd.f32 1.4214138, %v1875_v31  ;;  %v2030_v50 = vmul.f32 1.442695, %v2007_v36 }
 0x2ee   : > { %v1805_v17 = vadd.f32 1.0, %v1789_v21  ;;  %v1775_v15 = vand.u32 2147483647, %v4388_v7  ;;  %v4399_v22 = vpop.eup %2565  ;;  %v1921_v21 = vadd.f32 -0.28449672, %v1905_v62  ;;  %vm2095_vm5 = vcmp.ge.f32.partialorder %v4388_v7, 0.0 }
 0x2ef   : > { %v1847_v14 = vmul.f32 1.0614054, %v4399_v22  ;;  %v1877_v9 = vmul.f32 %v4390_v35, %v1861_v38  ;;  %v1907_v23 = vmul.f32 %v4369_v20, %v1891_v57  ;;  %v2038_v56 = vmul.f32 1.442695, %v2011_v26  ;;  %v2160_v7 = vld [vmem:[%s4564_s3] sm:$0xff] }
 0x2f0   : > { %2575 = vrcp.f32 %v1805_v17  ;;  %v1791_v6 = vmul.f32 0.3275911, %v1775_v15  ;;  %v2013_v17 = vmul.f32 %v1997_v59, %v1773_v32  ;;  %v1999_v30 = vsub.f32 0.0, %v1775_v15 }
 0x2f1   : > { %2577 = vpow2.f32 %v2026_v47  ;;  %v1863_v42 = vadd.f32 -1.4531521, %v1847_v14  ;;  %v1893_v52 = vadd.f32 1.4214138, %v1877_v9  ;;  %v1923_v61 = vadd.f32 -0.28449672, %v1907_v23 }
 0x2f2   : > { %v1807_v44 = vadd.f32 1.0, %v1791_v6  ;;  %v4404_v58 = vpop.eup %2567  ;;  %v1937_v47 = vmul.f32 %v4340_v54, %v1921_v21  ;;  %v2042_v62 = vmul.f32 1.442695, %v2013_v17  ;;  %v1743_v25 = vmul.f32 0.5, %v4381_v55  ;;  %v2161_v55 = vld [vmem:[%s4564_s3 + $0x8] sm:$0xff] }
 0x2f3   : > { %v1849_v5 = vmul.f32 1.0614054, %v4404_v58  ;;  %v1879_v48 = vmul.f32 %v4399_v22, %v1863_v42  ;;  %v2570_v36 = vpop.eup %2569  ;;  %v1909_v31 = vmul.f32 %v4390_v35, %v1893_v52  ;;  %v1939_v14 = vmul.f32 %v4369_v20, %v1923_v61 }
 0x2f4   : > { %2579 = vrcp.f32 %v1807_v44  ;;  %v1953_v32 = vadd.f32 0.2548296, %v1937_v47 }
 0x2f5   : > { %2581 = vpow2.f32 %v2030_v50  ;;  %v1865_v2 = vadd.f32 -1.4531521, %v1849_v5  ;;  %v1895_v6 = vadd.f32 1.4214138, %v1879_v48  ;;  %v1925_v59 = vadd.f32 -0.28449672, %v1909_v31 }
 0x2f6   : > { %v4411_v38 = vpop.eup %2571  ;;  %2583 = vpow2.f32 %v2034_v24  ;;  %v1955_v44 = vadd.f32 0.2548296, %v1939_v14  ;;  %v1969_v42 = vmul.f32 %v4340_v54, %v1953_v32  ;;  %v2015_v5 = vmul.f32 %v1999_v30, %v1775_v15 }
 0x2f7   : > { %v1881_v57 = vmul.f32 %v4404_v58, %v1865_v2  ;;  %v1851_v26 = vmul.f32 1.0614054, %v4411_v38  ;;  %v2574_v9 = vpop.eup %2573  ;;  %v1911_v50 = vmul.f32 %v4399_v22, %v1895_v6  ;;  %2585 = vpow2.f32 %v2038_v56 }
 0x2f8   : > { %v1941_v24 = vmul.f32 %v4390_v35, %v1925_v59  ;;  %v1971_v61 = vmul.f32 %v4369_v20, %v1955_v44  ;;  %v2049_v47 = vmul.f32 %v2570_v36, %v1969_v42  ;;  %2587 = vpow2.f32 %v2042_v62 }
 0x2f9   : > { %v1897_v21 = vadd.f32 1.4214138, %v1881_v57  ;;  %v1867_v52 = vadd.f32 -1.4531521, %v1851_v26  ;;  %v1927_v48 = vadd.f32 -0.28449672, %v1911_v50 }
 0x2fa   : > { %v4419_v23 = vpop.eup %2575  ;;  %v1957_v56 = vadd.f32 0.2548296, %v1941_v24  ;;  %v2051_v32 = vmul.f32 %v2574_v9, %v1971_v61  ;;  %v2065_v15 = vsub.f32 1.0, %v2049_v47  ;;  %v2046_v57 = vmul.f32 1.442695, %v2015_v5 }
 0x2fb   : > { %v1853_v17 = vmul.f32 1.0614054, %v4419_v23  ;;  %v2578_v31 = vpop.eup %2577  ;;  %v1913_v2 = vmul.f32 %v4404_v58, %v1897_v21  ;;  %v1883_v54 = vmul.f32 %v4411_v38, %v1867_v52  ;;  %v1943_v6 = vmul.f32 %v4399_v22, %v1927_v48 }
 0x2fc   : > { %v1973_v59 = vmul.f32 %v4390_v35, %v1957_v56  ;;  %v2067_v62 = vsub.f32 1.0, %v2051_v32  ;;  %v2097_v52 = vsub.f32 0.0, %v2065_v15  ;;  %2589 = vpow2.f32 %v2046_v57 }
 0x2fd   : > { %v1869_v14 = vadd.f32 -1.4531521, %v1853_v17  ;;  %v1929_v20 = vadd.f32 -0.28449672, %v1913_v2  ;;  %v1899_v36 = vadd.f32 1.4214138, %v1883_v54 }
 0x2fe   : > { %v4429_v30 = vpop.eup %2579  ;;  %v1959_v26 = vadd.f32 0.2548296, %v1943_v6  ;;  %v2053_v24 = vmul.f32 %v2578_v31, %v1973_v59  ;;  %v2099_v61 = vsub.f32 0.0, %v2067_v62  ;;  %v2113_v54 = vsel %vm2081_vm11, %v2065_v15, %v2097_v52 }
 0x2ff   : > { %v1885_v50 = vmul.f32 %v4419_v23, %v1869_v14  ;;  %v1855_v44 = vmul.f32 1.0614054, %v4429_v30  ;;  %v2582_v42 = vpop.eup %2581  ;;  %v1945_v9 = vmul.f32 %v4404_v58, %v1929_v20  ;;  %v1915_v21 = vmul.f32 %v4411_v38, %v1899_v36 }
 0x300   : > { %v2584_v48 = vpop.eup %2583  ;;  %v1975_v35 = vmul.f32 %v4399_v22, %v1959_v26  ;;  %v2069_v47 = vsub.f32 1.0, %v2053_v24  ;;  %v2115_v59 = vsel %vm2083_vm12, %v2067_v62, %v2099_v61  ;;  %v2129_v26 = vadd.f32 1.0, %v2113_v54 }
 0x301   : > { %v1901_v17 = vadd.f32 1.4214138, %v1885_v50  ;;  %v1871_v5 = vadd.f32 -1.4531521, %v1855_v44  ;;  %v1961_v56 = vadd.f32 0.2548296, %v1945_v9  ;;  %v2586_v31 = vpop.eup %2585 }
 0x302   : > { %v1931_v2 = vadd.f32 -0.28449672, %v1915_v21  ;;  %v2055_v6 = vmul.f32 %v2582_v42, %v1975_v35  ;;  %v2101_v20 = vsub.f32 0.0, %v2069_v47  ;;  %v2131_v46 = vadd.f32 1.0, %v2115_v59  ;;  %v2588_v15 = vpop.eup %2587 }
 0x303   : > { %v1917_v14 = vmul.f32 %v4419_v23, %v1901_v17  ;;  %v1887_v32 = vmul.f32 %v4429_v30, %v1871_v5  ;;  %v1977_v22 = vmul.f32 %v4404_v58, %v1961_v56  ;;  %v2145_v52 = vmul.f32 %v2129_v26, %v4334_v41 }
 0x304   : > { %v1947_v36 = vmul.f32 %v4411_v38, %v1931_v2  ;;  %v2071_v50 = vsub.f32 1.0, %v2055_v6  ;;  %v2117_v42 = vsel %vm2085_vm13, %v2069_v47, %v2101_v20  ;;  %v2147_v12 = vmul.f32 %v2131_v46, %v4363_v33 }
 0x305   : > { %v1933_v44 = vadd.f32 -0.28449672, %v1917_v14  ;;  %v1903_v24 = vadd.f32 1.4214138, %v1887_v32  ;;  %v2057_v9 = vmul.f32 %v2584_v48, %v1977_v22  ;;  %v2133_v35 = vadd.f32 1.0, %v2117_v42 }
 0x306   : > { %v1963_v21 = vadd.f32 0.2548296, %v1947_v36  ;;  %v2103_v53 = vsub.f32 0.0, %v2071_v50  ;;  %v2078_v48 = vsub.f32 1.0, %v4385_v1  ;;  %v2396_v6 = vpack.c.bf16 %v2147_v12, %v2145_v52  ;;  %v2590_v26 = vpop.eup %2589  ;;  %v2163_v12 = vld [vmem:[%s4564_s3 + $0x18] sm:$0xff] }
 0x307   : > { %v1949_v58 = vmul.f32 %v4419_v23, %v1933_v44  ;;  %v1919_v62 = vmul.f32 %v4429_v30, %v1903_v24  ;;  %v2073_v17 = vsub.f32 1.0, %v2057_v9  ;;  %v2136_v14 = vadd.f32 1.0, %v4356_v43 }
 0x308   : > { %v1979_v5 = vmul.f32 %v4411_v38, %v1963_v21  ;;  %v2119_v57 = vsel %vm2087_vm14, %v2071_v50, %v2103_v53  ;;  %v2149_v33 = vmul.f32 %v2133_v35, %v4378_v27  ;;  %2397 = vmatprep.subr.bf16.mxu1 %v2396_v6  ;;  %v2138_v59 = vadd.f32 1.0, %v4373_v39 }
 0x309   : > { %v1965_v61 = vadd.f32 0.2548296, %v1949_v58  ;;  %v1935_v47 = vadd.f32 -0.28449672, %v1919_v62  ;;  %v2135_v56 = vadd.f32 1.0, %v2119_v57  ;;  %v2105_v2 = vsub.f32 0.0, %v2073_v17  ;;  %2399 = vmatpush1.bf16.msra.mxu1 %v2398_v29 }
 0x30a   : > { %v2059_v54 = vmul.f32 %v2586_v31, %v1979_v5  ;;  %v2108_v43 = vsub.f32 0.0, %v2076_v0  ;;  %v2110_v27 = vsub.f32 0.0, %v2078_v48  ;;  %v2152_v50 = vmul.f32 %v2136_v14, %v4300_v4  ;;  %v2162_v5 = vld [vmem:[%s4564_s3 + $0x10] sm:$0xff] }
 0x30b   : > { %v1981_v41 = vmul.f32 %v4419_v23, %v1965_v61  ;;  %v1951_v38 = vmul.f32 %v4429_v30, %v1935_v47  ;;  %v2151_v1 = vmul.f32 %v2135_v56, %v4397_v16  ;;  %v2121_v63 = vsel %vm2089_vm2, %v2073_v17, %v2105_v2 }
 0x30c   : > { %v2075_v32 = vsub.f32 1.0, %v2059_v54  ;;  %v2137_v22 = vadd.f32 1.0, %v2121_v63  ;;  %v2154_v24 = vmul.f32 %v2138_v59, %v4304_v60  ;;  %v2124_v37 = vsel %vm2092_vm15, %v2076_v0, %v2108_v43 }
 0x30d   : > { %v2061_v20 = vmul.f32 %v2588_v15, %v1981_v41  ;;  %v1967_v31 = vadd.f32 0.2548296, %v1951_v38  ;;  %v2400_v16 = vpack.c.bf16 %v2151_v1, %v2149_v33  ;;  %v2126_v4 = vsel %vm2094_vm0, %v2078_v48, %v2110_v27 }
 0x30e   : > { %v2107_v23 = vsub.f32 0.0, %v2075_v32  ;;  %v2153_v19 = vmul.f32 %v2137_v22, %v1737_v18  ;;  %v1740_v15 = vmul.f32 0.5, %v4177_v28  ;;  %v1742_v42 = vmul.f32 0.5, %v4190_v34 }
 0x30f   : > { %v2077_v36 = vsub.f32 1.0, %v2061_v20  ;;  %v1983_v39 = vmul.f32 %v4429_v30, %v1967_v31  ;;  %2401 = vmatprep.subr.bf16.mxu1 %v2400_v16  ;;  %v2140_v9 = vadd.f32 1.0, %v2124_v37  ;;  %v2142_v60 = vadd.f32 1.0, %v2126_v4 }
 0x310   : > { %v2123_v8 = vsel %vm2091_vm3, %v2075_v32, %v2107_v23  ;;  %2403 = vmatpush1.bf16.msra.mxu1 %v2402_v40  ;;  %v2406_v3 = vpack.c.bf16 %v2154_v24, %v2152_v50  ;;  %v1741_v0 = vmul.f32 0.5, %v4359_v45  ;;  %v4671_v45 = vmov 0.0  }
 0x311   : > { %v2139_v29 = vadd.f32 1.0, %v2123_v8  ;;  %v2109_v11 = vsub.f32 0.0, %v2077_v36  ;;  %v2063_v44 = vmul.f32 %v2590_v26, %v1983_v39  ;;  %v2156_v62 = vmul.f32 %v2140_v9, %v1740_v15 }
 0x312   : > { %v2158_v28 = vmul.f32 %v2142_v60, %v1742_v42 }
 0x313   : > { %v2155_v30 = vmul.f32 %v2139_v29, %v1739_v13  ;;  %v2125_v46 = vsel %vm2093_vm4, %v2077_v36, %v2109_v11  ;;  %v2079_v49 = vsub.f32 1.0, %v2063_v44 }
 0x314   : > { %v2141_v53 = vadd.f32 1.0, %v2125_v46  ;;  %v2410_v17 = vpack.c.bf16 %v2158_v28, %v2156_v62 }
 0x315   : > { %v2111_v21 = vsub.f32 0.0, %v2079_v49  ;;  %v2404_v51 = vpack.c.bf16 %v2155_v30, %v2153_v19 }
 0x316   : > { %v2157_v52 = vmul.f32 %v2141_v53, %v1741_v0 }
 0x317   : > { %v2127_v10 = vsel %vm2095_vm5, %v2079_v49, %v2111_v21  ;;  %2405 = vmatprep.subr.bf16.mxu1 %v2404_v51 }
 0x318   : > { %v2143_v58 = vadd.f32 1.0, %v2127_v10  ;;  %2407 = vmatpush1.bf16.msra.mxu1 %v2406_v3 }
 0x31a   : > { %v2159_v34 = vmul.f32 %v2143_v58, %v1743_v25 }
 0x31c   : > { %v2408_v35 = vpack.c.bf16 %v2159_v34, %v2157_v52 }
 0x31e   : > { %2409 = vmatprep.subr.bf16.mxu1 %v2408_v35 }
 0x31f   : > { %2411 = vmatpush1.bf16.msra.mxu1 %v2410_v17 }
 0x322   : > { %2377 = vmatmul.mubr.msk.f32.vlgmr.msra.gmra.mrb[0].mxu1 %vm866_vm1, %v2160_v7 }
 0x323   : > { %2246 = vmatprep.mubr.f32.mxu1 %v4671_v45 }
 0x326   : > { %2378 = vmatmul.mubr.msk.f32.gmra.mrb[2].mxu1 %vm866_vm1, %v2161_v55 }
 0x327   : > { %2252 = vmatprep.mubr.f32.mxu1 %v4671_v45 }
 0x32a   : > { %2379 = vmatmul.mubr.msk.f32.gmra.mrb[4].mxu1 %vm866_vm1, %v2162_v5 }
 0x32b   : > { %2258 = vmatprep.mubr.f32.mxu1 %v4671_v45 }
 0x32e   : > { %2380 = vmatmul.mubr.msk.f32.gmra.mrb[6].mxu1 %vm866_vm1, %v2163_v12 }
 0x3f5   : > { %v2242_v48 = vpop.f32.mrb[0].mxu1 }
 0x3f6   : > { %2265 = vst [vmem:[%s215_s26] sm:$0xff] %v2242_v48  ;;  %v2244_v57 = vpop.f32.mrb[1].mxu1 }
 0x3f7   : > { %2266 = vst [vmem:[%s215_s26 + $0x8] sm:$0xff] %v2244_v57 }
 0x3f9   : > { %v2248_v61 = vpop.f32.mrb[2].mxu1 }
 0x3fa   : > { %2267 = vst [vmem:[%s215_s26 + $0x10] sm:$0xff] %v2248_v61  ;;  %v2250_v47 = vpop.f32.mrb[3].mxu1 }
 0x3fb   : > { %2268 = vst [vmem:[%s215_s26 + $0x18] sm:$0xff] %v2250_v47 }
 0x3fd   : > { %v2254_v56 = vpop.f32.mrb[4].mxu1 }
 0x3fe   : > { %2269 = vst [vmem:[%s215_s26 + $0x20] sm:$0xff] %v2254_v56  ;;  %v2256_v2 = vpop.f32.mrb[5].mxu1 }
 0x3ff   : > { %2270 = vst [vmem:[%s215_s26 + $0x28] sm:$0xff] %v2256_v2 }
 0x401   : > { %v2260_v54 = vpop.f32.mrb[6].mxu1 }
 0x402   : > { %2271 = vst [vmem:[%s215_s26 + $0x30] sm:$0xff] %v2260_v54  ;;  %v2262_v6 = vpop.f32.mrb[7].mxu1 }
 0x403   : > { %2272 = vst [vmem:[%s215_s26 + $0x38] sm:$0xff] %v2262_v6 }
 0x404   : > { %2634 = shalt.err (!%p2631_p2)
}
 0x405   : > { %s2635_s5 = scalar_lea.hbm %s4517_s12, 1024  ;;  %s2639_s9 = scalar_lea.hbm %s4565_s4, 2048 }
 0x406   : > { %p2636_p4 = scmp.ne.s32.totalorder %s4517_s12, %s2635_s5  ;;  %p2640_p9 = scmp.lt.u32.totalorder %s4517_s12, %s4565_s4 }
 0x407   : > { %p2641_p1 = scmp.lt.u32.totalorder %s2639_s9, %s2635_s5  ;;  %p2643_p6 = scmp.lt.u32.totalorder %s2635_s5, %s4517_s12 }
 0x408   : > { %p2637_p5 = pnand %p2636_p4, %p4672_p11 }
 0x409   : > { %p2642_p3 = por %p2641_p1, %p2640_p9 }
 0x40a   : > { %p2638_p7 = pneg %p2637_p5 }
 0x40b   : > { %p2644_p12 = por %p2643_p6, %p2642_p3 }
 0x40d   : > { %p2645_p13 = pnand %p2644_p12, %p2638_p7 }
 0x40f   : > { %2648 = shalt.err (!%p2645_p13)
}
 0x410   : > { %s2694_s26 = smov 256   ;;  %s2695_s10 = smov 16  }
 0x411   : > { %2414 = dma.vmem_to_hbm [thread:$0]  (%p4672_p11), %s4512_s8, 1024, %s4517_s12, %s2274_s23, %s2694_s26, %s2694_s26, %s2695_s10  }
 0x412 PF: > { %s2302_s14 = sand.u32 1, %s2675_s15   ;;  %p4673_p8 = scmp.ne.s32.totalorder %s4596_s28, 0 }
 0x413   : > { %p4674_p10 = scmp.ge.s32.totalorder %s2687_s18, 2  ;;  %s2303_s11 = scalar_lea.sflag [#allocation5], %s2302_s14 }
 0x415   : > { %p2421_p0 = pnand %p4674_p10, %p4673_p8 }
 0x417   : > { %2670 = dma.done.wait (!%p2421_p0), %s2303_s11, 1024  }
 0x418   : > { %2672 = vsyncadd (!%p2421_p0), %s2303_s11, 4294966272  ;;  %p17_p2 = scmp.ge.s32.totalorder %s2746_s21, 4   ;;  %s4675_s15 = smov %s2679_s16 }
 0x419   : > { %s4676_s16 = smov %s2683_s17  ;;  %s4677_s17 = smov %s2758_s24 }
 0x41a   : > { %s4678_s18 = smov %s2746_s21  ;;  %19 = sbr.rel (!%p17_p2) target bundleno = 5 (0x5), region = 83 }
 0x421   :  { %2308 = vsyncpa [#allocation4], 1 }
 0x422   :  { %2310 = vsyncpa [#allocation4 + $0x1], 1 }
 0x423   :  { %2311 = vsyncpa [#allocation5], 1 }
 0x424   :  { %2313 = vsyncpa [#allocation5 + $0x1], 1 }

</bundles_post_ra>
